<compile_context>
chip_gen: v7x
topology: tpu7x:2x2x1
jax: 0.10.0
libtpu: 0.0.40
codegen_flags: <defaults>
</compile_context>

<pallas_src>
import functools
import numpy as np
import jax
import jax.numpy as jnp
from jax import lax
from jax.experimental import pallas as pl
from jax.experimental.pallas import tpu as pltpu

MP_SILU_SCALE = 1.0 / 0.596
RES_BALANCE = 0.3
CLIP_ACT = 256.0


def _mp_silu_in_kernel(x):
    # x * sigmoid(x) / 0.596 ; the reciprocal lands on the (otherwise idle) EUP slot.
    return x * pl.reciprocal(1.0 + jnp.exp(-x), approx=True) * MP_SILU_SCALE


# ----------------------------- fused Pallas kernel ----------------------------

def block_kernel(x_ref, wb0_ref, wb1_ref, c_ref, o_ref, s_ref, y_ref, *,
                 T, H, kT, kH, t_bal, clip_act):
    """Whole residual branch for one batch element; mid activation stays in VMEM.

    x_ref  : (1, Tp, Hp, W*Cin)      bf16  zero-padded input slab (causal T, 'same' H)
    wb0_ref: (kT*kH, W*Cin,  W*Cmid) bf16  banded conv_res0 weights (kW + W-pad in lanes)
    wb1_ref: (kT*kH, W*Cmid, W*Cout) bf16  banded conv_res1 weights
    c_ref  : (1, 1, W*Cmid)          f32   emb modulation, tiled across W
    o_ref  : (1, T*H, W*Cout)        f32   lane/sublane-dense output slab
    s_ref  : (Tp*Hp, W*Cin)          bf16  scratch: mp_silu(x) padded slab
    y_ref  : (Tp*Hp, W*Cmid)         bf16  scratch: padded mid activation slab
    """
    Tp, Hp, K0 = x_ref.shape[1], x_ref.shape[2], x_ref.shape[3]
    N0 = wb0_ref.shape[-1]
    N1 = wb1_ref.shape[-1]
    ph = kH // 2
    M = T * Hp

    # --- mp_silu(x) once into VMEM (silu(0)=0 keeps the zero halo valid) -------------
    xv = x_ref[0].astype(jnp.float32)                                      # (Tp, Hp, K0)
    s_ref[...] = _mp_silu_in_kernel(xv).reshape(Tp * Hp, K0).astype(jnp.bfloat16)

    # --- conv_res0: one MXU dot per (kt, kh) tap, M = T*Hp rows ----------------------
    acc0 = jnp.zeros((T, H, N0), jnp.float32)
    for kt in range(kT):
        lhs = s_ref[kt * Hp:kt * Hp + M, :]                                # (M, K0) bf16
        for kh in range(kH):
            prod = jnp.dot(lhs, wb0_ref[kt * kH + kh],
                           preferred_element_type=jnp.float32)             # (M, N0) f32
            acc0 = acc0 + prod.reshape(T, Hp, N0)[:, kh:kh + H, :]

    # --- emb modulation + mp_silu -> zero-padded mid slab (VMEM only, no HBM) --------
    mid = _mp_silu_in_kernel(acc0 * c_ref[0]).astype(jnp.bfloat16)         # (T, H, N0)
    y_ref[...] = jnp.zeros_like(y_ref)                                     # zero T/H halo
    for t in range(T):
        r = (kT - 1 + t) * Hp + ph
        y_ref[r:r + H, :] = mid[t]

    # --- conv_res1 --------------------------------------------------------------------
    acc1 = jnp.zeros((T, H, N1), jnp.float32)
    for kt in range(kT):
        lhs = y_ref[kt * Hp:kt * Hp + M, :]                                # (M, N0) bf16
        for kh in range(kH):
            prod = jnp.dot(lhs, wb1_ref[kt * kH + kh],
                           preferred_element_type=jnp.float32)             # (M, N1) f32
            acc1 = acc1 + prod.reshape(T, Hp, N1)[:, kh:kh + H, :]

    # --- mp_sum(x, y, t) + clip; residual re-read from the resident padded slab ------
    inv = 1.0 / float(np.sqrt((1.0 - t_bal) ** 2 + t_bal ** 2))
    xres = x_ref[0, kT - 1:, ph:ph + H, :].astype(jnp.float32)             # (T, H, N1)
    out = (xres * (1.0 - t_bal) + acc1 * t_bal) * inv
    o_ref[0] = jnp.clip(out, -clip_act, clip_act).reshape(T * H, N1)


# ----------------------------- pallas_call wrapper ----------------------------

def pallas_block(x_pad, wb0, wb1, c_tiled, *, T, H, kT, kH, t_bal, clip_act):
    B, Tp, Hp, K0 = x_pad.shape
    nb, _, N0 = wb0.shape
    _, K1, N1 = wb1.shape
    assert K1 == N0
    kernel = functools.partial(block_kernel, T=T, H=H, kT=kT, kH=kH,
                               t_bal=t_bal, clip_act=clip_act)
    return pl.pallas_call(
        kernel,
        out_shape=jax.ShapeDtypeStruct((B, T * H, N1), jnp.float32),
        grid=(B,),
        in_specs=[
            pl.BlockSpec((1, Tp, Hp, K0), lambda b: (b, 0, 0, 0)),
            # Resident weights (constant index_map).  TODO(synk): tile W / single-buffer
            # these for production channel counts so v7x's 64 MiB VMEM is not exceeded.
            pl.BlockSpec((nb, K0, N0), lambda b: (0, 0, 0)),
            pl.BlockSpec((nb, N0, N1), lambda b: (0, 0, 0)),
            pl.BlockSpec((1, 1, N0), lambda b: (b, 0, 0)),
        ],
        out_specs=pl.BlockSpec((1, T * H, N1), lambda b: (b, 0, 0)),
        scratch_shapes=[
            pltpu.VMEM((Tp * Hp, K0), jnp.bfloat16),   # mp_silu(x) slab
            pltpu.VMEM((Tp * Hp, N0), jnp.bfloat16),   # padded mid activation slab
        ],
        compiler_params=pltpu.CompilerParams(dimension_semantics=("parallel",)),
    )(x_pad, wb0, wb1, c_tiled)


# ----------------------------- glue (params / layout) -------------------------

def mp_weight(w, gain=1.0, eps=1e-4):
    """EDM2 magnitude-preserving weight: per-filter normalize, scale by gain/sqrt(fan_in)."""
    fan_in = int(np.prod(w.shape[1:]))
    norm = jnp.sqrt(jnp.sum(w.astype(jnp.float32) ** 2,
                            axis=tuple(range(1, w.ndim)), keepdims=True))
    w_n = w / (eps + norm / np.sqrt(fan_in))
    return w_n * (gain / np.sqrt(fan_in))


def build_banded(w_n, W):
    """(Cout, Cin, kT, kH, kW) -> (kT*kH, W*Cin, W*Cout) banded matrices.

    kW taps AND the 'same' W padding are folded into the lane dim:
      wb[kt*kH+kh][w_in*Cin + ci, w_out*Cout + co] = w_n[co, ci, kt, kh, w_in - w_out + kW//2]
    when 0 <= w_in - w_out + kW//2 < kW, zero otherwise (boundary taps fall off the band).
    """
    Cout, Cin, kT, kH, kW = w_n.shape
    pw = kW // 2
    w_t = jnp.transpose(w_n, (2, 3, 4, 1, 0))                      # (kT,kH,kW,Cin,Cout)
    wi = np.arange(W)[:, None]
    wo = np.arange(W)[None, :]
    sel = np.stack([(wi - wo + pw) == kw for kw in range(kW)], 0).astype(np.float32)
    wb = jnp.einsum('kab,thkcd->thacbd', jnp.asarray(sel), w_t, precision='highest')
    return wb.reshape(kT * kH, W * Cin, W * Cout)


# ----------------------------- Block forward ----------------------------------

def block_forward_pallas(x, emb5, params, *, res_balance=RES_BALANCE, clip_act=CLIP_ACT):
    """x: (B, C, T, H, W) f32; emb5: (B, emb_ch, 1, 1, 1) f32.  NCDHW in/out."""
    B, C, T, H, W = x.shape
    Cmid = params["w0"].shape[0]
    Cout = params["w1"].shape[0]
    kT, kH, kW = params["w0"].shape[2:]
    assert C == Cout, "no skip-conv path: in_channels must equal out_channels"
    ph = kH // 2
    Tp, Hp = T + kT - 1, H + 2 * ph

    # Magnitude-preserving weights -> banded bf16 matrices (kW + W-pad folded into lanes).
    wb0 = build_banded(mp_weight(params["w0"]), W).astype(jnp.bfloat16)  # (kT*kH, W*C,    W*Cmid)
    wb1 = build_banded(mp_weight(params["w1"]), W).astype(jnp.bfloat16)  # (kT*kH, W*Cmid, W*Cout)

    # c = emb_linear(emb, gain=emb_gain) + 1 — tiny GEMV in plain JAX (no extra launch).
    w_emb = mp_weight(params["w_emb"], gain=params["emb_gain"])          # (Cmid, E, 1,1,1)
    w_emb_mat = w_emb.reshape(Cmid, -1).T                                # (E, Cmid)
    c = emb5.reshape(B, -1).astype(jnp.float32) @ w_emb_mat + 1.0        # (B, Cmid)
    c_tiled = jnp.tile(c, (1, W)).reshape(B, 1, W * Cmid)                # lane = w*Cmid + co

    # Channel-last, T/H zero-padded slab with W folded into lanes (no W padding needed).
    # TODO(synk): keep activations channel-last across consecutive Blocks to avoid the
    #             per-block transpose/pad glue passes over HBM.
    x_cl = jnp.transpose(x, (0, 2, 3, 4, 1))                             # (B,T,H,W,C)
    x_pad = jnp.pad(x_cl, ((0, 0), (kT - 1, 0), (ph, ph), (0, 0), (0, 0)))
    x_pad = x_pad.reshape(B, Tp, Hp, W * C).astype(jnp.bfloat16)

    out = pallas_block(x_pad, wb0, wb1, c_tiled, T=T, H=H, kT=kT, kH=kH,
                       t_bal=res_balance, clip_act=clip_act)             # (B, T*H, W*Cout) f32

    return jnp.transpose(out.reshape(B, T, H, W, Cout), (0, 4, 1, 2, 3))  # back to NCDHW


# ----------------------------- pure-JAX reference ------------------------------

def block_forward_ref(x, emb5, params):
    dn = ("NCDHW", "OIDHW", "NCDHW")
    t = RES_BALANCE
    silu = lambda v: v * (1.0 / (1.0 + jnp.exp(-v))) * MP_SILU_SCALE
    w0 = mp_weight(params["w0"])
    w1 = mp_weight(params["w1"])
    w_emb = mp_weight(params["w_emb"], gain=params["emb_gain"])
    s = silu(x)
    y = lax.conv_general_dilated(s, w0, (1, 1, 1), padding=((1, 0), (1, 1), (1, 1)),
                                 dimension_numbers=dn, precision="highest")
    c = lax.conv_general_dilated(emb5, w_emb, (1, 1, 1), padding=((0, 0), (0, 0), (0, 0)),
                                 dimension_numbers=dn, precision="highest") + 1.0
    y = silu(y * c)
    y = lax.conv_general_dilated(y, w1, (1, 1, 1), padding=((1, 0), (1, 1), (1, 1)),
                                 dimension_numbers=dn, precision="highest")
    out = (x * (1.0 - t) + y * t) / np.sqrt((1.0 - t) ** 2 + t ** 2)
    return jnp.clip(out, -CLIP_ACT, CLIP_ACT)


# ----------------------------- main --------------------------------------------

if __name__ == "__main__":
    B, C_in, C_out, E = 2, 32, 32, 16      # in_channels == out_channels (no skip conv)
    T, H, W = 4, 8, 8                      # W * C = 256 -> lane-dense tiles
    mlp_multiplier = 1
    C_mid = C_out * mlp_multiplier

    key = jax.random.PRNGKey(0)
    kx, ke, k0, k1, kemb = jax.random.split(key, 5)
    x = jax.random.normal(kx, (B, C_in, T, H, W), dtype=jnp.float32)
    emb = jax.random.normal(ke, (B, E, 1, 1, 1), dtype=jnp.float32)

    params = {
        "w0": jax.random.normal(k0, (C_mid, C_in, 2, 3, 3), dtype=jnp.float32),
        "w1": jax.random.normal(k1, (C_out, C_mid, 2, 3, 3), dtype=jnp.float32),
        "w_emb": jax.random.normal(kemb, (C_mid, E, 1, 1, 1), dtype=jnp.float32),
        "emb_gain": jnp.float32(0.25),     # nonzero to exercise the modulation path
    }

    out = jax.block_until_ready(jax.jit(block_forward_pallas)(x, emb, params))
    ref = jax.block_until_ready(jax.jit(block_forward_ref)(x, emb, params))

    err = float(jnp.max(jnp.abs(out - ref)))
    assert out.shape == (B, C_out, T, H, W), out.shape
    # bf16 MXU operands end-to-end (incl. the residual slab) + approx EUP reciprocal in
    # the sigmoid, with f32 accumulation -> small rounding vs the f32 reference.
    assert err < 1e-1, f"max abs err {err}"
    print("KERNEL_OK")
</pallas_src>

<mosaic_0001>
module attributes {stable_mosaic.version = 11 : i64} {
  func.func @block_kernel(%arg0: i32, %arg1: memref<1x5x10x256xbf16, #tpu.memory_space<vmem>>, %arg2: memref<6x256x256xbf16, #tpu.memory_space<vmem>>, %arg3: memref<6x256x256xbf16, #tpu.memory_space<vmem>>, %arg4: memref<1x1x256xf32, #tpu.memory_space<vmem>>, %arg5: memref<1x32x256xf32, #tpu.memory_space<vmem>>, %arg6: memref<50x256xbf16, #tpu.memory_space<vmem>>, %arg7: memref<50x256xbf16, #tpu.memory_space<vmem>>) attributes {dimension_semantics = [#tpu.dimension_semantics<parallel>], iteration_bounds = array<i64: 2>, scalar_prefetch = 0 : i64, scratch_operands = 2 : i64, tpu.core_type = #tpu.core_type<tc>, window_params = [{transform_indices = @transform_0, window_bounds = array<i64: 1, 5, 10, 256>}, {pipeline_mode = #tpu.pipeline_mode<synchronous>, transform_indices = @transform_1, window_bounds = array<i64: 6, 256, 256>}, {pipeline_mode = #tpu.pipeline_mode<synchronous>, transform_indices = @transform_2, window_bounds = array<i64: 6, 256, 256>}, {transform_indices = @transform_3, window_bounds = array<i64: 1, 1, 256>}, {transform_indices = @transform_4, window_bounds = array<i64: 1, 32, 256>}]} {
    %c0 = arith.constant 0 : index
    %c0_0 = arith.constant 0 : index
    %c0_1 = arith.constant 0 : index
    %c0_2 = arith.constant 0 : index
    %0 = vector.load %arg1[%c0, %c0_0, %c0_1, %c0_2] : memref<1x5x10x256xbf16, #tpu.memory_space<vmem>>, vector<1x5x10x256xbf16>
    %1 = vector.shape_cast %0 : vector<1x5x10x256xbf16> to vector<5x10x256xbf16>
    %2 = arith.extf %1 : vector<5x10x256xbf16> to vector<5x10x256xf32>
    %cst = arith.constant 0.000000e+00 : f32
    %3 = vector.broadcast %cst : f32 to vector<5x10x256xf32>
    %4 = arith.subf %3, %2 : vector<5x10x256xf32>
    %5 = math.exp %4 : vector<5x10x256xf32>
    %cst_3 = arith.constant 1.000000e+00 : f32
    %6 = vector.broadcast %cst_3 : f32 to vector<5x10x256xf32>
    %7 = arith.addf %6, %5 : vector<5x10x256xf32>
    %8 = tpu.reciprocal %7 {approx = true} : vector<5x10x256xf32> -> vector<5x10x256xf32>
    %9 = arith.mulf %2, %8 : vector<5x10x256xf32>
    %cst_4 = arith.constant 1.67785239 : f32
    %10 = vector.broadcast %cst_4 : f32 to vector<5x10x256xf32>
    %11 = arith.mulf %9, %10 : vector<5x10x256xf32>
    %12 = vector.shape_cast %11 : vector<5x10x256xf32> to vector<50x256xf32>
    %13 = arith.truncf %12 : vector<50x256xf32> to vector<50x256xbf16>
    %c0_5 = arith.constant 0 : index
    %c0_6 = arith.constant 0 : index
    %14 = vector.load %arg6[%c0_5, %c0_6] : memref<50x256xbf16, #tpu.memory_space<vmem>>, vector<50x256xbf16>
    tpu.vector_store %arg6[%c0_5, %c0_6], %13 {strides = array<i32>} : memref<50x256xbf16, #tpu.memory_space<vmem>>, vector<50x256xbf16>,
    %cst_7 = arith.constant 0.000000e+00 : f32
    %15 = vector.broadcast %cst_7 : f32 to vector<4x8x256xf32>
    %c0_8 = arith.constant 0 : index
    %c0_9 = arith.constant 0 : index
    %16 = vector.load %arg6[%c0_8, %c0_9] : memref<50x256xbf16, #tpu.memory_space<vmem>>, vector<40x256xbf16>
    %c0_10 = arith.constant 0 : index
    %c0_11 = arith.constant 0 : index
    %c0_12 = arith.constant 0 : index
    %17 = vector.load %arg2[%c0_10, %c0_11, %c0_12] : memref<6x256x256xbf16, #tpu.memory_space<vmem>>, vector<1x256x256xbf16>
    %18 = vector.shape_cast %17 : vector<1x256x256xbf16> to vector<256x256xbf16>
    %cst_13 = arith.constant dense<0.000000e+00> : vector<40x256xf32>
    %19 = tpu.matmul %16, %18, %cst_13 {dimension_numbers = #tpu.dot_dimension_numbers<[1], [0], [0], [1], [0, 0, 1, 1], [], []>} : vector<40x256xbf16>, vector<256x256xbf16>, vector<40x256xf32> -> vector<40x256xf32>
    %20 = vector.shape_cast %19 : vector<40x256xf32> to vector<4x10x256xf32>
    %21 = vector.extract_strided_slice %20 {offsets = [0, 0, 0], sizes = [4, 8, 256], strides = [1, 1, 1]} : vector<4x10x256xf32> to vector<4x8x256xf32>
    %22 = arith.addf %15, %21 : vector<4x8x256xf32>
    %c1 = arith.constant 1 : index
    %c0_14 = arith.constant 0 : index
    %c0_15 = arith.constant 0 : index
    %23 = vector.load %arg2[%c1, %c0_14, %c0_15] : memref<6x256x256xbf16, #tpu.memory_space<vmem>>, vector<1x256x256xbf16>
    %24 = vector.shape_cast %23 : vector<1x256x256xbf16> to vector<256x256xbf16>
    %cst_16 = arith.constant dense<0.000000e+00> : vector<40x256xf32>
    %25 = tpu.matmul %16, %24, %cst_16 {dimension_numbers = #tpu.dot_dimension_numbers<[1], [0], [0], [1], [0, 0, 1, 1], [], []>} : vector<40x256xbf16>, vector<256x256xbf16>, vector<40x256xf32> -> vector<40x256xf32>
    %26 = vector.shape_cast %25 : vector<40x256xf32> to vector<4x10x256xf32>
    %27 = vector.extract_strided_slice %26 {offsets = [0, 1, 0], sizes = [4, 8, 256], strides = [1, 1, 1]} : vector<4x10x256xf32> to vector<4x8x256xf32>
    %28 = arith.addf %22, %27 : vector<4x8x256xf32>
    %c2 = arith.constant 2 : index
    %c0_17 = arith.constant 0 : index
    %c0_18 = arith.constant 0 : index
    %29 = vector.load %arg2[%c2, %c0_17, %c0_18] : memref<6x256x256xbf16, #tpu.memory_space<vmem>>, vector<1x256x256xbf16>
    %30 = vector.shape_cast %29 : vector<1x256x256xbf16> to vector<256x256xbf16>
    %cst_19 = arith.constant dense<0.000000e+00> : vector<40x256xf32>
    %31 = tpu.matmul %16, %30, %cst_19 {dimension_numbers = #tpu.dot_dimension_numbers<[1], [0], [0], [1], [0, 0, 1, 1], [], []>} : vector<40x256xbf16>, vector<256x256xbf16>, vector<40x256xf32> -> vector<40x256xf32>
    %32 = vector.shape_cast %31 : vector<40x256xf32> to vector<4x10x256xf32>
    %33 = vector.extract_strided_slice %32 {offsets = [0, 2, 0], sizes = [4, 8, 256], strides = [1, 1, 1]} : vector<4x10x256xf32> to vector<4x8x256xf32>
    %34 = arith.addf %28, %33 : vector<4x8x256xf32>
    %c10 = arith.constant 10 : index
    %c0_20 = arith.constant 0 : index
    %35 = vector.load %arg6[%c10, %c0_20] : memref<50x256xbf16, #tpu.memory_space<vmem>>, vector<40x256xbf16>
    %c3 = arith.constant 3 : index
    %c0_21 = arith.constant 0 : index
    %c0_22 = arith.constant 0 : index
    %36 = vector.load %arg2[%c3, %c0_21, %c0_22] : memref<6x256x256xbf16, #tpu.memory_space<vmem>>, vector<1x256x256xbf16>
    %37 = vector.shape_cast %36 : vector<1x256x256xbf16> to vector<256x256xbf16>
    %cst_23 = arith.constant dense<0.000000e+00> : vector<40x256xf32>
    %38 = tpu.matmul %35, %37, %cst_23 {dimension_numbers = #tpu.dot_dimension_numbers<[1], [0], [0], [1], [0, 0, 1, 1], [], []>} : vector<40x256xbf16>, vector<256x256xbf16>, vector<40x256xf32> -> vector<40x256xf32>
    %39 = vector.shape_cast %38 : vector<40x256xf32> to vector<4x10x256xf32>
    %40 = vector.extract_strided_slice %39 {offsets = [0, 0, 0], sizes = [4, 8, 256], strides = [1, 1, 1]} : vector<4x10x256xf32> to vector<4x8x256xf32>
    %41 = arith.addf %34, %40 : vector<4x8x256xf32>
    %c4 = arith.constant 4 : index
    %c0_24 = arith.constant 0 : index
    %c0_25 = arith.constant 0 : index
    %42 = vector.load %arg2[%c4, %c0_24, %c0_25] : memref<6x256x256xbf16, #tpu.memory_space<vmem>>, vector<1x256x256xbf16>
    %43 = vector.shape_cast %42 : vector<1x256x256xbf16> to vector<256x256xbf16>
    %cst_26 = arith.constant dense<0.000000e+00> : vector<40x256xf32>
    %44 = tpu.matmul %35, %43, %cst_26 {dimension_numbers = #tpu.dot_dimension_numbers<[1], [0], [0], [1], [0, 0, 1, 1], [], []>} : vector<40x256xbf16>, vector<256x256xbf16>, vector<40x256xf32> -> vector<40x256xf32>
    %45 = vector.shape_cast %44 : vector<40x256xf32> to vector<4x10x256xf32>
    %46 = vector.extract_strided_slice %45 {offsets = [0, 1, 0], sizes = [4, 8, 256], strides = [1, 1, 1]} : vector<4x10x256xf32> to vector<4x8x256xf32>
    %47 = arith.addf %41, %46 : vector<4x8x256xf32>
    %c5 = arith.constant 5 : index
    %c0_27 = arith.constant 0 : index
    %c0_28 = arith.constant 0 : index
    %48 = vector.load %arg2[%c5, %c0_27, %c0_28] : memref<6x256x256xbf16, #tpu.memory_space<vmem>>, vector<1x256x256xbf16>
    %49 = vector.shape_cast %48 : vector<1x256x256xbf16> to vector<256x256xbf16>
    %cst_29 = arith.constant dense<0.000000e+00> : vector<40x256xf32>
    %50 = tpu.matmul %35, %49, %cst_29 {dimension_numbers = #tpu.dot_dimension_numbers<[1], [0], [0], [1], [0, 0, 1, 1], [], []>} : vector<40x256xbf16>, vector<256x256xbf16>, vector<40x256xf32> -> vector<40x256xf32>
    %51 = vector.shape_cast %50 : vector<40x256xf32> to vector<4x10x256xf32>
    %52 = vector.extract_strided_slice %51 {offsets = [0, 2, 0], sizes = [4, 8, 256], strides = [1, 1, 1]} : vector<4x10x256xf32> to vector<4x8x256xf32>
    %53 = arith.addf %47, %52 : vector<4x8x256xf32>
    %c0_30 = arith.constant 0 : index
    %c0_31 = arith.constant 0 : index
    %c0_32 = arith.constant 0 : index
    %54 = vector.load %arg4[%c0_30, %c0_31, %c0_32] : memref<1x1x256xf32, #tpu.memory_space<vmem>>, vector<1x1x256xf32>
    %55 = vector.shape_cast %54 : vector<1x1x256xf32> to vector<1x256xf32>
    %56 = vector.shape_cast %55 : vector<1x256xf32> to vector<1x1x256xf32>
    %57 = vector.broadcast %56 : vector<1x1x256xf32> to vector<4x8x256xf32>
    %58 = arith.mulf %53, %57 : vector<4x8x256xf32>
    %cst_33 = arith.constant 0.000000e+00 : f32
    %59 = vector.broadcast %cst_33 : f32 to vector<4x8x256xf32>
    %60 = arith.subf %59, %58 : vector<4x8x256xf32>
    %61 = math.exp %60 : vector<4x8x256xf32>
    %cst_34 = arith.constant 1.000000e+00 : f32
    %62 = vector.broadcast %cst_34 : f32 to vector<4x8x256xf32>
    %63 = arith.addf %62, %61 : vector<4x8x256xf32>
    %64 = tpu.reciprocal %63 {approx = true} : vector<4x8x256xf32> -> vector<4x8x256xf32>
    %65 = arith.mulf %58, %64 : vector<4x8x256xf32>
    %cst_35 = arith.constant 1.67785239 : f32
    %66 = vector.broadcast %cst_35 : f32 to vector<4x8x256xf32>
    %67 = arith.mulf %65, %66 : vector<4x8x256xf32>
    %68 = arith.truncf %67 : vector<4x8x256xf32> to vector<4x8x256xbf16>
    %cst_36 = arith.constant 0.000000e+00 : bf16
    %69 = vector.broadcast %cst_36 : bf16 to vector<50x256xbf16>
    %c0_37 = arith.constant 0 : index
    %c0_38 = arith.constant 0 : index
    %70 = vector.load %arg7[%c0_37, %c0_38] : memref<50x256xbf16, #tpu.memory_space<vmem>>, vector<50x256xbf16>
    tpu.vector_store %arg7[%c0_37, %c0_38], %69 {strides = array<i32>} : memref<50x256xbf16, #tpu.memory_space<vmem>>, vector<50x256xbf16>,
    %71 = vector.extract_strided_slice %68 {offsets = [0, 0, 0], sizes = [1, 8, 256], strides = [1, 1, 1]} : vector<4x8x256xbf16> to vector<1x8x256xbf16>
    %72 = vector.shape_cast %71 : vector<1x8x256xbf16> to vector<8x256xbf16>
    %c11 = arith.constant 11 : index
    %c0_39 = arith.constant 0 : index
    %73 = vector.load %arg7[%c11, %c0_39] : memref<50x256xbf16, #tpu.memory_space<vmem>>, vector<8x256xbf16>
    tpu.vector_store %arg7[%c11, %c0_39], %72 {strides = array<i32>} : memref<50x256xbf16, #tpu.memory_space<vmem>>, vector<8x256xbf16>,
    %74 = vector.extract_strided_slice %68 {offsets = [1, 0, 0], sizes = [1, 8, 256], strides = [1, 1, 1]} : vector<4x8x256xbf16> to vector<1x8x256xbf16>
    %75 = vector.shape_cast %74 : vector<1x8x256xbf16> to vector<8x256xbf16>
    %c21 = arith.constant 21 : index
    %c0_40 = arith.constant 0 : index
    %76 = vector.load %arg7[%c21, %c0_40] : memref<50x256xbf16, #tpu.memory_space<vmem>>, vector<8x256xbf16>
    tpu.vector_store %arg7[%c21, %c0_40], %75 {strides = array<i32>} : memref<50x256xbf16, #tpu.memory_space<vmem>>, vector<8x256xbf16>,
    %77 = vector.extract_strided_slice %68 {offsets = [2, 0, 0], sizes = [1, 8, 256], strides = [1, 1, 1]} : vector<4x8x256xbf16> to vector<1x8x256xbf16>
    %78 = vector.shape_cast %77 : vector<1x8x256xbf16> to vector<8x256xbf16>
    %c31 = arith.constant 31 : index
    %c0_41 = arith.constant 0 : index
    %79 = vector.load %arg7[%c31, %c0_41] : memref<50x256xbf16, #tpu.memory_space<vmem>>, vector<8x256xbf16>
    tpu.vector_store %arg7[%c31, %c0_41], %78 {strides = array<i32>} : memref<50x256xbf16, #tpu.memory_space<vmem>>, vector<8x256xbf16>,
    %80 = vector.extract_strided_slice %68 {offsets = [3, 0, 0], sizes = [1, 8, 256], strides = [1, 1, 1]} : vector<4x8x256xbf16> to vector<1x8x256xbf16>
    %81 = vector.shape_cast %80 : vector<1x8x256xbf16> to vector<8x256xbf16>
    %c41 = arith.constant 41 : index
    %c0_42 = arith.constant 0 : index
    %82 = vector.load %arg7[%c41, %c0_42] : memref<50x256xbf16, #tpu.memory_space<vmem>>, vector<8x256xbf16>
    tpu.vector_store %arg7[%c41, %c0_42], %81 {strides = array<i32>} : memref<50x256xbf16, #tpu.memory_space<vmem>>, vector<8x256xbf16>,
    %cst_43 = arith.constant 0.000000e+00 : f32
    %83 = vector.broadcast %cst_43 : f32 to vector<4x8x256xf32>
    %c0_44 = arith.constant 0 : index
    %c0_45 = arith.constant 0 : index
    %84 = vector.load %arg7[%c0_44, %c0_45] : memref<50x256xbf16, #tpu.memory_space<vmem>>, vector<40x256xbf16>
    %c0_46 = arith.constant 0 : index
    %c0_47 = arith.constant 0 : index
    %c0_48 = arith.constant 0 : index
    %85 = vector.load %arg3[%c0_46, %c0_47, %c0_48] : memref<6x256x256xbf16, #tpu.memory_space<vmem>>, vector<1x256x256xbf16>
    %86 = vector.shape_cast %85 : vector<1x256x256xbf16> to vector<256x256xbf16>
    %cst_49 = arith.constant dense<0.000000e+00> : vector<40x256xf32>
    %87 = tpu.matmul %84, %86, %cst_49 {dimension_numbers = #tpu.dot_dimension_numbers<[1], [0], [0], [1], [0, 0, 1, 1], [], []>} : vector<40x256xbf16>, vector<256x256xbf16>, vector<40x256xf32> -> vector<40x256xf32>
    %88 = vector.shape_cast %87 : vector<40x256xf32> to vector<4x10x256xf32>
    %89 = vector.extract_strided_slice %88 {offsets = [0, 0, 0], sizes = [4, 8, 256], strides = [1, 1, 1]} : vector<4x10x256xf32> to vector<4x8x256xf32>
    %90 = arith.addf %83, %89 : vector<4x8x256xf32>
    %c1_50 = arith.constant 1 : index
    %c0_51 = arith.constant 0 : index
    %c0_52 = arith.constant 0 : index
    %91 = vector.load %arg3[%c1_50, %c0_51, %c0_52] : memref<6x256x256xbf16, #tpu.memory_space<vmem>>, vector<1x256x256xbf16>
    %92 = vector.shape_cast %91 : vector<1x256x256xbf16> to vector<256x256xbf16>
    %cst_53 = arith.constant dense<0.000000e+00> : vector<40x256xf32>
    %93 = tpu.matmul %84, %92, %cst_53 {dimension_numbers = #tpu.dot_dimension_numbers<[1], [0], [0], [1], [0, 0, 1, 1], [], []>} : vector<40x256xbf16>, vector<256x256xbf16>, vector<40x256xf32> -> vector<40x256xf32>
    %94 = vector.shape_cast %93 : vector<40x256xf32> to vector<4x10x256xf32>
    %95 = vector.extract_strided_slice %94 {offsets = [0, 1, 0], sizes = [4, 8, 256], strides = [1, 1, 1]} : vector<4x10x256xf32> to vector<4x8x256xf32>
    %96 = arith.addf %90, %95 : vector<4x8x256xf32>
    %c2_54 = arith.constant 2 : index
    %c0_55 = arith.constant 0 : index
    %c0_56 = arith.constant 0 : index
    %97 = vector.load %arg3[%c2_54, %c0_55, %c0_56] : memref<6x256x256xbf16, #tpu.memory_space<vmem>>, vector<1x256x256xbf16>
    %98 = vector.shape_cast %97 : vector<1x256x256xbf16> to vector<256x256xbf16>
    %cst_57 = arith.constant dense<0.000000e+00> : vector<40x256xf32>
    %99 = tpu.matmul %84, %98, %cst_57 {dimension_numbers = #tpu.dot_dimension_numbers<[1], [0], [0], [1], [0, 0, 1, 1], [], []>} : vector<40x256xbf16>, vector<256x256xbf16>, vector<40x256xf32> -> vector<40x256xf32>
    %100 = vector.shape_cast %99 : vector<40x256xf32> to vector<4x10x256xf32>
    %101 = vector.extract_strided_slice %100 {offsets = [0, 2, 0], sizes = [4, 8, 256], strides = [1, 1, 1]} : vector<4x10x256xf32> to vector<4x8x256xf32>
    %102 = arith.addf %96, %101 : vector<4x8x256xf32>
    %c10_58 = arith.constant 10 : index
    %c0_59 = arith.constant 0 : index
    %103 = vector.load %arg7[%c10_58, %c0_59] : memref<50x256xbf16, #tpu.memory_space<vmem>>, vector<40x256xbf16>
    %c3_60 = arith.constant 3 : index
    %c0_61 = arith.constant 0 : index
    %c0_62 = arith.constant 0 : index
    %104 = vector.load %arg3[%c3_60, %c0_61, %c0_62] : memref<6x256x256xbf16, #tpu.memory_space<vmem>>, vector<1x256x256xbf16>
    %105 = vector.shape_cast %104 : vector<1x256x256xbf16> to vector<256x256xbf16>
    %cst_63 = arith.constant dense<0.000000e+00> : vector<40x256xf32>
    %106 = tpu.matmul %103, %105, %cst_63 {dimension_numbers = #tpu.dot_dimension_numbers<[1], [0], [0], [1], [0, 0, 1, 1], [], []>} : vector<40x256xbf16>, vector<256x256xbf16>, vector<40x256xf32> -> vector<40x256xf32>
    %107 = vector.shape_cast %106 : vector<40x256xf32> to vector<4x10x256xf32>
    %108 = vector.extract_strided_slice %107 {offsets = [0, 0, 0], sizes = [4, 8, 256], strides = [1, 1, 1]} : vector<4x10x256xf32> to vector<4x8x256xf32>
    %109 = arith.addf %102, %108 : vector<4x8x256xf32>
    %c4_64 = arith.constant 4 : index
    %c0_65 = arith.constant 0 : index
    %c0_66 = arith.constant 0 : index
    %110 = vector.load %arg3[%c4_64, %c0_65, %c0_66] : memref<6x256x256xbf16, #tpu.memory_space<vmem>>, vector<1x256x256xbf16>
    %111 = vector.shape_cast %110 : vector<1x256x256xbf16> to vector<256x256xbf16>
    %cst_67 = arith.constant dense<0.000000e+00> : vector<40x256xf32>
    %112 = tpu.matmul %103, %111, %cst_67 {dimension_numbers = #tpu.dot_dimension_numbers<[1], [0], [0], [1], [0, 0, 1, 1], [], []>} : vector<40x256xbf16>, vector<256x256xbf16>, vector<40x256xf32> -> vector<40x256xf32>
    %113 = vector.shape_cast %112 : vector<40x256xf32> to vector<4x10x256xf32>
    %114 = vector.extract_strided_slice %113 {offsets = [0, 1, 0], sizes = [4, 8, 256], strides = [1, 1, 1]} : vector<4x10x256xf32> to vector<4x8x256xf32>
    %115 = arith.addf %109, %114 : vector<4x8x256xf32>
    %c5_68 = arith.constant 5 : index
    %c0_69 = arith.constant 0 : index
    %c0_70 = arith.constant 0 : index
    %116 = vector.load %arg3[%c5_68, %c0_69, %c0_70] : memref<6x256x256xbf16, #tpu.memory_space<vmem>>, vector<1x256x256xbf16>
    %117 = vector.shape_cast %116 : vector<1x256x256xbf16> to vector<256x256xbf16>
    %cst_71 = arith.constant dense<0.000000e+00> : vector<40x256xf32>
    %118 = tpu.matmul %103, %117, %cst_71 {dimension_numbers = #tpu.dot_dimension_numbers<[1], [0], [0], [1], [0, 0, 1, 1], [], []>} : vector<40x256xbf16>, vector<256x256xbf16>, vector<40x256xf32> -> vector<40x256xf32>
    %119 = vector.shape_cast %118 : vector<40x256xf32> to vector<4x10x256xf32>
    %120 = vector.extract_strided_slice %119 {offsets = [0, 2, 0], sizes = [4, 8, 256], strides = [1, 1, 1]} : vector<4x10x256xf32> to vector<4x8x256xf32>
    %121 = arith.addf %115, %120 : vector<4x8x256xf32>
    %c0_72 = arith.constant 0 : index
    %c1_73 = arith.constant 1 : index
    %c1_74 = arith.constant 1 : index
    %c0_75 = arith.constant 0 : index
    %122 = vector.load %arg1[%c0_72, %c1_73, %c1_74, %c0_75] : memref<1x5x10x256xbf16, #tpu.memory_space<vmem>>, vector<1x4x8x256xbf16>
    %123 = vector.shape_cast %122 : vector<1x4x8x256xbf16> to vector<4x8x256xbf16>
    %124 = arith.extf %123 : vector<4x8x256xbf16> to vector<4x8x256xf32>
    %cst_76 = arith.constant 0.699999988 : f32
    %125 = vector.broadcast %cst_76 : f32 to vector<4x8x256xf32>
    %126 = arith.mulf %124, %125 : vector<4x8x256xf32>
    %cst_77 = arith.constant 3.000000e-01 : f32
    %127 = vector.broadcast %cst_77 : f32 to vector<4x8x256xf32>
    %128 = arith.mulf %121, %127 : vector<4x8x256xf32>
    %129 = arith.addf %126, %128 : vector<4x8x256xf32>
    %cst_78 = arith.constant 1.31306434 : f32
    %130 = vector.broadcast %cst_78 : f32 to vector<4x8x256xf32>
    %131 = arith.mulf %129, %130 : vector<4x8x256xf32>
    %cst_79 = arith.constant -2.560000e+02 : f32
    %cst_80 = arith.constant 2.560000e+02 : f32
    %132 = vector.broadcast %cst_79 : f32 to vector<4x8x256xf32>
    %133 = arith.maximumf %132, %131 : vector<4x8x256xf32>
    %134 = vector.broadcast %cst_80 : f32 to vector<4x8x256xf32>
    %135 = arith.minimumf %134, %133 : vector<4x8x256xf32>
    %136 = vector.shape_cast %135 : vector<4x8x256xf32> to vector<32x256xf32>
    %c0_81 = arith.constant 0 : index
    %c0_82 = arith.constant 0 : index
    %c0_83 = arith.constant 0 : index
    %137 = vector.load %arg5[%c0_81, %c0_82, %c0_83] : memref<1x32x256xf32, #tpu.memory_space<vmem>>, vector<1x32x256xf32>
    %138 = vector.shape_cast %137 : vector<1x32x256xf32> to vector<32x256xf32>
    %139 = vector.shape_cast %136 : vector<32x256xf32> to vector<1x32x256xf32>
    tpu.vector_store %arg5[%c0_81, %c0_82, %c0_83], %139 {strides = array<i32>} : memref<1x32x256xf32, #tpu.memory_space<vmem>>, vector<1x32x256xf32>,
    return
  }
  func.func @transform_0(%arg0: i32) -> (i32, i32, i32, i32) {
    %c0_i32 = arith.constant 0 : i32
    %c0_i32_0 = arith.constant 0 : i32
    %c0_i32_1 = arith.constant 0 : i32
    %c0_i32_2 = arith.constant 0 : i32
    return %arg0, %c0_i32, %c0_i32_0, %c0_i32_1 : i32, i32, i32, i32
  }
  func.func @transform_1(%arg0: i32) -> (i32, i32, i32) {
    %c0_i32 = arith.constant 0 : i32
    %c0_i32_0 = arith.constant 0 : i32
    %c0_i32_1 = arith.constant 0 : i32
    %c0_i32_2 = arith.constant 0 : i32
    return %c0_i32, %c0_i32_0, %c0_i32_1 : i32, i32, i32
  }
  func.func @transform_2(%arg0: i32) -> (i32, i32, i32) {
    %c0_i32 = arith.constant 0 : i32
    %c0_i32_0 = arith.constant 0 : i32
    %c0_i32_1 = arith.constant 0 : i32
    %c0_i32_2 = arith.constant 0 : i32
    return %c0_i32, %c0_i32_0, %c0_i32_1 : i32, i32, i32
  }
  func.func @transform_3(%arg0: i32) -> (i32, i32, i32) {
    %c0_i32 = arith.constant 0 : i32
    %c0_i32_0 = arith.constant 0 : i32
    %c0_i32_1 = arith.constant 0 : i32
    return %arg0, %c0_i32, %c0_i32_0 : i32, i32, i32
  }
  func.func @transform_4(%arg0: i32) -> (i32, i32, i32) {
    %c0_i32 = arith.constant 0 : i32
    %c0_i32_0 = arith.constant 0 : i32
    %c0_i32_1 = arith.constant 0 : i32
    return %arg0, %c0_i32, %c0_i32_0 : i32, i32, i32
  }
}

</mosaic_0001>

<bundles_post_ra>
// kernel: block_forward_pallas.1
= control target key start
LH: loop header
LB: loop body
LE: loop exit
PB: predicated region body
PF: predicated region fallthrough
CT: control target
= control target key end

     0   :  { %s8045_s15 = smov 0   ;;  %s10488_s0 = inlined_call_operand.vmem [shape: bf16[2,5,10,256], index: 0, kind: input, shape index: {}]   ;;  %s10489_s1 = inlined_call_operand.vmem [shape: bf16[6,256,256], index: 1, kind: input, shape index: {}]   ;;  %s10490_s2 = inlined_call_operand.vmem [shape: bf16[6,256,256], index: 2, kind: input, shape index: {}]   ;;  %s10491_s3 = inlined_call_operand.vmem [shape: f32[2,1,256], index: 3, kind: input, shape index: {}]   ;;  %s10492_s4 = inlined_call_operand.vmem [shape: f32[2,32,256], index: 4, kind: output, shape index: {}]  }
   0x1 LB: > { %s6464_s16 = sadd.s32 4294967295, %s8016_s15   ;;  %p6468_p0 = scmp.ge.s32.totalorder %s8016_s15, 1  ;;  %s8016_s15 = sphi %s8045_s15, %s14_s15  }
   0x2   : > { %p171_p1 = scmp.lt.s32.totalorder %s8016_s15, 3 }
   0x4   : > { %p172_p2 = pnand %p6468_p0, %p171_p1 }
   0x5   : > { %v7277_v0 = vld [vmem:[%s10489_s1 + $0x4] ss:$8 sps:$4 sm:$0xff] (!%p172_p2)   ;;  %v7281_v2 = vld [vmem:[%s10489_s1] ss:$8 sps:$4 sm:$0xff] (!%p172_p2)   ;;  %v7283_v4 = vld [vmem:[%s10489_s1 + $0x14] ss:$8 sps:$4 sm:$0xff] (!%p172_p2)  }
   0x6   : > { %175 = sbr.rel (%p172_p2) target bundleno = 929 (0x3a1), region = 36  ;;  %v7279_v1 = vld [vmem:[%s10489_s1 + $0x104] ss:$8 sps:$4 sm:$0xff] (!%p172_p2)   ;;  %941 = vmatprep.subr.bf16.mxu0 (!%p172_p2), %v7277_v0  ;;  %v7282_v3 = vld [vmem:[%s10489_s1 + $0x100] ss:$8 sps:$4 sm:$0xff] (!%p172_p2)   ;;  %p201_p3 = scmp.lt.s32.totalorder (!%p172_p2), %s6464_s16, 1 }
   0x7   : > { %1325 = vmatprep.subr.bf16.mxu1 (!%p172_p2), %v7279_v1  ;;  %942 = vmatpush1.bf16.msra.mxu0 (!%p172_p2), %v7281_v2  ;;  %v7285_v5 = vld [vmem:[%s10489_s1 + $0x114] ss:$8 sps:$4 sm:$0xff] (!%p172_p2)   ;;  %v7287_v6 = vld [vmem:[%s10489_s1 + $0x10] ss:$8 sps:$4 sm:$0xff] (!%p172_p2)   ;;  %v7289_v8 = vld [vmem:[%s10489_s1 + $0x24] ss:$8 sps:$4 sm:$0xff] (!%p172_p2)  }
   0x8   : > { %1326 = vmatpush1.bf16.msra.mxu1 (!%p172_p2), %v7282_v3  ;;  %943 = vmatprep.subr.bf16.mxu0 (!%p172_p2), %v7283_v4  ;;  %v7288_v7 = vld [vmem:[%s10489_s1 + $0x110] ss:$8 sps:$4 sm:$0xff] (!%p172_p2)   ;;  %v7291_v9 = vld [vmem:[%s10489_s1 + $0x124] ss:$8 sps:$4 sm:$0xff] (!%p172_p2)   ;;  %v7293_v10 = vld [vmem:[%s10489_s1 + $0x20] ss:$8 sps:$4 sm:$0xff] (!%p172_p2)  }
   0x9   : > { %1327 = vmatprep.subr.bf16.mxu1 (!%p172_p2), %v7285_v5  ;;  %v7294_v11 = vld [vmem:[%s10489_s1 + $0x120] ss:$8 sps:$4 sm:$0xff] (!%p172_p2)   ;;  %v7295_v12 = vld [vmem:[%s10489_s1 + $0x34] ss:$8 sps:$4 sm:$0xff] (!%p172_p2)   ;;  %v7299_v14 = vld [vmem:[%s10489_s1 + $0x30] ss:$8 sps:$4 sm:$0xff] (!%p172_p2)  }
   0xa   : > { %v7297_v13 = vld [vmem:[%s10489_s1 + $0x134] ss:$8 sps:$4 sm:$0xff] (!%p172_p2)   ;;  %v7300_v15 = vld [vmem:[%s10489_s1 + $0x130] ss:$8 sps:$4 sm:$0xff] (!%p172_p2)   ;;  %v7301_v16 = vld [vmem:[%s10489_s1 + $0x44] ss:$8 sps:$4 sm:$0xff] (!%p172_p2)  }
   0xb   : > { %944 = vmatpush1.bf16.msra.mxu0 (!%p172_p2), %v7287_v6  ;;  %v7303_v17 = vld [vmem:[%s10489_s1 + $0x144] ss:$8 sps:$4 sm:$0xff] (!%p172_p2)   ;;  %v7305_v18 = vld [vmem:[%s10489_s1 + $0x40] ss:$8 sps:$4 sm:$0xff] (!%p172_p2)   ;;  %v7307_v20 = vld [vmem:[%s10489_s1 + $0x54] ss:$8 sps:$4 sm:$0xff] (!%p172_p2)  }
   0xc   : > { %1328 = vmatpush1.bf16.msra.mxu1 (!%p172_p2), %v7288_v7  ;;  %945 = vmatprep.subr.bf16.mxu0 (!%p172_p2), %v7289_v8  ;;  %v7306_v19 = vld [vmem:[%s10489_s1 + $0x140] ss:$8 sps:$4 sm:$0xff] (!%p172_p2)   ;;  %v7309_v21 = vld [vmem:[%s10489_s1 + $0x154] ss:$8 sps:$4 sm:$0xff] (!%p172_p2)   ;;  %v7311_v22 = vld [vmem:[%s10489_s1 + $0x50] ss:$8 sps:$4 sm:$0xff] (!%p172_p2)  }
   0xd   : > { %1329 = vmatprep.subr.bf16.mxu1 %v7291_v9  ;;  %v7312_v23 = vld [vmem:[%s10489_s1 + $0x150] ss:$8 sps:$4 sm:$0xff]   ;;  %v7313_v24 = vld [vmem:[%s10489_s1 + $0x64] ss:$8 sps:$4 sm:$0xff]   ;;  %v7317_v26 = vld [vmem:[%s10489_s1 + $0x60] ss:$8 sps:$4 sm:$0xff]  }
   0xe   : > { %v7315_v25 = vld [vmem:[%s10489_s1 + $0x164] ss:$8 sps:$4 sm:$0xff]   ;;  %v7318_v27 = vld [vmem:[%s10489_s1 + $0x160] ss:$8 sps:$4 sm:$0xff]   ;;  %v7319_v28 = vld [vmem:[%s10489_s1 + $0x74] ss:$8 sps:$4 sm:$0xff]  }
   0xf   : > { %946 = vmatpush1.bf16.msra.mxu0 %v7293_v10  ;;  %v7321_v29 = vld [vmem:[%s10489_s1 + $0x174] ss:$8 sps:$4 sm:$0xff]   ;;  %v7323_v30 = vld [vmem:[%s10489_s1 + $0x70] ss:$8 sps:$4 sm:$0xff]   ;;  %v7325_v32 = vld [vmem:[%s10489_s1 + $0x84] ss:$8 sps:$4 sm:$0xff]  }
  0x10   : > { %1330 = vmatpush1.bf16.msra.mxu1 %v7294_v11  ;;  %947 = vmatprep.subr.bf16.mxu0 %v7295_v12  ;;  %v7324_v31 = vld [vmem:[%s10489_s1 + $0x170] ss:$8 sps:$4 sm:$0xff]   ;;  %v7327_v33 = vld [vmem:[%s10489_s1 + $0x184] ss:$8 sps:$4 sm:$0xff]   ;;  %v7329_v34 = vld [vmem:[%s10489_s1 + $0x80] ss:$8 sps:$4 sm:$0xff]  }
  0x11   : > { %1331 = vmatprep.subr.bf16.mxu1 %v7297_v13  ;;  %v7330_v35 = vld [vmem:[%s10489_s1 + $0x180] ss:$8 sps:$4 sm:$0xff]   ;;  %s10541_s16 = smov (!%p201_p3, %s6464_s16), 1  ;;  %v7331_v36 = vld [vmem:[%s10489_s1 + $0x94] ss:$8 sps:$4 sm:$0xff]   ;;  %vm10493_vm0 = vcmask 1046528  }
  0x12   : > { %v7333_v37 = vld [vmem:[%s10489_s1 + $0x194] ss:$8 sps:$4 sm:$0xff]   ;;  %v7335_v38 = vld [vmem:[%s10489_s1 + $0x90] ss:$8 sps:$4 sm:$0xff]   ;;  %s7266_s23 = smul.u32 80, %s10541_s16  ;;  %vm1486_vm1 = vcmask 1040384  }
  0x13   : > { %948 = vmatpush1.bf16.msra.mxu0 %v7299_v14  ;;  %v7336_v39 = vld [vmem:[%s10489_s1 + $0x190] ss:$8 sps:$4 sm:$0xff]   ;;  %v7337_v40 = vld [vmem:[%s10489_s1 + $0xa4] ss:$8 sps:$4 sm:$0xff]   ;;  %v7341_v42 = vld [vmem:[%s10489_s1 + $0xa0] ss:$8 sps:$4 sm:$0xff]  }
  0x14   : > { %1332 = vmatpush1.bf16.msra.mxu1 %v7300_v15  ;;  %949 = vmatprep.subr.bf16.mxu0 %v7301_v16  ;;  %v7339_v41 = vld [vmem:[%s10489_s1 + $0x1a4] ss:$8 sps:$4 sm:$0xff]   ;;  %v7342_v43 = vld [vmem:[%s10489_s1 + $0x1a0] ss:$8 sps:$4 sm:$0xff]   ;;  %s8195_s10 = scalar_lea.vmem %s10488_s0, %s7266_s23  ;;  %v7343_v44 = vld [vmem:[%s10489_s1 + $0xb4] ss:$8 sps:$4 sm:$0xff]  }
  0x15   : > { %1333 = vmatprep.subr.bf16.mxu1 %v7303_v17  ;;  %v7345_v45 = vld [vmem:[%s10489_s1 + $0x1b4] ss:$8 sps:$4 sm:$0xff]   ;;  %v7347_v46 = vld [vmem:[%s10489_s1 + $0xb0] ss:$8 sps:$4 sm:$0xff]   ;;  %v8207_v47 = vld [vmem:[%s8195_s10] sm:$0xff]  ;;  %vm1487_vm2 = vcmask 1042434  }
  0x16   : > { %v8210_v48 = vld [vmem:[%s8195_s10 + $0x8] sm:$0x11]  ;;  %v8213_v49 = vld [vmem:[%s8195_s10 + $0x10] sm:$0xff]  ;;  %v226_v50 = vunpack.c.l.bf16 %v8207_v47  ;;  %v227_v51 = vunpack.c.h.bf16 %v8207_v47  ;;  %v8258_v12 = vld [vmem:[%s8195_s10 + $0x18] sm:$0x11]  ;;  %vm1489_vm3 = vcmask 1044484  }
  0x17   : > { %950 = vmatpush1.bf16.msra.mxu0 %v7305_v18  ;;  %v7348_v52 = vld [vmem:[%s10489_s1 + $0x1b0] ss:$8 sps:$4 sm:$0xff]   ;;  %v7349_v53 = vld [vmem:[%s10489_s1 + $0xc4] ss:$8 sps:$4 sm:$0xff]   ;;  %v228_v54 = vunpack.c.l.bf16 %v8210_v48  ;;  %v229_v55 = vunpack.c.h.bf16 %v8210_v48  ;;  %v230_v56 = vunpack.c.l.bf16 %v8213_v49  ;;  %v231_v57 = vunpack.c.h.bf16 %v8213_v49  ;;  %v7353_v61 = vld [vmem:[%s10489_s1 + $0xc0] ss:$8 sps:$4 sm:$0xff]  }
  0x18   : > { %1334 = vmatpush1.bf16.msra.mxu1 %v7306_v19  ;;  %951 = vmatprep.subr.bf16.mxu0 %v7307_v20  ;;  %v7351_v58 = vld [vmem:[%s10489_s1 + $0x1c4] ss:$8 sps:$4 sm:$0xff]   ;;  %v246_v59 = vsub.f32 0.0, %v226_v50  ;;  %v247_v60 = vsub.f32 0.0, %v227_v51  ;;  %v7354_v4 = vld [vmem:[%s10489_s1 + $0x1c0] ss:$8 sps:$4 sm:$0xff]   ;;  %v232_v16 = vunpack.c.l.bf16 %v8258_v12  ;;  %v233_v17 = vunpack.c.h.bf16 %v8258_v12  ;;  %vm1488_vm4 = vmor %vm1486_vm1, %vm1487_vm2 }
  0x19   : > { %1335 = vmatprep.subr.bf16.mxu1 %v7309_v21  ;;  %v248_v62 = vsub.f32 0.0, %v228_v54  ;;  %v249_v63 = vsub.f32 0.0, %v229_v55  ;;  %v250_v0 = vsub.f32 0.0, %v230_v56  ;;  %v251_v1 = vsub.f32 0.0, %v231_v57  ;;  %v7355_v7 = vld [vmem:[%s10489_s1 + $0xd4] ss:$8 sps:$4 sm:$0xff]   ;;  %vm1490_vm6 = vmor %vm1488_vm4, %vm1489_vm3 }
  0x1a   : > { %v266_v2 = vmul.f32 1.442695, %v246_v59  ;;  %v268_v3 = vmul.f32 1.442695, %v247_v60  ;;  %v7357_v8 = vld [vmem:[%s10489_s1 + $0x1d4] ss:$8 sps:$4 sm:$0xff]  }
  0x1b   : > { %952 = vmatpush1.bf16.msra.mxu0 %v7311_v22  ;;  %v270_v5 = vmul.f32 1.442695, %v248_v62  ;;  %v272_v6 = vmul.f32 1.442695, %v249_v63  ;;  %v274_v9 = vmul.f32 1.442695, %v250_v0 }
  0x1c   : > { %1336 = vmatpush1.bf16.msra.mxu1 %v7312_v23  ;;  %953 = vmatprep.subr.bf16.mxu0 %v7313_v24  ;;  %7857 = vpow2.f32 %v266_v2  ;;  %v276_v10 = vmul.f32 1.442695, %v251_v1  ;;  %v7359_v11 = vld [vmem:[%s10489_s1 + $0xd0] ss:$8 sps:$4 sm:$0xff]   ;;  %v8261_v13 = vld [vmem:[%s8195_s10 + $0x20] sm:$0xff]  ;;  %v252_v24 = vsub.f32 0.0, %v232_v16 }
  0x1d   : > { %1337 = vmatprep.subr.bf16.mxu1 %v7315_v25  ;;  %7859 = vpow2.f32 %v268_v3  ;;  %v7360_v14 = vld [vmem:[%s10489_s1 + $0x1d0] ss:$8 sps:$4 sm:$0xff]   ;;  %v7361_v15 = vld [vmem:[%s10489_s1 + $0xe4] ss:$8 sps:$4 sm:$0xff]   ;;  %v234_v18 = vunpack.c.l.bf16 %v8261_v13  ;;  %v235_v21 = vunpack.c.h.bf16 %v8261_v13  ;;  %v7365_v22 = vld [vmem:[%s10489_s1 + $0xe0] ss:$8 sps:$4 sm:$0xff]  }
  0x1e   : > { %7861 = vpow2.f32 %v270_v5  ;;  %v7363_v19 = vld [vmem:[%s10489_s1 + $0x1e4] ss:$8 sps:$4 sm:$0xff]   ;;  %v7366_v23 = vld [vmem:[%s10489_s1 + $0x1e0] ss:$8 sps:$4 sm:$0xff]   ;;  %v7367_v25 = vld [vmem:[%s10489_s1 + $0xf4] ss:$8 sps:$4 sm:$0xff]  }
  0x1f   : > { %954 = vmatpush1.bf16.msra.mxu0 %v7317_v26  ;;  %7863 = vpow2.f32 %v272_v6  ;;  %v8276_v20 = vld [vmem:[%s8195_s10 + $0x28] sm:$0x11]  ;;  %v8291_v26 = vld [vmem:[%s8195_s10 + $0x30] sm:$0xff]  ;;  %vm1491_vm5 = vcmask 1046534   ;;  %s6470_s21 = sshll.u32 %s10541_s16, 1  ;;  %vm3501_vm8 = vcmask 1043457  }
  0x20   : > { %1338 = vmatpush1.bf16.msra.mxu1 %v7318_v27  ;;  %955 = vmatprep.subr.bf16.mxu0 %v7319_v28  ;;  %7865 = vpow2.f32 %v274_v9  ;;  %v253_v27 = vsub.f32 0.0, %v233_v17  ;;  %v254_v28 = vsub.f32 0.0, %v234_v18  ;;  %v8018_v9 = vmov 1983009808   ;;  %vm8918_vm7 = vmor %vm1490_vm6, %vm1491_vm5  ;;  %s209_s30 = scalar_lea.vmem %s10491_s3, %s6470_s21 }
  0x21   : > { %1339 = vmatprep.subr.bf16.mxu1 %v7321_v29  ;;  %7867 = vpow2.f32 %v276_v10  ;;  %v255_v29 = vsub.f32 0.0, %v235_v21  ;;  %v409_v10 = vunpack.c.l.s4 %v8018_v9  ;;  %vm3502_vm9 = vsmask.f32 7942 }
  0x22   : > { %vm3504_vm10 = vcmask 1047557   ;;  %vm3505_vm11 = vsmask.f32 7958  ;;  %vm3511_vm12 = vcmask 1041408   ;;  %vm3512_vm13 = vsmask.f32 1280  ;;  %vm9484_vm2 = vmand %vm3501_vm8, %vm3502_vm9 }
  0x23   : > { %956 = vmatpush1.bf16.msra.mxu0 %v7323_v30  ;;  %v7369_v30 = vld [vmem:[%s10489_s1 + $0x1f4] ss:$8 sps:$4 sm:$0xff]   ;;  %vm3514_vm14 = vcmask 1045508   ;;  %vm3515_vm15 = vsmask.f32 5376  ;;  %vm9490_vm4 = vmand %vm3504_vm10, %vm3505_vm11  ;;  %vm3537_vm10 = vcmask 1043458  }
  0x24   : > { %1340 = vmatpush1.bf16.msra.mxu1 %v7324_v31  ;;  %957 = vmatprep.subr.bf16.mxu0 %v7325_v32  ;;  %v236_v31 = vunpack.c.l.bf16 %v8276_v20  ;;  %v278_v32 = vmul.f32 1.442695, %v252_v24  ;;  %vm9496_vm5 = vmand %vm3511_vm12, %vm3512_vm13  ;;  %vm3538_vm11 = vsmask.f32 7946  ;;  %vm3540_vm12 = vcmask 1047558  }
  0x25   : > { %1341 = vmatprep.subr.bf16.mxu1 %v7327_v33  ;;  %v237_v33 = vunpack.c.h.bf16 %v8276_v20  ;;  %v7376_v20 = vld [vmem:[%s10489_s1 + $0x300] ss:$8 sps:$4 sm:$0xff]   ;;  %vm9505_vm6 = vmand %vm3514_vm14, %vm3515_vm15  ;;  %vm3541_vm13 = vsmask.f32 7962  ;;  %vm3547_vm14 = vcmask 1042432  }
  0x26   : > { %7869 = vpow2.f32 %v278_v32  ;;  %vm3507_vm8 = vmor %vm9490_vm4, %vm9484_vm2  ;;  %vm3548_vm15 = vsmask.f32 2304  ;;  %vm3550_vm2 = vcmask 1046532   ;;  %vm3551_vm4 = vsmask.f32 6400 }
  0x27   : > { %958 = vmatpush1.bf16.msra.mxu0 %v7329_v34  ;;  %v280_v34 = vmul.f32 1.442695, %v253_v27  ;;  %v410_v27 = vunpack.c.0.s8 %v409_v10  ;;  %vm3517_vm9 = vmor %vm9505_vm6, %vm9496_vm5 }
  0x28   : > { %1342 = vmatpush1.bf16.msra.mxu1 %v7330_v35  ;;  %959 = vmatprep.subr.bf16.mxu0 %v7331_v36  ;;  %v282_v35 = vmul.f32 1.442695, %v254_v28  ;;  %v284_v36 = vmul.f32 1.442695, %v255_v29  ;;  %vm9556_vm5 = vmand %vm3537_vm10, %vm3538_vm11  ;;  %vm3574_vm10 = vsmask.f32 7950 }
  0x29   : > { %1343 = vmatprep.subr.bf16.mxu1 %v7333_v37  ;;  %v7371_v37 = vld [vmem:[%s10489_s1 + $0xf0] ss:$8 sps:$4 sm:$0xff]   ;;  %7871 = vpow2.f32 %v280_v34  ;;  %vm9571_vm6 = vmand %vm3540_vm12, %vm3541_vm13  ;;  %vm3577_vm12 = vsmask.f32 7966 }
  0x2a   : > { %7873 = vpow2.f32 %v282_v35  ;;  %vm9588_vm11 = vmand %vm3550_vm2, %vm3551_vm4 }
  0x2b   : > { %960 = vmatpush1.bf16.msra.mxu0 %v7335_v38  ;;  %v238_v38 = vunpack.c.l.bf16 %v8291_v26  ;;  %7875 = vpow2.f32 %v284_v36  ;;  %vm3543_vm13 = vmor %vm9571_vm6, %vm9556_vm5  ;;  %vm3584_vm5 = vsmask.f32 3328  ;;  %vm3586_vm6 = vcmask 1047556  }
  0x2c   : > { %1344 = vmatpush1.bf16.msra.mxu1 %v7336_v39  ;;  %961 = vmatprep.subr.bf16.mxu0 %v7337_v40  ;;  %v7858_v39 = vpop.eup %7857  ;;  %v7372_v40 = vld [vmem:[%s10489_s1 + $0x1f0] ss:$8 sps:$4 sm:$0xff]  }
  0x2d   : > { %1345 = vmatprep.subr.bf16.mxu1 %v7339_v41  ;;  %v239_v41 = vunpack.c.h.bf16 %v8291_v26  ;;  %v7379_v26 = vld [vmem:[%s10489_s1 + $0x210] ss:$8 sps:$4 sm:$0xff]  }
  0x2f   : > { %962 = vmatpush1.bf16.msra.mxu0 %v7341_v42  ;;  %v7860_v42 = vpop.eup %7859  ;;  %v259_v0 = vsub.f32 0.0, %v239_v41 }
  0x30   : > { %1346 = vmatpush1.bf16.msra.mxu1 %v7342_v43  ;;  %963 = vmatprep.subr.bf16.mxu0 %v7343_v44  ;;  %v306_v43 = vadd.f32 1.0, %v7858_v39  ;;  %v7375_v44 = vld [vmem:[%s10489_s1 + $0x204] ss:$8 sps:$4 sm:$0xff]  }
  0x31   : > { %1347 = vmatprep.subr.bf16.mxu1 %v7345_v45  ;;  %v256_v45 = vsub.f32 0.0, %v236_v31 }
  0x32   : > { %7877 = vrcp.f32 %v306_v43 }
  0x33   : > { %964 = vmatpush1.bf16.msra.mxu0 %v7347_v46  ;;  %v7862_v46 = vpop.eup %7861  ;;  %v286_v3 = vmul.f32 1.442695, %v256_v45 }
  0x34   : > { %1348 = vmatpush1.bf16.msra.mxu1 %v7348_v52  ;;  %965 = vmatprep.subr.bf16.mxu0 %v7349_v53  ;;  %v307_v52 = vadd.f32 1.0, %v7860_v42  ;;  %v7378_v53 = vld [vmem:[%s10489_s1 + $0x304] ss:$8 sps:$4 sm:$0xff]   ;;  %v7864_v59 = vpop.eup %7863  ;;  %v308_v60 = vadd.f32 1.0, %v7862_v46 }
  0x35   : > { %1349 = vmatprep.subr.bf16.mxu1 %v7351_v58  ;;  %v257_v58 = vsub.f32 0.0, %v237_v33  ;;  %v7866_v62 = vpop.eup %7865  ;;  %v309_v63 = vadd.f32 1.0, %v7864_v59 }
  0x36   : > { %7879 = vrcp.f32 %v307_v52  ;;  %v7868_v1 = vpop.eup %7867  ;;  %v310_v2 = vadd.f32 1.0, %v7866_v62 }
  0x37   : > { %966 = vmatpush1.bf16.msra.mxu0 %v7353_v61  ;;  %v258_v61 = vsub.f32 0.0, %v238_v38  ;;  %7881 = vrcp.f32 %v308_v60  ;;  %v288_v5 = vmul.f32 1.442695, %v257_v58 }
  0x38   : > { %1350 = vmatpush1.bf16.msra.mxu1 %v7354_v4  ;;  %967 = vmatprep.subr.bf16.mxu0 %v7355_v7  ;;  %v311_v4 = vadd.f32 1.0, %v7868_v1  ;;  %7883 = vrcp.f32 %v309_v63  ;;  %v292_v7 = vmul.f32 1.442695, %v259_v0 }
  0x39   : > { %1351 = vmatprep.subr.bf16.mxu1 %v7357_v8  ;;  %7885 = vrcp.f32 %v310_v2  ;;  %v290_v6 = vmul.f32 1.442695, %v258_v61  ;;  %v7870_v8 = vpop.eup %7869 }
  0x3a   : > { %7887 = vrcp.f32 %v311_v4 }
  0x3b   : > { %968 = vmatpush1.bf16.msra.mxu0 %v7359_v11  ;;  %v411_v11 = vlaneseq  ;;  %7889 = vpow2.f32 %v286_v3 }
  0x3c   : > { %1352 = vmatpush1.bf16.msra.mxu1 %v7360_v14  ;;  %969 = vmatprep.subr.bf16.mxu0 %v7361_v15  ;;  %v7872_v14 = vpop.eup %7871  ;;  %7891 = vpow2.f32 %v288_v5  ;;  %v312_v15 = vadd.f32 1.0, %v7870_v8 }
  0x3d   : > { %1353 = vmatprep.subr.bf16.mxu1 %v7363_v19  ;;  %v7874_v19 = vpop.eup %7873  ;;  %7893 = vpow2.f32 %v290_v6  ;;  %v8326_v28 = vshrl.u32 %v411_v11, 7 }
  0x3e   : > { %7895 = vpow2.f32 %v292_v7  ;;  %v314_v24 = vadd.f32 1.0, %v7874_v19 }
  0x3f   : > { %970 = vmatpush1.bf16.msra.mxu0 %v7365_v22  ;;  %v313_v22 = vadd.f32 1.0, %v7872_v14  ;;  %7897 = vrcp.f32 %v312_v15 }
  0x40   : > { %1354 = vmatpush1.bf16.msra.mxu1 %v7366_v23  ;;  %971 = vmatprep.subr.bf16.mxu0 %v7367_v25  ;;  %v7876_v23 = vpop.eup %7875 }
  0x41   : > { %1355 = vmatprep.subr.bf16.mxu1 %v7369_v30  ;;  %v7878_v25 = vpop.eup %7877  ;;  %v315_v29 = vadd.f32 1.0, %v7876_v23  ;;  %7899 = vrcp.f32 %v313_v22 }
  0x42   : > { %v7880_v30 = vpop.eup %7879  ;;  %v346_v32 = vmul.f32 %v7878_v25, %v226_v50  ;;  %7901 = vrcp.f32 %v314_v24 }
  0x43   : > { %972 = vmatpush1.bf16.msra.mxu0 %v7371_v37  ;;  %v7882_v34 = vpop.eup %7881  ;;  %v347_v35 = vmul.f32 %v7880_v30, %v227_v51  ;;  %7903 = vrcp.f32 %v315_v29  ;;  %v8357_v29 = vld [vmem:[%s8195_s10 + $0x38] sm:$0x11] }
  0x44   : > { %1356 = vmatpush1.bf16.msra.mxu1 %v7372_v40  ;;  %1770 = vmatprep.subr.bf16.mxu0 %v7375_v44  ;;  %v7884_v36 = vpop.eup %7883  ;;  %v348_v37 = vmul.f32 %v7882_v34, %v228_v54  ;;  %v366_v39 = vmul.f32 1.6778524, %v346_v32  ;;  %v8337_v44 = vsub.s32 %v410_v27, %v8326_v28 }
  0x45   : > { %2201 = vmatprep.subr.bf16.mxu1 %v7378_v53  ;;  %v7886_v40 = vpop.eup %7885  ;;  %v349_v42 = vmul.f32 %v7884_v36, %v229_v55  ;;  %v367_v43 = vmul.f32 1.6778524, %v347_v35 }
  0x46   : > { %v7888_v50 = vpop.eup %7887  ;;  %v350_v47 = vmul.f32 %v7886_v40, %v230_v56  ;;  %v368_v51 = vmul.f32 1.6778524, %v348_v37 }
  0x47   : > { %v7890_v45 = vpop.eup %7889  ;;  %v351_v46 = vmul.f32 %v7888_v50, %v231_v57  ;;  %v369_v54 = vmul.f32 1.6778524, %v349_v42  ;;  %v406_v52 = vcombine.low %v366_v39, %v367_v43  ;;  %v407_v53 = vcombine.high %v366_v39, %v367_v43 }
  0x48   : > { %v7892_v58 = vpop.eup %7891  ;;  %v370_v59 = vmul.f32 1.6778524, %v350_v47  ;;  %v316_v48 = vadd.f32 1.0, %v7890_v45  ;;  %v240_v42 = vunpack.c.l.bf16 %v8357_v29  ;;  %v241_v50 = vunpack.c.h.bf16 %v8357_v29  ;;  %v7423_v29 = vld [vmem:[%s10489_s1 + $0x284] ss:$8 sps:$4 sm:$0xff]  }
  0x49   : > { %v7894_v55 = vpop.eup %7893  ;;  %v371_v60 = vmul.f32 1.6778524, %v351_v46  ;;  %v414_v61 = vrot.slane %v406_v52, %v8337_v44  ;;  %v421_v62 = vrot.slane %v407_v53, %v8337_v44  ;;  %v424_v63 = vcombine.low %v368_v51, %v369_v54 }
  0x4a   : > { %v7896_v0 = vpop.eup %7895  ;;  %v317_v56 = vadd.f32 1.0, %v7892_v58  ;;  %v318_v1 = vadd.f32 1.0, %v7894_v55  ;;  %7905 = vrcp.f32 %v316_v48  ;;  %v260_v45 = vsub.f32 0.0, %v240_v42 }
  0x4b   : > { %v7898_v2 = vpop.eup %7897  ;;  %v422_v49 = vcombine.high %v414_v61, %v414_v61  ;;  %v423_v57 = vcombine.high %v421_v62, %v421_v62  ;;  %v431_v3 = vrot.slane %v424_v63, %v8337_v44  ;;  %v432_v4 = vcombine.low %v370_v59, %v371_v60 }
  0x4c   : > { %v7900_v5 = vpop.eup %7899  ;;  %v433_v6 = vcombine.high %v370_v59, %v371_v60  ;;  %v319_v7 = vadd.f32 1.0, %v7896_v0  ;;  %7907 = vrcp.f32 %v317_v56  ;;  %v352_v8 = vmul.f32 %v7898_v2, %v232_v16 }
  0x4d   : > { %v7902_v9 = vpop.eup %7901  ;;  %v440_v10 = vrot.slane %v432_v4, %v8337_v44  ;;  %v536_v11 = vcombine.low %v414_v61, %v422_v49  ;;  %v537_v14 = vcombine.low %v421_v62, %v423_v57  ;;  %7909 = vrcp.f32 %v318_v1 }
  0x4e   : > { %v7904_v15 = vpop.eup %7903  ;;  %v447_v19 = vrot.slane %v433_v6, %v8337_v44  ;;  %7911 = vrcp.f32 %v319_v7  ;;  %v353_v22 = vmul.f32 %v7900_v5, %v233_v17  ;;  %v354_v23 = vmul.f32 %v7902_v9, %v234_v18  ;;  %v7381_v6 = vld [vmem:[%s10489_s1 + $0x214] ss:$8 sps:$4 sm:$0xff]  }
  0x4f   : > { %v448_v24 = vcombine.high %v440_v10, %v440_v10  ;;  %v544_v25 = vrot.slane %v536_v11, %v8337_v44  ;;  %v551_v16 = vrot.slane %v537_v14, %v8337_v44  ;;  %v554_v27 = vcombine.low %v431_v3, %v440_v10  ;;  %v7382_v11 = vld [vmem:[%s10489_s1 + $0x310] ss:$8 sps:$4 sm:$0xff]  }
  0x50   : > { %v355_v30 = vmul.f32 %v7904_v15, %v235_v21  ;;  %v372_v32 = vmul.f32 1.6778524, %v352_v8  ;;  %v373_v34 = vmul.f32 1.6778524, %v353_v22  ;;  %v374_v35 = vmul.f32 1.6778524, %v354_v23 }
  0x51   : > { %v552_v36 = vcombine.low %v544_v25, %v551_v16  ;;  %v553_v12 = vcombine.high %v544_v25, %v551_v16  ;;  %v555_v17 = vcombine.low %v448_v24, %v447_v19  ;;  %v562_v37 = vrot.slane %v554_v27, %v8337_v44  ;;  %v7387_v23 = vld [vmem:[%s10489_s1 + $0x224] ss:$8 sps:$4 sm:$0xff]  }
  0x52   : > { %v375_v18 = vmul.f32 1.6778524, %v355_v30  ;;  %v449_v39 = vcombine.high %v447_v19, %v447_v19  ;;  %v450_v40 = vcombine.low %v372_v32, %v373_v34  ;;  %v261_v53 = vsub.f32 0.0, %v241_v50  ;;  %v7390_v24 = vld [vmem:[%s10489_s1 + $0x324] ss:$8 sps:$4 sm:$0xff]  }
  0x53   : > { %v569_v43 = vrot.slane %v555_v17, %v8337_v44  ;;  %v294_v60 = vmul.f32 1.442695, %v260_v45  ;;  %v8422_v25 = vld [vmem:[%s8195_s10 + $0x40] sm:$0xff]  ;;  %v8425_v30 = vld [vmem:[%s8195_s10 + $0x48] sm:$0x11] }
  0x54   : > { %v7906_v47 = vpop.eup %7905  ;;  %v457_v13 = vrot.slane %v450_v40, %v8337_v44  ;;  %v458_v21 = vcombine.low %v374_v35, %v375_v18  ;;  %v459_v51 = vcombine.high %v374_v35, %v375_v18  ;;  %v296_v56 = vmul.f32 1.442695, %v261_v53 }
  0x55   : > { %v570_v46 = vcombine.low %v562_v37, %v569_v43  ;;  %v571_v54 = vcombine.high %v562_v37, %v569_v43  ;;  %v356_v52 = vmul.f32 %v7906_v47, %v236_v31  ;;  %v7373_v31 = vld [vmem:[%s10489_s1 + $0x200] ss:$8 sps:$4 sm:$0xff]   ;;  %7913 = vpow2.f32 %v294_v60 }
  0x56   : > { %v7908_v58 = vpop.eup %7907  ;;  %v466_v59 = vrot.slane %v458_v21, %v8337_v44  ;;  %v473_v48 = vrot.slane %v459_v51, %v8337_v44  ;;  %v572_v55 = vcombine.low %v449_v39, %v457_v13  ;;  %7915 = vpow2.f32 %v296_v56  ;;  %v7385_v37 = vld [vmem:[%s10489_s1 + $0x220] ss:$8 sps:$4 sm:$0xff]   ;;  %v7393_v13 = vld [vmem:[%s10489_s1 + $0x234] ss:$8 sps:$4 sm:$0xff]  }
  0x57   : > { %v7910_v61 = vpop.eup %7909  ;;  %v7256_v62 = vpack.c.bf16 %v571_v54, %v570_v46  ;;  %v357_v63 = vmul.f32 %v7908_v58, %v237_v33  ;;  %v376_v0 = vmul.f32 1.6778524, %v356_v52  ;;  %v8381_v3 = vpack.c.bf16 %v571_v54, %v553_v12  ;;  %v7388_v47 = vld [vmem:[%s10489_s1 + $0x320] ss:$8 sps:$4 sm:$0xff]   ;;  %v7396_v51 = vld [vmem:[%s10489_s1 + $0x334] ss:$8 sps:$4 sm:$0xff]  }
  0x58   : > { %v7912_v1 = vpop.eup %7911  ;;  %v358_v2 = vmul.f32 %v7910_v61, %v238_v38  ;;  %v474_v49 = vcombine.high %v466_v59, %v466_v59  ;;  %v475_v57 = vcombine.high %v473_v48, %v473_v48  ;;  %v8383_v4 = vpack.c.bf16 %v570_v46, %v552_v36  ;;  %v7384_v38 = vld [vmem:[%s10489_s1 + $0x314] ss:$8 sps:$4 sm:$0xff]   ;;  %v7391_v52 = vld [vmem:[%s10489_s1 + $0x230] ss:$8 sps:$4 sm:$0xff]   ;;  %v7399_v61 = vld [vmem:[%s10489_s1 + $0x244] ss:$8 sps:$4 sm:$0xff]  }
  0x59   : > { %711 = vst [vmem:[#allocation2 + $0x8] sm:$0xff] %v7256_v62  ;;  %v359_v33 = vmul.f32 %v7912_v1, %v239_v41  ;;  %v377_v5 = vmul.f32 1.6778524, %v357_v63  ;;  %v580_v9 = vrot.slane %v572_v55, %v8337_v44  ;;  %973 = vmatprep.mubr.bf16.mxu0 %v8381_v3  ;;  %1357 = vmatprep.mubr.bf16.mxu1 %v8381_v3  ;;  %v242_v32 = vunpack.c.l.bf16 %v8422_v25 }
  0x5a   : > { %v8396_v7 = vmul.f32 1.6778524, %v358_v2  ;;  %v573_v8 = vcombine.low %v466_v59, %v474_v49  ;;  %974 = vmatmul.mubr.bf16.vlgmr.msra.gmra.mrb[0].mxu0 %v8383_v4  ;;  %1358 = vmatmul.mubr.bf16.vlgmr.msra.gmra.mrb[0].mxu1 %v8383_v4  ;;  %v590_v22 = vcombine.low %v473_v48, %v475_v57  ;;  %v243_v34 = vunpack.c.h.bf16 %v8422_v25  ;;  %v7394_v59 = vld [vmem:[%s10489_s1 + $0x330] ss:$8 sps:$4 sm:$0xff]   ;;  %v7400_v57 = vld [vmem:[%s10489_s1 + $0x340] ss:$8 sps:$4 sm:$0xff]  }
  0x5b   : > { %v8404_v41 = vmul.f32 1.6778524, %v359_v33  ;;  %v476_v10 = vcombine.low %v376_v0, %v377_v5  ;;  %1771 = vmatpush1.bf16.msra.mxu0 %v7373_v31  ;;  %2202 = vmatpush1.bf16.msra.mxu1 %v7376_v20  ;;  %v244_v36 = vunpack.c.l.bf16 %v8425_v30  ;;  %v245_v12 = vunpack.c.h.bf16 %v8425_v30  ;;  %v7402_v0 = vld [vmem:[%s10489_s1 + $0x344] ss:$8 sps:$4 sm:$0xff]   ;;  %v7397_v31 = vld [vmem:[%s10489_s1 + $0x240] ss:$8 sps:$4 sm:$0xff]  }
  0x5c   : > { %v587_v14 = vrot.slane %v573_v8, %v8337_v44  ;;  %1772 = vmatprep.subr.bf16.mxu0 %v7381_v6  ;;  %2203 = vmatprep.subr.bf16.mxu1 %v7384_v38  ;;  %v262_v18 = vsub.f32 0.0, %v242_v32  ;;  %v263_v39 = vsub.f32 0.0, %v243_v34  ;;  %v598_v43 = vrot.slane %v590_v22, %v8337_v44  ;;  %v7405_v20 = vld [vmem:[%s10489_s1 + $0x254] ss:$8 sps:$4 sm:$0xff]   ;;  %v7403_v5 = vld [vmem:[%s10489_s1 + $0x250] ss:$8 sps:$4 sm:$0xff]  }
  0x5d   : > { %v483_v15 = vrot.slane %v476_v10, %v8337_v44  ;;  %v484_v19 = vcombine.low %v8396_v7, %v8404_v41  ;;  %v264_v21 = vsub.f32 0.0, %v244_v36  ;;  %v265_v45 = vsub.f32 0.0, %v245_v12  ;;  %v7408_v33 = vld [vmem:[%s10489_s1 + $0x354] ss:$8 sps:$4 sm:$0xff]   ;;  %v7406_v6 = vld [vmem:[%s10489_s1 + $0x350] ss:$8 sps:$4 sm:$0xff]  }
  0x5e   : > { %v588_v16 = vcombine.low %v580_v9, %v587_v14  ;;  %v589_v27 = vcombine.high %v580_v9, %v587_v14  ;;  %v298_v46 = vmul.f32 1.442695, %v262_v18  ;;  %v300_v53 = vmul.f32 1.442695, %v263_v39  ;;  %v7411_v8 = vld [vmem:[%s10489_s1 + $0x264] ss:$8 sps:$4 sm:$0xff]  }
  0x5f   : > { %v8430_v35 = vrot.slane %v484_v19, %v8337_v44  ;;  %1773 = vmatpush1.bf16.msra.mxu0 %v7379_v26  ;;  %2204 = vmatpush1.bf16.msra.mxu1 %v7382_v11  ;;  %v7914_v58 = vpop.eup %7913  ;;  %v302_v63 = vmul.f32 1.442695, %v264_v21  ;;  %v304_v1 = vmul.f32 1.442695, %v265_v45  ;;  %v7414_v9 = vld [vmem:[%s10489_s1 + $0x364] ss:$8 sps:$4 sm:$0xff]   ;;  %v485_v26 = vcombine.high %v8396_v7, %v8404_v41 }
  0x60   : > { %v8434_v17 = vpack.c.bf16 %v589_v27, %v588_v16  ;;  %1774 = vmatprep.subr.bf16.mxu0 %v7387_v23  ;;  %2205 = vmatprep.subr.bf16.mxu1 %v7390_v24  ;;  %7917 = vpow2.f32 %v298_v46  ;;  %v7916_v48 = vpop.eup %7915  ;;  %v320_v62 = vadd.f32 1.0, %v7914_v58  ;;  %v7409_v14 = vld [vmem:[%s10489_s1 + $0x260] ss:$8 sps:$4 sm:$0xff]   ;;  %v7417_v7 = vld [vmem:[%s10489_s1 + $0x274] ss:$8 sps:$4 sm:$0xff]  }
  0x61   : > { %v591_v40 = vcombine.low %v483_v15, %v8430_v35  ;;  %v321_v56 = vadd.f32 1.0, %v7916_v48  ;;  %7919 = vpow2.f32 %v300_v53  ;;  %v7412_v19 = vld [vmem:[%s10489_s1 + $0x360] ss:$8 sps:$4 sm:$0xff]   ;;  %v7420_v41 = vld [vmem:[%s10489_s1 + $0x374] ss:$8 sps:$4 sm:$0xff]   ;;  %v499_v18 = vrot.slane %v485_v26, %v8337_v44 }
  0x62   : > { %7921 = vrcp.f32 %v320_v62  ;;  %v500_v39 = vcombine.high %v8430_v35, %v8430_v35  ;;  %v7421_v46 = vld [vmem:[%s10489_s1 + $0x280] ss:$8 sps:$4 sm:$0xff]   ;;  %v7429_v53 = vld [vmem:[%s10489_s1 + $0x294] ss:$8 sps:$4 sm:$0xff]   ;;  %v7427_v48 = vld [vmem:[%s10489_s1 + $0x290] ss:$8 sps:$4 sm:$0xff]  }
  0x63   : > { %v605_v54 = vrot.slane %v591_v40, %v8337_v44  ;;  %1775 = vmatpush1.bf16.msra.mxu0 %v7385_v37  ;;  %2206 = vmatpush1.bf16.msra.mxu1 %v7388_v47  ;;  %7923 = vrcp.f32 %v321_v56  ;;  %v501_v35 = vcombine.high %v499_v18, %v499_v18  ;;  %v7432_v58 = vld [vmem:[%s10489_s1 + $0x394] ss:$8 sps:$4 sm:$0xff]   ;;  %v7436_v25 = vld [vmem:[%s10489_s1 + $0x3a0] ss:$8 sps:$4 sm:$0xff]   ;;  %v7442_v30 = vld [vmem:[%s10489_s1 + $0x3b0] ss:$8 sps:$4 sm:$0xff]  }
  0x64   : > { %1776 = vmatprep.subr.bf16.mxu0 %v7393_v13  ;;  %2207 = vmatprep.subr.bf16.mxu1 %v7396_v51  ;;  %7925 = vpow2.f32 %v302_v63  ;;  %v608_v45 = vcombine.low %v500_v39, %v499_v18  ;;  %v8559_v63 = vld [vmem:[#allocation2 + $0x8] sm:$0xee] }
  0x65   : > { %v8465_v55 = vcombine.low %v598_v43, %v605_v54  ;;  %v8467_v60 = vcombine.high %v598_v43, %v605_v54  ;;  %7927 = vpow2.f32 %v304_v1  ;;  %v7424_v54 = vld [vmem:[%s10489_s1 + $0x380] ss:$8 sps:$4 sm:$0xff]   ;;  %v7430_v1 = vld [vmem:[%s10489_s1 + $0x390] ss:$8 sps:$4 sm:$0xff]   ;;  %v7447_v18 = vld [vmem:[%s10489_s1 + $0x2c4] ss:$8 sps:$4 sm:$0xff]  }
  0x66   : > { %v616_v62 = vrot.slane %v608_v45, %v8337_v44 }
  0x67   : > { %v8479_v2 = vpack.c.bf16 %v8467_v60, %v589_v27  ;;  %v8482_v49 = vpack.c.bf16 %v8465_v55, %v588_v16  ;;  %1777 = vmatpush1.bf16.msra.mxu0 %v7391_v52  ;;  %2208 = vmatpush1.bf16.msra.mxu1 %v7394_v59  ;;  %v7415_v27 = vld [vmem:[%s10489_s1 + $0x270] ss:$8 sps:$4 sm:$0xff]  }
  0x68   : > { %1778 = vmatprep.subr.bf16.mxu0 %v7399_v61  ;;  %2209 = vmatprep.subr.bf16.mxu1 %v7402_v0 }
  0x69   : > { %1367 = vmatprep.mubr.bf16.mxu1 %v8479_v2  ;;  %983 = vmatprep.mubr.bf16.mxu0 %v8479_v2 }
  0x6a   : > { %1368 = vmatmul.mubr.bf16.gmra.mrb[4].mxu1 %v8482_v49  ;;  %984 = vmatmul.mubr.bf16.gmra.mrb[4].mxu0 %v8482_v49  ;;  %v7918_v38 = vpop.eup %7917 }
  0x6b   : > { %1779 = vmatpush1.bf16.msra.mxu0 %v7397_v31  ;;  %2210 = vmatpush1.bf16.msra.mxu1 %v7400_v57  ;;  %v322_v10 = vadd.f32 1.0, %v7918_v38  ;;  %v7920_v11 = vpop.eup %7919  ;;  %v7435_v31 = vld [vmem:[%s10489_s1 + $0x2a4] ss:$8 sps:$4 sm:$0xff]   ;;  %v6683_v38 = vcombine.high %v8559_v63, %v8434_v17 }
  0x6c   : > { %1780 = vmatprep.subr.bf16.mxu0 %v7405_v20  ;;  %2211 = vmatprep.subr.bf16.mxu1 %v7408_v33  ;;  %v7922_v15 = vpop.eup %7921  ;;  %v323_v22 = vadd.f32 1.0, %v7920_v11  ;;  %v7438_v20 = vld [vmem:[%s10489_s1 + $0x3a4] ss:$8 sps:$4 sm:$0xff]   ;;  %v7441_v11 = vld [vmem:[%s10489_s1 + $0x2b4] ss:$8 sps:$4 sm:$0xff]  }
  0x6d   : > { %7929 = vrcp.f32 %v322_v10  ;;  %v7924_v23 = vpop.eup %7923  ;;  %v360_v24 = vmul.f32 %v7922_v15, %v240_v42  ;;  %v7418_v42 = vld [vmem:[%s10489_s1 + $0x370] ss:$8 sps:$4 sm:$0xff]   ;;  %v7433_v10 = vld [vmem:[%s10489_s1 + $0x2a0] ss:$8 sps:$4 sm:$0xff]  }
  0x6e   : > { %v7926_v16 = vpop.eup %7925  ;;  %v361_v37 = vmul.f32 %v7924_v23, %v241_v50  ;;  %7931 = vrcp.f32 %v323_v22  ;;  %v7426_v50 = vld [vmem:[%s10489_s1 + $0x384] ss:$8 sps:$4 sm:$0xff]  }
  0x6f   : > { %1781 = vmatpush1.bf16.msra.mxu0 %v7403_v5  ;;  %2212 = vmatpush1.bf16.msra.mxu1 %v7406_v6  ;;  %v7928_v40 = vpop.eup %7927  ;;  %v380_v43 = vmul.f32 1.6778524, %v360_v24  ;;  %v324_v47 = vadd.f32 1.0, %v7926_v16  ;;  %v2028_v24 = vrot.slane %v6683_v38, 1  ;;  %v7466_v38 = vld [vmem:[%s10489_s1 + $0x3f0] ss:$8 sps:$4 sm:$0xff]  }
  0x70   : > { %1782 = vmatprep.subr.bf16.mxu0 %v7411_v8  ;;  %2213 = vmatprep.subr.bf16.mxu1 %v7414_v9  ;;  %v381_v13 = vmul.f32 1.6778524, %v361_v37  ;;  %v325_v21 = vadd.f32 1.0, %v7928_v40 }
  0x71   : > { %7933 = vrcp.f32 %v324_v47 }
  0x72   : > { %v502_v51 = vcombine.low %v380_v43, %v381_v13  ;;  %7935 = vrcp.f32 %v325_v21  ;;  %v7448_v13 = vld [vmem:[%s10489_s1 + $0x3c0] ss:$8 sps:$4 sm:$0xff]  }
  0x73   : > { %1783 = vmatpush1.bf16.msra.mxu0 %v7409_v14  ;;  %2214 = vmatpush1.bf16.msra.mxu1 %v7412_v19  ;;  %v7444_v14 = vld [vmem:[%s10489_s1 + $0x3b4] ss:$8 sps:$4 sm:$0xff]  }
  0x74   : > { %1784 = vmatprep.subr.bf16.mxu0 %v7417_v7  ;;  %2215 = vmatprep.subr.bf16.mxu1 %v7420_v41  ;;  %v509_v52 = vrot.slane %v502_v51, %v8337_v44 }
  0x76   : > { %v609_v61 = vcombine.low %v501_v35, %v509_v52 }
  0x77   : > { %1785 = vmatpush1.bf16.msra.mxu0 %v7415_v27  ;;  %2216 = vmatpush1.bf16.msra.mxu1 %v7418_v42  ;;  %v7930_v59 = vpop.eup %7929  ;;  %v7445_v42 = vld [vmem:[%s10489_s1 + $0x2c0] ss:$8 sps:$4 sm:$0xff]  }
  0x78   : > { %1786 = vmatprep.subr.bf16.mxu0 %v7423_v29  ;;  %2217 = vmatprep.subr.bf16.mxu1 %v7426_v50  ;;  %v362_v0 = vmul.f32 %v7930_v59, %v242_v32  ;;  %v7932_v56 = vpop.eup %7931  ;;  %v623_v57 = vrot.slane %v609_v61, %v8337_v44  ;;  %v7453_v29 = vld [vmem:[%s10489_s1 + $0x2d4] ss:$8 sps:$4 sm:$0xff]   ;;  %v7459_v59 = vld [vmem:[%s10489_s1 + $0x2e4] ss:$8 sps:$4 sm:$0xff]  }
  0x79   : > { %v363_v32 = vmul.f32 %v7932_v56, %v243_v34  ;;  %v7456_v50 = vld [vmem:[%s10489_s1 + $0x3d4] ss:$8 sps:$4 sm:$0xff]  }
  0x7a   : > { %v382_v33 = vmul.f32 1.6778524, %v362_v0  ;;  %v8575_v5 = vcombine.low %v616_v62, %v623_v57  ;;  %v625_v6 = vcombine.high %v616_v62, %v623_v57  ;;  %v7465_v57 = vld [vmem:[%s10489_s1 + $0x2f4] ss:$8 sps:$4 sm:$0xff]  }
  0x7b   : > { %1787 = vmatpush1.bf16.msra.mxu0 %v7421_v46  ;;  %2218 = vmatpush1.bf16.msra.mxu1 %v7424_v54  ;;  %v7934_v8 = vpop.eup %7933  ;;  %v383_v9 = vmul.f32 1.6778524, %v363_v32  ;;  %v6682_v32 = vcombine.low %v8559_v63, %v8434_v17  ;;  %v7477_v17 = vld [vmem:[%s10489_s1 + $0x504] ss:$8 sps:$4 sm:$0xff]  }
  0x7c   : > { %1788 = vmatprep.subr.bf16.mxu0 %v7429_v53  ;;  %2219 = vmatprep.subr.bf16.mxu1 %v7432_v58  ;;  %v7936_v26 = vpop.eup %7935  ;;  %v364_v34 = vmul.f32 %v7934_v8, %v244_v36  ;;  %v7439_v36 = vld [vmem:[%s10489_s1 + $0x2b0] ss:$8 sps:$4 sm:$0xff]   ;;  %v8598_v23 = vpack.c.bf16 %v625_v6, %v625_v6  ;;  %v8602_v7 = vpack.c.bf16 %v8575_v5, %v8575_v5  ;;  %v7471_v8 = vld [vmem:[%s10489_s1 + $0x404] ss:$8 sps:$4 sm:$0xff]  }
  0x7d   : > { %v365_v15 = vmul.f32 %v7936_v26, %v245_v12  ;;  %v510_v19 = vcombine.low %v382_v33, %v383_v9  ;;  %v511_v22 = vcombine.high %v382_v33, %v383_v9  ;;  %v8008_v41 = vpack.c.bf16 %v625_v6, %v8467_v60  ;;  %v7450_v60 = vld [vmem:[%s10489_s1 + $0x3c4] ss:$8 sps:$4 sm:$0xff]   ;;  %v7451_v53 = vld [vmem:[%s10489_s1 + $0x2d0] ss:$8 sps:$4 sm:$0xff]   ;;  %v7475_v9 = vld [vmem:[%s10489_s1 + $0x500] ss:$8 sps:$4 sm:$0xff]  }
  0x7e   : > { %v384_v12 = vmul.f32 1.6778524, %v364_v34  ;;  %1377 = vmatprep.mubr.bf16.mxu1 %v8598_v23  ;;  %993 = vmatprep.mubr.bf16.mxu0 %v8598_v23  ;;  %v7454_v58 = vld [vmem:[%s10489_s1 + $0x3d0] ss:$8 sps:$4 sm:$0xff]   ;;  %v8009_v33 = vpack.c.bf16 %v8575_v5, %v8465_v55  ;;  %v2025_v55 = vrot.slane %v6682_v32, 1 }
  0x7f   : > { %1789 = vmatpush1.bf16.msra.mxu0 %v7427_v48  ;;  %2220 = vmatpush1.bf16.msra.mxu1 %v7430_v1  ;;  %v385_v16 = vmul.f32 1.6778524, %v365_v15  ;;  %v518_v27 = vrot.slane %v510_v19, %v8337_v44  ;;  %v525_v37 = vrot.slane %v511_v22, %v8337_v44  ;;  %v8613_v39 = vrot.slane %v8008_v41, 1  ;;  %v7462_v48 = vld [vmem:[%s10489_s1 + $0x3e4] ss:$8 sps:$4 sm:$0xff]  }
  0x80   : > { %1790 = vmatprep.subr.bf16.mxu0 %v7435_v31  ;;  %2221 = vmatprep.subr.bf16.mxu1 %v7438_v20  ;;  %v7460_v31 = vld [vmem:[%s10489_s1 + $0x3e0] ss:$8 sps:$4 sm:$0xff]   ;;  %v7468_v20 = vld [vmem:[%s10489_s1 + $0x3f4] ss:$8 sps:$4 sm:$0xff]   ;;  %v7463_v6 = vld [vmem:[%s10489_s1 + $0x2f0] ss:$8 sps:$4 sm:$0xff]  }
  0x81   : > { %v526_v40 = vcombine.high %v518_v27, %v518_v27  ;;  %v527_v43 = vcombine.high %v525_v37, %v525_v37  ;;  %v528_v47 = vcombine.low %v384_v12, %v385_v16  ;;  %v8628_v21 = vsel %vm10493_vm0, %v2028_v24, %v8613_v39  ;;  %1378 = vmatmul.mubr.bf16.gmra.mrb[8].mxu1 %v8602_v7  ;;  %v7469_v5 = vld [vmem:[%s10489_s1 + $0x400] ss:$8 sps:$4 sm:$0xff]   ;;  %v7472_v19 = vld [vmem:[%s10489_s1 + $0x410] ss:$8 sps:$4 sm:$0xff]   ;;  %v7480_v41 = vld [vmem:[%s10489_s1 + $0x424] ss:$8 sps:$4 sm:$0xff]  }
  0x82   : > { %994 = vmatmul.mubr.bf16.gmra.mrb[8].mxu0 %v8602_v7  ;;  %2233 = vmatprep.mubr.bf16.mxu1 %v8628_v21  ;;  %v2026_v63 = vrot.slane %v8009_v33, 1  ;;  %v7481_v22 = vld [vmem:[%s10489_s1 + $0x510] ss:$8 sps:$4 sm:$0xff]   ;;  %v7489_v24 = vld [vmem:[%s10489_s1 + $0x524] ss:$8 sps:$4 sm:$0xff]  }
  0x83   : > { %1791 = vmatpush1.bf16.msra.mxu0 %v7433_v10  ;;  %2222 = vmatpush1.bf16.msra.mxu1 %v7436_v25  ;;  %v535_v35 = vrot.slane %v528_v47, %v8337_v44  ;;  %v626_v51 = vcombine.low %v518_v27, %v526_v40  ;;  %v627_v45 = vcombine.low %v525_v37, %v527_v43  ;;  %v7474_v10 = vld [vmem:[%s10489_s1 + $0x414] ss:$8 sps:$4 sm:$0xff]   ;;  %v7487_v12 = vld [vmem:[%s10489_s1 + $0x520] ss:$8 sps:$4 sm:$0xff]   ;;  %v7484_v37 = vld [vmem:[%s10489_s1 + $0x430] ss:$8 sps:$4 sm:$0xff]  }
  0x84   : > { %1792 = vmatprep.subr.bf16.mxu0 %v7441_v11  ;;  %2223 = vmatprep.subr.bf16.mxu1 %v7444_v14  ;;  %v8694_v34 = vsel %vm10493_vm0, %v2025_v55, %v2026_v63  ;;  %v7483_v14 = vld [vmem:[%s10489_s1 + $0x514] ss:$8 sps:$4 sm:$0xff]   ;;  %v7499_v40 = vld [vmem:[%s10489_s1 + $0x540] ss:$8 sps:$4 sm:$0xff]   ;;  %v7540_v32 = vld [vmem:[%s10489_s1 + $0x4c4] ss:$8 sps:$4 sm:$0xff]  }
  0x85   : > { %v634_v46 = vrot.slane %v626_v51, %v8337_v44  ;;  %v641_v54 = vrot.slane %v627_v45, %v8337_v44  ;;  %v650_v52 = vrot.slane %v535_v35, %v8337_v44  ;;  %1802 = vmatprep.mubr.bf16.mxu0 %v8381_v3  ;;  %v7457_v3 = vld [vmem:[%s10489_s1 + $0x2e0] ss:$8 sps:$4 sm:$0xff]   ;;  %v7486_v16 = vld [vmem:[%s10489_s1 + $0x434] ss:$8 sps:$4 sm:$0xff]   ;;  %v7508_v45 = vld [vmem:[%s10489_s1 + $0x470] ss:$8 sps:$4 sm:$0xff]  }
  0x86   : > { %v7498_v43 = vld [vmem:[%s10489_s1 + $0x454] ss:$8 sps:$4 sm:$0xff]   ;;  %v7549_v33 = vld [vmem:[%s10489_s1 + $0x5c4] ss:$8 sps:$4 sm:$0xff]   ;;  %v7544_v55 = vld [vmem:[%s10489_s1 + $0x4d0] ss:$8 sps:$4 sm:$0xff]  }
  0x87   : > { %1793 = vmatpush1.bf16.msra.mxu0 %v7439_v36  ;;  %2224 = vmatpush1.bf16.msra.mxu1 %v7442_v30  ;;  %v642_v61 = vcombine.low %v634_v46, %v641_v54  ;;  %v643_v62 = vcombine.high %v634_v46, %v641_v54  ;;  %v651_v0 = vcombine.high %v650_v52, %v650_v52  ;;  %v7507_v47 = vld [vmem:[%s10489_s1 + $0x554] ss:$8 sps:$4 sm:$0xff]   ;;  %v7516_v46 = vld [vmem:[%s10489_s1 + $0x484] ss:$8 sps:$4 sm:$0xff]  }
  0x88   : > { %1794 = vmatprep.subr.bf16.mxu0 %v7447_v18  ;;  %2225 = vmatprep.subr.bf16.mxu1 %v7450_v60  ;;  %v7493_v18 = vld [vmem:[%s10489_s1 + $0x530] ss:$8 sps:$4 sm:$0xff]   ;;  %v7501_v60 = vld [vmem:[%s10489_s1 + $0x544] ss:$8 sps:$4 sm:$0xff]   ;;  %v7510_v35 = vld [vmem:[%s10489_s1 + $0x474] ss:$8 sps:$4 sm:$0xff]  }
  0x89   : > { %v7260_v56 = vpack.c.bf16 %v643_v62, %v642_v61  ;;  %v7261_v1 = vpack.c.bf16 %v651_v0, %v650_v52  ;;  %v7519_v51 = vld [vmem:[%s10489_s1 + $0x574] ss:$8 sps:$4 sm:$0xff]   ;;  %v7525_v54 = vld [vmem:[%s10489_s1 + $0x584] ss:$8 sps:$4 sm:$0xff]   ;;  %v7514_v52 = vld [vmem:[%s10489_s1 + $0x480] ss:$8 sps:$4 sm:$0xff]  }
  0x8a   : > { %v7529_v61 = vld [vmem:[%s10489_s1 + $0x590] ss:$8 sps:$4 sm:$0xff]   ;;  %v7528_v62 = vld [vmem:[%s10489_s1 + $0x4a4] ss:$8 sps:$4 sm:$0xff]  }
  0x8b   : > { %1795 = vmatpush1.bf16.msra.mxu0 %v7445_v42  ;;  %2226 = vmatpush1.bf16.msra.mxu1 %v7448_v13  ;;  %716 = vst [vmem:[#allocation2 + $0x30] sm:$0x11] %v7261_v1  ;;  %v7505_v42 = vld [vmem:[%s10489_s1 + $0x550] ss:$8 sps:$4 sm:$0xff]   ;;  %v7504_v13 = vld [vmem:[%s10489_s1 + $0x464] ss:$8 sps:$4 sm:$0xff]  }
  0x8c   : > { %1796 = vmatprep.subr.bf16.mxu0 %v7453_v29  ;;  %2227 = vmatprep.subr.bf16.mxu1 %v7456_v50  ;;  %v7513_v29 = vld [vmem:[%s10489_s1 + $0x564] ss:$8 sps:$4 sm:$0xff]   ;;  %v7502_v50 = vld [vmem:[%s10489_s1 + $0x460] ss:$8 sps:$4 sm:$0xff]  }
  0x8d   : > { %v7537_v0 = vld [vmem:[%s10489_s1 + $0x5a4] ss:$8 sps:$4 sm:$0xff]   ;;  %v7535_v1 = vld [vmem:[%s10489_s1 + $0x5a0] ss:$8 sps:$4 sm:$0xff]  }
  0x8f   : > { %1797 = vmatpush1.bf16.msra.mxu0 %v7451_v53  ;;  %2228 = vmatpush1.bf16.msra.mxu1 %v7454_v58  ;;  %v7523_v53 = vld [vmem:[%s10489_s1 + $0x580] ss:$8 sps:$4 sm:$0xff]   ;;  %v7522_v58 = vld [vmem:[%s10489_s1 + $0x494] ss:$8 sps:$4 sm:$0xff]  }
  0x90   : > { %1798 = vmatprep.subr.bf16.mxu0 %v7459_v59  ;;  %2229 = vmatprep.subr.bf16.mxu1 %v7462_v48  ;;  %v7531_v59 = vld [vmem:[%s10489_s1 + $0x594] ss:$8 sps:$4 sm:$0xff]   ;;  %v7520_v48 = vld [vmem:[%s10489_s1 + $0x490] ss:$8 sps:$4 sm:$0xff]  }
  0x92   : > { %v1966_v26 = vld [vmem:[#allocation2 + $0x30] sm:$0x11] }
  0x93   : > { %1799 = vmatpush1.bf16.msra.mxu0 %v7457_v3  ;;  %2230 = vmatpush1.bf16.msra.mxu1 %v7460_v31  ;;  %v6687_v25 = vcombine.high %v7260_v56, %v1966_v26  ;;  %v6686_v11 = vcombine.low %v7260_v56, %v1966_v26  ;;  %v7526_v56 = vld [vmem:[%s10489_s1 + $0x4a0] ss:$8 sps:$4 sm:$0xff]   ;;  %v7534_v3 = vld [vmem:[%s10489_s1 + $0x4b4] ss:$8 sps:$4 sm:$0xff]  }
  0x94   : > { %1800 = vmatprep.subr.bf16.mxu0 %v7465_v57  ;;  %2231 = vmatprep.subr.bf16.mxu1 %v7468_v20  ;;  %v7543_v31 = vld [vmem:[%s10489_s1 + $0x5b4] ss:$8 sps:$4 sm:$0xff]   ;;  %v7532_v57 = vld [vmem:[%s10489_s1 + $0x4b0] ss:$8 sps:$4 sm:$0xff]   ;;  %v7550_v26 = vld [vmem:[%s10489_s1 + $0x4e0] ss:$8 sps:$4 sm:$0xff]  }
  0x95   : > { %v8699_v15 = vrot.slane %v6687_v25, 1  ;;  %v8720_v30 = vrot.slane %v6686_v11, 1  ;;  %v7541_v20 = vld [vmem:[%s10489_s1 + $0x5b0] ss:$8 sps:$4 sm:$0xff]   ;;  %v7558_v25 = vld [vmem:[%s10489_s1 + $0x4f4] ss:$8 sps:$4 sm:$0xff]  }
  0x96   : > { %v7564_v11 = vld [vmem:[%s10489_s1 + $0x5f4] ss:$8 sps:$4 sm:$0xff]  }
  0x97   : > { %1801 = vmatpush1.bf16.msra.mxu0 %v7463_v6  ;;  %2232 = vmatpush1.bf16.msra.mxu1 %v7466_v38  ;;  %v8712_v36 = vsel %vm10493_vm0, %v8613_v39, %v8699_v15  ;;  %v8735_v27 = vsel %vm10493_vm0, %v2026_v63, %v8720_v30  ;;  %v7492_v39 = vld [vmem:[%s10489_s1 + $0x444] ss:$8 sps:$4 sm:$0xff]   ;;  %v7538_v6 = vld [vmem:[%s10489_s1 + $0x4c0] ss:$8 sps:$4 sm:$0xff]   ;;  %v7553_v63 = vld [vmem:[%s10489_s1 + $0x5d0] ss:$8 sps:$4 sm:$0xff]  }
  0x98   : > { %2585 = vmatprep.subr.bf16.mxu0 %v7471_v8  ;;  %3023 = vmatprep.subr.bf16.mxu1 %v7477_v17  ;;  %v7547_v38 = vld [vmem:[%s10489_s1 + $0x5c0] ss:$8 sps:$4 sm:$0xff]   ;;  %v7546_v8 = vld [vmem:[%s10489_s1 + $0x4d4] ss:$8 sps:$4 sm:$0xff]   ;;  %vm3583_vm0 = vcmask 1043456  }
  0x99   : > { %v7555_v17 = vld [vmem:[%s10489_s1 + $0x5d4] ss:$8 sps:$4 sm:$0xff]  }
  0x9a   : > { %1803 = vmatmul.mubr.bf16.vlgmr.msra.gmra.mrb[12].mxu0 %v8383_v4  ;;  %2234 = vmatmul.mubr.bf16.vlgmr.msra.gmra.mrb[12].mxu1 %v8694_v34  ;;  %v7478_v4 = vld [vmem:[%s10489_s1 + $0x420] ss:$8 sps:$4 sm:$0xff]  }
  0x9b   : > { %2586 = vmatpush1.bf16.msra.mxu0 %v7469_v5  ;;  %3024 = vmatpush1.bf16.msra.mxu1 %v7475_v9  ;;  %v7552_v5 = vld [vmem:[%s10489_s1 + $0x4e4] ss:$8 sps:$4 sm:$0xff]  }
  0x9c   : > { %2587 = vmatprep.subr.bf16.mxu0 %v7474_v10  ;;  %1812 = vmatprep.mubr.bf16.mxu0 %v8479_v2  ;;  %v7495_v2 = vld [vmem:[%s10489_s1 + $0x534] ss:$8 sps:$4 sm:$0xff]   ;;  %v7561_v9 = vld [vmem:[%s10489_s1 + $0x5e4] ss:$8 sps:$4 sm:$0xff]   ;;  %v7559_v10 = vld [vmem:[%s10489_s1 + $0x5e0] ss:$8 sps:$4 sm:$0xff]  }
  0x9d   : > { %2243 = vmatprep.mubr.bf16.mxu1 %v8712_v36  ;;  %3025 = vmatprep.subr.bf16.mxu1 %v7483_v14  ;;  %v7556_v14 = vld [vmem:[%s10489_s1 + $0x4f0] ss:$8 sps:$4 sm:$0xff]  }
  0x9f   : > { %2588 = vmatpush1.bf16.msra.mxu0 %v7472_v19  ;;  %3026 = vmatpush1.bf16.msra.mxu1 %v7481_v22  ;;  %v7562_v19 = vld [vmem:[%s10489_s1 + $0x5f0] ss:$8 sps:$4 sm:$0xff]  }
  0xa0   : > { %2589 = vmatprep.subr.bf16.mxu0 %v7480_v41  ;;  %3027 = vmatprep.subr.bf16.mxu1 %v7489_v24 }
  0xa2   : > { %1813 = vmatmul.mubr.bf16.gmra.mrb[16].mxu0 %v8482_v49  ;;  %2244 = vmatmul.mubr.bf16.gmra.mrb[16].mxu1 %v8735_v27  ;;  %v7490_v49 = vld [vmem:[%s10489_s1 + $0x440] ss:$8 sps:$4 sm:$0xff]  }
  0xa3   : > { %2590 = vmatpush1.bf16.msra.mxu0 %v7478_v4  ;;  %3028 = vmatpush1.bf16.msra.mxu1 %v7487_v12 }
  0xa4   : > { %2591 = vmatprep.subr.bf16.mxu0 %v7486_v16  ;;  %1822 = vmatprep.mubr.bf16.mxu0 %v8598_v23  ;;  %v7496_v23 = vld [vmem:[%s10489_s1 + $0x450] ss:$8 sps:$4 sm:$0xff]  }
  0xa5   : > { %2253 = vmatprep.mubr.bf16.mxu1 %v8699_v15  ;;  %3029 = vmatprep.subr.bf16.mxu1 %v7495_v2 }
  0xa7   : > { %2592 = vmatpush1.bf16.msra.mxu0 %v7484_v37  ;;  %3030 = vmatpush1.bf16.msra.mxu1 %v7493_v18 }
  0xa8   : > { %2593 = vmatprep.subr.bf16.mxu0 %v7492_v39  ;;  %3031 = vmatprep.subr.bf16.mxu1 %v7501_v60 }
  0xaa   : > { %1823 = vmatmul.mubr.bf16.gmra.mrb[20].mxu0 %v8602_v7  ;;  %2254 = vmatmul.mubr.bf16.gmra.mrb[20].mxu1 %v8720_v30  ;;  %v7511_v7 = vld [vmem:[%s10489_s1 + $0x560] ss:$8 sps:$4 sm:$0xff]  }
  0xab   : > { %2594 = vmatpush1.bf16.msra.mxu0 %v7490_v49  ;;  %3032 = vmatpush1.bf16.msra.mxu1 %v7499_v40 }
  0xac   : > { %2595 = vmatprep.subr.bf16.mxu0 %v7498_v43  ;;  %3033 = vmatprep.subr.bf16.mxu1 %v7507_v47 }
  0xad   : > { %2617 = vmatprep.mubr.bf16.mxu0 %v8628_v21  ;;  %3055 = vmatprep.mubr.bf16.mxu1 %v8628_v21  ;;  %v7517_v21 = vld [vmem:[%s10489_s1 + $0x570] ss:$8 sps:$4 sm:$0xff]  }
  0xaf   : > { %2596 = vmatpush1.bf16.msra.mxu0 %v7496_v23  ;;  %3034 = vmatpush1.bf16.msra.mxu1 %v7505_v42 }
  0xb0   : > { %2597 = vmatprep.subr.bf16.mxu0 %v7504_v13  ;;  %3035 = vmatprep.subr.bf16.mxu1 %v7513_v29 }
  0xb3   : > { %2598 = vmatpush1.bf16.msra.mxu0 %v7502_v50  ;;  %3036 = vmatpush1.bf16.msra.mxu1 %v7511_v7 }
  0xb4   : > { %2599 = vmatprep.subr.bf16.mxu0 %v7510_v35  ;;  %3037 = vmatprep.subr.bf16.mxu1 %v7519_v51 }
  0xb7   : > { %2600 = vmatpush1.bf16.msra.mxu0 %v7508_v45  ;;  %3038 = vmatpush1.bf16.msra.mxu1 %v7517_v21 }
  0xb8   : > { %2601 = vmatprep.subr.bf16.mxu0 %v7516_v46  ;;  %3039 = vmatprep.subr.bf16.mxu1 %v7525_v54 }
  0xbb   : > { %2602 = vmatpush1.bf16.msra.mxu0 %v7514_v52  ;;  %3040 = vmatpush1.bf16.msra.mxu1 %v7523_v53 }
  0xbc   : > { %2603 = vmatprep.subr.bf16.mxu0 %v7522_v58  ;;  %3041 = vmatprep.subr.bf16.mxu1 %v7531_v59 }
  0xbf   : > { %2604 = vmatpush1.bf16.msra.mxu0 %v7520_v48  ;;  %3042 = vmatpush1.bf16.msra.mxu1 %v7529_v61 }
  0xc0   : > { %2605 = vmatprep.subr.bf16.mxu0 %v7528_v62  ;;  %3043 = vmatprep.subr.bf16.mxu1 %v7537_v0 }
  0xc3   : > { %2606 = vmatpush1.bf16.msra.mxu0 %v7526_v56  ;;  %3044 = vmatpush1.bf16.msra.mxu1 %v7535_v1 }
  0xc4   : > { %2607 = vmatprep.subr.bf16.mxu0 %v7534_v3  ;;  %3045 = vmatprep.subr.bf16.mxu1 %v7543_v31 }
  0xc7   : > { %2608 = vmatpush1.bf16.msra.mxu0 %v7532_v57  ;;  %3046 = vmatpush1.bf16.msra.mxu1 %v7541_v20 }
  0xc8   : > { %2609 = vmatprep.subr.bf16.mxu0 %v7540_v32  ;;  %3047 = vmatprep.subr.bf16.mxu1 %v7549_v33 }
  0xcb   : > { %2610 = vmatpush1.bf16.msra.mxu0 %v7538_v6  ;;  %3048 = vmatpush1.bf16.msra.mxu1 %v7547_v38 }
  0xcc   : > { %2611 = vmatprep.subr.bf16.mxu0 %v7546_v8  ;;  %3049 = vmatprep.subr.bf16.mxu1 %v7555_v17 }
  0xcf   : > { %2612 = vmatpush1.bf16.msra.mxu0 %v7544_v55  ;;  %3050 = vmatpush1.bf16.msra.mxu1 %v7553_v63 }
  0xd0   : > { %2613 = vmatprep.subr.bf16.mxu0 %v7552_v5  ;;  %3051 = vmatprep.subr.bf16.mxu1 %v7561_v9 }
  0xd3   : > { %2614 = vmatpush1.bf16.msra.mxu0 %v7550_v26  ;;  %3052 = vmatpush1.bf16.msra.mxu1 %v7559_v10 }
  0xd4   : > { %2615 = vmatprep.subr.bf16.mxu0 %v7558_v25  ;;  %3053 = vmatprep.subr.bf16.mxu1 %v7564_v11 }
  0xd7   : > { %2616 = vmatpush1.bf16.msra.mxu0 %v7556_v14  ;;  %3054 = vmatpush1.bf16.msra.mxu1 %v7562_v19 }
  0xda   : > { %2618 = vmatmul.mubr.bf16.vlgmr.msra.gmra.mrb[24].mxu0 %v8694_v34  ;;  %3056 = vmatmul.mubr.bf16.vlgmr.msra.gmra.mrb[24].mxu1 %v8694_v34 }
  0xdb   : > { %2627 = vmatprep.mubr.bf16.mxu0 %v8712_v36  ;;  %3065 = vmatprep.mubr.bf16.mxu1 %v8712_v36 }
  0xe2   : > { %2628 = vmatmul.mubr.bf16.gmra.mrb[28].mxu0 %v8735_v27  ;;  %3066 = vmatmul.mubr.bf16.gmra.mrb[28].mxu1 %v8735_v27 }
  0xe3   : > { %2637 = vmatprep.mubr.bf16.mxu0 %v8699_v15  ;;  %3075 = vmatprep.mubr.bf16.mxu1 %v8699_v15 }
  0xea   : > { %2638 = vmatmul.mubr.bf16.gmra.mrb[32].mxu0 %v8720_v30  ;;  %3076 = vmatmul.mubr.bf16.gmra.mrb[32].mxu1 %v8720_v30 }
 0x12d   : > { %v975_v22 = vpop.f32.mrb[0].mxu0  ;;  %v1359_v34 = vpop.f32.mrb[0].mxu1 }
 0x12e   : > { %v977_v41 = vpop.f32.mrb[1].mxu0  ;;  %v1361_v24 = vpop.f32.mrb[1].mxu1 }
 0x12f   : > { %v1012_v36 = vcombine.low %v975_v22, %v977_v41  ;;  %v1013_v4 = vcombine.high %v975_v22, %v977_v41  ;;  %v1396_v12 = vcombine.low %v1359_v34, %v1361_v24  ;;  %v1397_v16 = vcombine.high %v1359_v34, %v1361_v24  ;;  %v979_v27 = vpop.f32.mrb[2].mxu0  ;;  %v1363_v2 = vpop.f32.mrb[2].mxu1 }
 0x130   : > { %v981_v15 = vpop.f32.mrb[3].mxu0  ;;  %v1365_v37 = vpop.f32.mrb[3].mxu1 }
 0x131   : > { %v1020_v30 = vrot.slane %v1012_v36, %v8337_v44  ;;  %v1027_v18 = vrot.slane %v1013_v4, %v8337_v44  ;;  %v1404_v39 = vrot.slane %v1396_v12, %v8337_v44  ;;  %v1411_v60 = vrot.slane %v1397_v16, %v8337_v44 }
 0x132   : > { %v1030_v49 = vcombine.low %v979_v27, %v981_v15  ;;  %v1031_v40 = vcombine.high %v979_v27, %v981_v15  ;;  %v1414_v43 = vcombine.low %v1363_v2, %v1365_v37  ;;  %v1415_v47 = vcombine.high %v1363_v2, %v1365_v37 }
 0x133   : > { %v1412_v23 = vcombine.high %v1404_v39, %v1404_v39  ;;  %v1413_v42 = vcombine.high %v1411_v60, %v1411_v60  ;;  %v6582_v13 = vrot.slane %v1404_v39, 9  ;;  %v1498_v29 = vrot.slane %v1411_v60, 7 }
 0x134   : > { %v1038_v50 = vrot.slane %v1030_v49, %v8337_v44  ;;  %v1422_v51 = vrot.slane %v1414_v43, %v8337_v44  ;;  %v1429_v45 = vrot.slane %v1415_v47, %v8337_v44  ;;  %v1028_v46 = vcombine.high %v1020_v30, %v1020_v30  ;;  %v7570_v43 = vld [vmem:[%s10490_s2 + $0x104] ss:$8 sps:$4 sm:$0xff]  }
 0x135   : > { %v1495_v7 = vrot.slane %v1412_v23, 7  ;;  %v1501_v35 = vrot.slane %v1413_v42, 7  ;;  %v1029_v54 = vcombine.high %v1027_v18, %v1027_v18  ;;  %v1500_v52 = vrot.slane %v1498_v29, 2  ;;  %4234 = vmatprep.subr.bf16.mxu1 %v7570_v43 }
 0x136   : > { %v1046_v53 = vcombine.high %v1038_v50, %v1038_v50  ;;  %v1430_v48 = vcombine.high %v1422_v51, %v1422_v51  ;;  %v1431_v61 = vcombine.high %v1429_v45, %v1429_v45  ;;  %v1504_v62 = vrot.slane %v1422_v51, 7 }
 0x137   : > { %v1497_v58 = vrot.slane %v1495_v7, 2  ;;  %v1503_v59 = vrot.slane %v1501_v35, 2  ;;  %v1508_v0 = vrot.slane %v1429_v45, 7  ;;  %v1496_v56 = vsel %vm8918_vm7, %v6582_v13, %v1495_v7  ;;  %v7565_v13 = vld [vmem:[%s10490_s2] ss:$8 sps:$4 sm:$0xff]  }
 0x138   : > { %v1502_v1 = vsel %vm8918_vm7, %v1500_v52, %v1501_v35  ;;  %v6583_v3 = vrot.slane %v1430_v48, 9  ;;  %v8926_v31 = vrot.slane %v1431_v61, 7  ;;  %v8930_v20 = vadd.f32 %v1496_v56, %v1020_v30 }
 0x139   : > { %v1499_v57 = vsel %vm8918_vm7, %v1497_v58, %v1498_v29  ;;  %v1510_v32 = vrot.slane %v1508_v0, 2  ;;  %v8934_v6 = vadd.f32 %v1502_v1, %v1027_v18  ;;  %v1505_v38 = vsel %vm8918_vm7, %v1503_v59, %v1504_v62  ;;  %v7568_v29 = vld [vmem:[%s10490_s2 + $0x100] ss:$8 sps:$4 sm:$0xff]  }
 0x13a   : > { %v8932_v33 = vadd.f32 %v1499_v57, %v1028_v46  ;;  %v8939_v8 = vrot.slane %v1031_v40, %v8337_v44  ;;  %v1509_v17 = vsel %vm8918_vm7, %v6583_v3, %v1508_v0  ;;  %v8943_v55 = vadd.f32 %v1505_v38, %v1029_v54  ;;  %v7567_v40 = vld [vmem:[%s10490_s2 + $0x4] ss:$8 sps:$4 sm:$0xff]   ;;  %4235 = vmatpush1.bf16.msra.mxu1 %v7568_v29 }
 0x13b   : > { %v8945_v63 = vadd.f32 %v1509_v17, %v1046_v53  ;;  %v1512_v5 = vsel %vm8918_vm7, %v1510_v32, %v8926_v31  ;;  %v1513_v47 = vrot.slane %v8926_v31, 2  ;;  %3850 = vmatprep.subr.bf16.mxu0 %v7567_v40 }
 0x13c   : > { %v8951_v10 = vadd.f32 %v1512_v5, %v8939_v8  ;;  %3851 = vmatpush1.bf16.msra.mxu0 %v7565_v13  ;;  %v1047_v53 = vcombine.high %v8939_v8, %v8939_v8 }
 0x13d   : > { %v1369_v9 = vpop.f32.mrb[4].mxu1  ;;  %v985_v26 = vpop.f32.mrb[4].mxu0 }
 0x13e   : > { %v1371_v25 = vpop.f32.mrb[5].mxu1  ;;  %v987_v11 = vpop.f32.mrb[5].mxu0 }
 0x13f   : > { %v1432_v14 = vcombine.low %v1369_v9, %v1371_v25  ;;  %v1433_v19 = vcombine.high %v1369_v9, %v1371_v25  ;;  %v1373_v22 = vpop.f32.mrb[6].mxu1  ;;  %v1048_v34 = vcombine.low %v985_v26, %v987_v11  ;;  %v1049_v41 = vcombine.high %v985_v26, %v987_v11  ;;  %v8953_v24 = vpop.f32.mrb[6].mxu0  ;;  %v7573_v25 = vld [vmem:[%s10490_s2 + $0x14] ss:$8 sps:$4 sm:$0xff]  }
 0x140   : > { %v1375_v36 = vpop.f32.mrb[7].mxu1  ;;  %v8955_v4 = vpop.f32.mrb[7].mxu0  ;;  %v7576_v11 = vld [vmem:[%s10490_s2 + $0x114] ss:$8 sps:$4 sm:$0xff]   ;;  %3852 = vmatprep.subr.bf16.mxu0 %v7573_v25  ;;  %v7583_v25 = vld [vmem:[%s10490_s2 + $0x30] ss:$8 sps:$4 sm:$0xff]  }
 0x141   : > { %v1440_v12 = vrot.slane %v1432_v14, %v8337_v44  ;;  %v1447_v16 = vrot.slane %v1433_v19, %v8337_v44  ;;  %v1450_v27 = vcombine.low %v1373_v22, %v1375_v36  ;;  %v1451_v2 = vcombine.high %v1373_v22, %v1375_v36  ;;  %v7571_v14 = vld [vmem:[%s10490_s2 + $0x10] ss:$8 sps:$4 sm:$0xff]   ;;  %4236 = vmatprep.subr.bf16.mxu1 %v7576_v11  ;;  %v7579_v22 = vld [vmem:[%s10490_s2 + $0x24] ss:$8 sps:$4 sm:$0xff]   ;;  %v7577_v36 = vld [vmem:[%s10490_s2 + $0x20] ss:$8 sps:$4 sm:$0xff]  }
 0x142   : > { %v1063_v15 = vrot.slane %v1049_v41, %v8337_v44  ;;  %v1065_v37 = vcombine.low %v8953_v24, %v8955_v4  ;;  %v1066_v30 = vcombine.high %v8953_v24, %v8955_v4  ;;  %v1056_v42 = vrot.slane %v1048_v34, %v8337_v44  ;;  %v7574_v19 = vld [vmem:[%s10490_s2 + $0x110] ss:$8 sps:$4 sm:$0xff]   ;;  %3853 = vmatpush1.bf16.msra.mxu0 %v7571_v14  ;;  %v7582_v34 = vld [vmem:[%s10490_s2 + $0x124] ss:$8 sps:$4 sm:$0xff]   ;;  %v7580_v4 = vld [vmem:[%s10490_s2 + $0x120] ss:$8 sps:$4 sm:$0xff]  }
 0x143   : > { %v1448_v18 = vcombine.high %v1440_v12, %v1440_v12  ;;  %v1449_v39 = vcombine.high %v1447_v16, %v1447_v16  ;;  %v1514_v60 = vrot.slane %v1440_v12, 7  ;;  %v6584_v49 = vrot.slane %v1447_v16, 9  ;;  %4237 = vmatpush1.bf16.msra.mxu1 %v7574_v19  ;;  %3854 = vmatprep.subr.bf16.mxu0 %v7579_v22  ;;  %v7586_v11 = vld [vmem:[%s10490_s2 + $0x130] ss:$8 sps:$4 sm:$0xff]   ;;  %v7591_v14 = vld [vmem:[%s10490_s2 + $0x44] ss:$8 sps:$4 sm:$0xff]  }
 0x144   : > { %v1458_v23 = vrot.slane %v1450_v27, %v8337_v44  ;;  %v1073_v51 = vrot.slane %v1065_v37, %v8337_v44  ;;  %v1465_v45 = vrot.slane %v1451_v2, %v8337_v44  ;;  %v1064_v52 = vcombine.high %v1063_v15, %v1063_v15  ;;  %4238 = vmatprep.subr.bf16.mxu1 %v7582_v34  ;;  %v7594_v19 = vld [vmem:[%s10490_s2 + $0x144] ss:$8 sps:$4 sm:$0xff]   ;;  %v7589_v22 = vld [vmem:[%s10490_s2 + $0x40] ss:$8 sps:$4 sm:$0xff]  }
 0x145   : > { %v1516_v50 = vrot.slane %v1514_v60, 2  ;;  %v1517_v7 = vrot.slane %v1448_v18, 7  ;;  %v1521_v35 = vrot.slane %v1449_v39, 7  ;;  %v1515_v31 = vsel %vm8918_vm7, %v1513_v47, %v1514_v60  ;;  %v7592_v34 = vld [vmem:[%s10490_s2 + $0x140] ss:$8 sps:$4 sm:$0xff]  }
 0x146   : > { %v1466_v46 = vcombine.high %v1458_v23, %v1458_v23  ;;  %v1524_v54 = vrot.slane %v1458_v23, 7  ;;  %v1530_v0 = vrot.slane %v1465_v45, 7  ;;  %v1081_v3 = vcombine.high %v1073_v51, %v1073_v51  ;;  %3855 = vmatpush1.bf16.msra.mxu0 %v7577_v36 }
 0x147   : > { %v1523_v58 = vrot.slane %v1521_v35, 2  ;;  %v1518_v59 = vsel %vm8918_vm7, %v1516_v50, %v1517_v7  ;;  %v1522_v48 = vsel %vm8918_vm7, %v6584_v49, %v1521_v35  ;;  %v8997_v8 = vadd.f32 %v1515_v31, %v1047_v53  ;;  %4239 = vmatpush1.bf16.msra.mxu1 %v7580_v4 }
 0x148   : > { %v1526_v61 = vrot.slane %v1524_v54, 2  ;;  %v1527_v62 = vrot.slane %v1466_v46, 7  ;;  %v8987_v56 = vadd.f32 %v1518_v59, %v1056_v42  ;;  %v8989_v1 = vadd.f32 %v1522_v48, %v1063_v15 }
 0x149   : > { %v1525_v57 = vsel %vm8918_vm7, %v1523_v58, %v1524_v54  ;;  %v1467_v12 = vcombine.high %v1465_v45, %v1465_v45  ;;  %v1080_v27 = vrot.slane %v1066_v30, %v8337_v44 }
 0x14a   : > { %v1529_v32 = vrot.slane %v1527_v62, 2  ;;  %v1528_v38 = vsel %vm8918_vm7, %v1526_v61, %v1527_v62  ;;  %v8999_v17 = vadd.f32 %v1525_v57, %v1064_v52 }
 0x14b   : > { %v9001_v5 = vadd.f32 %v1528_v38, %v1073_v51  ;;  %v6585_v42 = vrot.slane %v1467_v12, 9  ;;  %v1082_v13 = vcombine.high %v1080_v27, %v1080_v27  ;;  %v7585_v38 = vld [vmem:[%s10490_s2 + $0x34] ss:$8 sps:$4 sm:$0xff]  }
 0x14c   : > { %v1531_v9 = vsel %vm8918_vm7, %v1529_v32, %v1530_v0  ;;  %v8019_v32 = vmov 0   ;;  %3856 = vmatprep.subr.bf16.mxu0 %v7585_v38 }
 0x14d   : > { %v9005_v26 = vadd.f32 %v1531_v9, %v1081_v3  ;;  %3479 = vst [vmem:[#allocation3 + $0x8] sm:$0xff] %v8019_v32  ;;  %3480 = vst [vmem:[#allocation3 + $0x10] sm:$0xff] %v8019_v32  ;;  %v7588_v9 = vld [vmem:[%s10490_s2 + $0x134] ss:$8 sps:$4 sm:$0xff]   ;;  %3857 = vmatpush1.bf16.msra.mxu0 %v7583_v25 }
 0x14e   : > { %3478 = vst [vmem:[#allocation3] sm:$0xff] %v8019_v32  ;;  %3481 = vst [vmem:[#allocation3 + $0x18] sm:$0xff] %v8019_v32  ;;  %4240 = vmatprep.subr.bf16.mxu1 %v7588_v9  ;;  %3858 = vmatprep.subr.bf16.mxu0 %v7591_v14 }
 0x14f   : > { %3484 = vst [vmem:[#allocation3 + $0x30] sm:$0x11] %v8019_v32  ;;  %4241 = vmatpush1.bf16.msra.mxu1 %v7586_v11  ;;  %v7604_v11 = vld [vmem:[%s10490_s2 + $0x160] ss:$8 sps:$4 sm:$0xff]  }
 0x150   : > { %4242 = vmatprep.subr.bf16.mxu1 %v7594_v19 }
 0x151   : > { %3859 = vmatpush1.bf16.msra.mxu0 %v7589_v22 }
 0x153   : > { %4243 = vmatpush1.bf16.msra.mxu1 %v7592_v34 }
 0x154   : > { %v1379_v41 = vpop.f32.mrb[8].mxu1 }
 0x155   : > { %v995_v24 = vpop.f32.mrb[8].mxu0  ;;  %v1381_v16 = vpop.f32.mrb[9].mxu1 }
 0x156   : > { %v997_v2 = vpop.f32.mrb[9].mxu0  ;;  %v1468_v15 = vcombine.low %v1379_v41, %v1381_v16  ;;  %v1469_v37 = vcombine.high %v1379_v41, %v1381_v16  ;;  %v1383_v49 = vpop.f32.mrb[10].mxu1 }
 0x157   : > { %v1083_v18 = vcombine.low %v995_v24, %v997_v2  ;;  %v1084_v39 = vcombine.high %v995_v24, %v997_v2  ;;  %v999_v60 = vpop.f32.mrb[10].mxu0  ;;  %v1384_v43 = vpop.f32.mrb[11].mxu1 }
 0x158   : > { %v1000_v40 = vpop.f32.mrb[11].mxu0  ;;  %v1476_v47 = vrot.slane %v1468_v15, %v8337_v44  ;;  %v1483_v23 = vrot.slane %v1469_v37, %v8337_v44 }
 0x159   : > { %v1091_v30 = vrot.slane %v1083_v18, %v8337_v44  ;;  %v1098_v51 = vrot.slane %v1084_v39, %v8337_v44  ;;  %v7597_v18 = vld [vmem:[%s10490_s2 + $0x54] ss:$8 sps:$4 sm:$0xff]  }
 0x15a   : > { %v1484_v29 = vcombine.high %v1476_v47, %v1476_v47  ;;  %v1485_v50 = vcombine.high %v1483_v23, %v1483_v23  ;;  %v1534_v7 = vrot.slane %v1476_v47, 7  ;;  %v1540_v35 = vrot.slane %v1483_v23, 7  ;;  %v7595_v23 = vld [vmem:[%s10490_s2 + $0x50] ss:$8 sps:$4 sm:$0xff]   ;;  %3860 = vmatprep.subr.bf16.mxu0 %v7597_v18 }
 0x15b   : > { %v1099_v58 = vcombine.high %v1091_v30, %v1091_v30  ;;  %3861 = vmatpush1.bf16.msra.mxu0 %v7595_v23 }
 0x15c   : > { %v1536_v45 = vrot.slane %v1534_v7, 2  ;;  %v1537_v46 = vrot.slane %v1484_v29, 7  ;;  %v1542_v54 = vrot.slane %v1540_v35, 2  ;;  %v1543_v52 = vrot.slane %v1485_v50, 7  ;;  %v7598_v50 = vld [vmem:[%s10490_s2 + $0x150] ss:$8 sps:$4 sm:$0xff]  }
 0x15d   : > { %v1535_v53 = vsel %vm8918_vm7, %v6585_v42, %v1534_v7  ;;  %v7600_v7 = vld [vmem:[%s10490_s2 + $0x154] ss:$8 sps:$4 sm:$0xff]  }
 0x15e   : > { %v1539_v59 = vrot.slane %v1537_v46, 2  ;;  %v9038_v48 = vadd.f32 %v1535_v53, %v1082_v13  ;;  %v1538_v61 = vsel %vm8918_vm7, %v1536_v45, %v1537_v46  ;;  %v1544_v62 = vsel %vm8918_vm7, %v1542_v54, %v1543_v52  ;;  %v7603_v54 = vld [vmem:[%s10490_s2 + $0x64] ss:$8 sps:$4 sm:$0xff]   ;;  %4244 = vmatprep.subr.bf16.mxu1 %v7600_v7 }
 0x15f   : > { %v9044_v0 = vadd.f32 %v1538_v61, %v1091_v30  ;;  %v9046_v3 = vadd.f32 %v1544_v62, %v1098_v51  ;;  %v7606_v52 = vld [vmem:[%s10490_s2 + $0x164] ss:$8 sps:$4 sm:$0xff]   ;;  %4245 = vmatpush1.bf16.msra.mxu1 %v7598_v50  ;;  %3862 = vmatprep.subr.bf16.mxu0 %v7603_v54 }
 0x160   : > { %v1541_v31 = vsel %vm8918_vm7, %v1539_v59, %v1540_v35  ;;  %4246 = vmatprep.subr.bf16.mxu1 %v7606_v52 }
 0x161   : > { %v9050_v57 = vadd.f32 %v1541_v31, %v1099_v58 }
 0x163   : > { %4247 = vmatpush1.bf16.msra.mxu1 %v7604_v11 }
 0x16d   : > { %v1804_v41 = vpop.f32.mrb[12].mxu0  ;;  %v2235_v24 = vpop.f32.mrb[12].mxu1 }
 0x16e   : > { %v1806_v36 = vpop.f32.mrb[13].mxu0  ;;  %v2237_v4 = vpop.f32.mrb[13].mxu1 }
 0x16f   : > { %v1841_v12 = vcombine.low %v1804_v41, %v1806_v36  ;;  %v1842_v16 = vcombine.high %v1804_v41, %v1806_v36  ;;  %v2272_v27 = vcombine.low %v2235_v24, %v2237_v4  ;;  %v2273_v2 = vcombine.high %v2235_v24, %v2237_v4  ;;  %v1808_v15 = vpop.f32.mrb[14].mxu0  ;;  %v2239_v37 = vpop.f32.mrb[14].mxu1 }
 0x170   : > { %v1810_v39 = vpop.f32.mrb[15].mxu0  ;;  %v2241_v60 = vpop.f32.mrb[15].mxu1 }
 0x171   : > { %v1849_v49 = vrot.slane %v1841_v12, %v8337_v44  ;;  %v1856_v40 = vrot.slane %v1842_v16, %v8337_v44  ;;  %v2280_v43 = vrot.slane %v2272_v27, %v8337_v44  ;;  %v2287_v47 = vrot.slane %v2273_v2, %v8337_v44  ;;  %v7609_v27 = vld [vmem:[%s10490_s2 + $0x74] ss:$8 sps:$4 sm:$0xff]  }
 0x172   : > { %v1859_v42 = vcombine.low %v1808_v15, %v1810_v39  ;;  %v1860_v13 = vcombine.high %v1808_v15, %v1810_v39  ;;  %v2290_v30 = vcombine.low %v2239_v37, %v2241_v60  ;;  %v2291_v29 = vcombine.high %v2239_v37, %v2241_v60  ;;  %v7607_v60 = vld [vmem:[%s10490_s2 + $0x70] ss:$8 sps:$4 sm:$0xff]  }
 0x173   : > { %v1857_v35 = vcombine.high %v1849_v49, %v1849_v49  ;;  %v1858_v51 = vcombine.high %v1856_v40, %v1856_v40  ;;  %v1946_v45 = vadd.f32 %v1856_v40, %v8932_v33  ;;  %v2288_v46 = vcombine.high %v2280_v43, %v2280_v43  ;;  %v7601_v33 = vld [vmem:[%s10490_s2 + $0x60] ss:$8 sps:$4 sm:$0xff]  }
 0x174   : > { %v2289_v53 = vcombine.high %v2287_v47, %v2287_v47  ;;  %v1867_v58 = vrot.slane %v1859_v42, %v8337_v44  ;;  %v1874_v59 = vrot.slane %v1860_v13, %v8337_v44  ;;  %v2298_v61 = vrot.slane %v2290_v30, %v8337_v44  ;;  %3863 = vmatpush1.bf16.msra.mxu0 %v7601_v33 }
 0x175   : > { %v1945_v62 = vadd.f32 %v1857_v35, %v8930_v20  ;;  %v1947_v31 = vadd.f32 %v1858_v51, %v8934_v6  ;;  %v9107_v32 = vadd.f32 %v2288_v46, %v1946_v45  ;;  %v2305_v38 = vrot.slane %v2291_v29, %v8337_v44  ;;  %v1814_v9 = vpop.f32.mrb[16].mxu0  ;;  %v2245_v25 = vpop.f32.mrb[16].mxu1  ;;  %3864 = vmatprep.subr.bf16.mxu0 %v7609_v27  ;;  %v7615_v51 = vld [vmem:[%s10490_s2 + $0x84] ss:$8 sps:$4 sm:$0xff]  }
 0x176   : > { %v1875_v14 = vcombine.high %v1874_v59, %v1874_v59  ;;  %v1948_v19 = vadd.f32 %v1867_v58, %v8943_v55  ;;  %v1949_v22 = vadd.f32 %v1874_v59, %v8945_v63  ;;  %v2306_v34 = vcombine.high %v2298_v61, %v2298_v61  ;;  %v1816_v20 = vpop.f32.mrb[17].mxu0  ;;  %v2247_v41 = vpop.f32.mrb[17].mxu1  ;;  %v7612_v55 = vld [vmem:[%s10490_s2 + $0x174] ss:$8 sps:$4 sm:$0xff]   ;;  %v7618_v45 = vld [vmem:[%s10490_s2 + $0x184] ss:$8 sps:$4 sm:$0xff]  }
 0x177   : > { %v9115_v6 = vadd.f32 %v2280_v43, %v1945_v62  ;;  %v9117_v24 = vadd.f32 %v2287_v47, %v1947_v31  ;;  %v2307_v36 = vcombine.high %v2305_v38, %v2305_v38  ;;  %v1876_v4 = vcombine.low %v1814_v9, %v1816_v20  ;;  %v1818_v12 = vpop.f32.mrb[18].mxu0  ;;  %v2249_v16 = vpop.f32.mrb[18].mxu1  ;;  %4248 = vmatprep.subr.bf16.mxu1 %v7612_v55 }
 0x178   : > { %v9125_v63 = vadd.f32 %v2289_v53, %v1948_v19  ;;  %v1950_v2 = vadd.f32 %v1875_v14, %v8951_v10  ;;  %v9128_v15 = vadd.f32 %v2306_v34, %v1949_v22  ;;  %v1877_v37 = vcombine.high %v1814_v9, %v1816_v20  ;;  %v1820_v18 = vpop.f32.mrb[19].mxu0  ;;  %v2251_v39 = vpop.f32.mrb[19].mxu1  ;;  %v7610_v10 = vld [vmem:[%s10490_s2 + $0x170] ss:$8 sps:$4 sm:$0xff]   ;;  %3865 = vmatpush1.bf16.msra.mxu0 %v7607_v60 }
 0x179   : > { %v1884_v49 = vrot.slane %v1876_v4, %v8337_v44  ;;  %v2308_v40 = vcombine.low %v2245_v25, %v2247_v41  ;;  %v2309_v43 = vcombine.high %v2245_v25, %v2247_v41  ;;  %v1894_v47 = vcombine.low %v1818_v12, %v1820_v18  ;;  %4249 = vmatpush1.bf16.msra.mxu1 %v7610_v10 }
 0x17a   : > { %v9137_v23 = vadd.f32 %v2305_v38, %v1950_v2  ;;  %v1891_v42 = vrot.slane %v1877_v37, %v8337_v44  ;;  %v1895_v13 = vcombine.high %v1818_v12, %v1820_v18  ;;  %v2325_v30 = vcombine.low %v2249_v16, %v2251_v39  ;;  %v7616_v38 = vld [vmem:[%s10490_s2 + $0x180] ss:$8 sps:$4 sm:$0xff]   ;;  %3866 = vmatprep.subr.bf16.mxu0 %v7615_v51  ;;  %v7619_v37 = vld [vmem:[%s10490_s2 + $0x90] ss:$8 sps:$4 sm:$0xff]  }
 0x17b   : > { %v1892_v29 = vcombine.high %v1884_v49, %v1884_v49  ;;  %v1951_v50 = vadd.f32 %v1884_v49, %v8997_v8  ;;  %v2316_v7 = vrot.slane %v2308_v40, %v8337_v44  ;;  %v2323_v35 = vrot.slane %v2309_v43, %v8337_v44  ;;  %v7613_v8 = vld [vmem:[%s10490_s2 + $0x80] ss:$8 sps:$4 sm:$0xff]   ;;  %4250 = vmatprep.subr.bf16.mxu1 %v7618_v45  ;;  %v7622_v40 = vld [vmem:[%s10490_s2 + $0x190] ss:$8 sps:$4 sm:$0xff]  }
 0x17c   : > { %v1893_v46 = vcombine.high %v1891_v42, %v1891_v42  ;;  %v1902_v54 = vrot.slane %v1894_v47, %v8337_v44  ;;  %v1909_v52 = vrot.slane %v1895_v13, %v8337_v44  ;;  %v2326_v53 = vcombine.high %v2249_v16, %v2251_v39  ;;  %3867 = vmatpush1.bf16.msra.mxu0 %v7613_v8  ;;  %v7633_v8 = vld [vmem:[%s10490_s2 + $0xb4] ss:$8 sps:$4 sm:$0xff]  }
 0x17d   : > { %v9154_v58 = vadd.f32 %v2307_v36, %v1951_v50  ;;  %v1952_v59 = vadd.f32 %v1892_v29, %v8987_v56  ;;  %v2324_v61 = vcombine.high %v2323_v35, %v2323_v35  ;;  %v2333_v33 = vrot.slane %v2325_v30, %v8337_v44  ;;  %v1824_v62 = vpop.f32.mrb[20].mxu0  ;;  %v2255_v31 = vpop.f32.mrb[20].mxu1  ;;  %4251 = vmatpush1.bf16.msra.mxu1 %v7616_v38  ;;  %v7627_v30 = vld [vmem:[%s10490_s2 + $0xa4] ss:$8 sps:$4 sm:$0xff]   ;;  %v7640_v38 = vld [vmem:[%s10490_s2 + $0x1c0] ss:$8 sps:$4 sm:$0xff]  }
 0x17e   : > { %v1953_v9 = vadd.f32 %v1893_v46, %v8989_v1  ;;  %v1910_v25 = vcombine.high %v1902_v54, %v1902_v54  ;;  %v1954_v11 = vadd.f32 %v1902_v54, %v8999_v17  ;;  %v1956_v14 = vadd.f32 %v1909_v52, %v9005_v26  ;;  %v1826_v19 = vpop.f32.mrb[21].mxu0  ;;  %v2257_v22 = vpop.f32.mrb[21].mxu1  ;;  %v7621_v1 = vld [vmem:[%s10490_s2 + $0x94] ss:$8 sps:$4 sm:$0xff]   ;;  %v7630_v29 = vld [vmem:[%s10490_s2 + $0x1a4] ss:$8 sps:$4 sm:$0xff]  }
 0x17f   : > { %v9164_v56 = vadd.f32 %v2316_v7, %v1952_v59  ;;  %v2340_v34 = vrot.slane %v2326_v53, %v8337_v44  ;;  %v2341_v20 = vcombine.high %v2333_v33, %v2333_v33  ;;  %v1911_v41 = vcombine.low %v1824_v62, %v1826_v19  ;;  %v1828_v36 = vpop.f32.mrb[22].mxu0  ;;  %v2259_v4 = vpop.f32.mrb[22].mxu1  ;;  %v7624_v17 = vld [vmem:[%s10490_s2 + $0x194] ss:$8 sps:$4 sm:$0xff]   ;;  %3868 = vmatprep.subr.bf16.mxu0 %v7621_v1  ;;  %v7628_v54 = vld [vmem:[%s10490_s2 + $0x1a0] ss:$8 sps:$4 sm:$0xff]  }
 0x180   : > { %v9173_v26 = vadd.f32 %v2323_v35, %v1953_v9  ;;  %v9175_v12 = vadd.f32 %v2324_v61, %v1954_v11  ;;  %v1955_v16 = vadd.f32 %v1910_v25, %v9001_v5  ;;  %v1912_v27 = vcombine.high %v1824_v62, %v1826_v19  ;;  %v1829_v55 = vpop.f32.mrb[23].mxu0  ;;  %v2260_v2 = vpop.f32.mrb[23].mxu1  ;;  %4252 = vmatprep.subr.bf16.mxu1 %v7624_v17  ;;  %v7636_v61 = vld [vmem:[%s10490_s2 + $0x1b4] ss:$8 sps:$4 sm:$0xff]   ;;  %v7639_v62 = vld [vmem:[%s10490_s2 + $0xc4] ss:$8 sps:$4 sm:$0xff]  }
 0x181   : > { %v2342_v18 = vcombine.high %v2340_v34, %v2340_v34  ;;  %v9181_v39 = vadd.f32 %v2341_v20, %v1956_v14  ;;  %v1919_v60 = vrot.slane %v1911_v41, %v8337_v44  ;;  %v2343_v49 = vcombine.low %v2255_v31, %v2257_v22  ;;  %3869 = vmatpush1.bf16.msra.mxu0 %v7619_v37  ;;  %v7645_v9 = vld [vmem:[%s10490_s2 + $0xd4] ss:$8 sps:$4 sm:$0xff]   ;;  %v7643_v11 = vld [vmem:[%s10490_s2 + $0xd0] ss:$8 sps:$4 sm:$0xff]   ;;  %v7651_v19 = vld [vmem:[%s10490_s2 + $0xe4] ss:$8 sps:$4 sm:$0xff]  }
 0x182   : > { %v9187_v5 = vadd.f32 %v2333_v33, %v1955_v16  ;;  %v1926_v43 = vrot.slane %v1912_v27, %v8337_v44  ;;  %v2344_v47 = vcombine.high %v2255_v31, %v2257_v22  ;;  %4253 = vmatpush1.bf16.msra.mxu1 %v7622_v40  ;;  %3870 = vmatprep.subr.bf16.mxu0 %v7627_v30  ;;  %v7637_v33 = vld [vmem:[%s10490_s2 + $0xc0] ss:$8 sps:$4 sm:$0xff]   ;;  %v7642_v31 = vld [vmem:[%s10490_s2 + $0x1c4] ss:$8 sps:$4 sm:$0xff]   ;;  %v7648_v25 = vld [vmem:[%s10490_s2 + $0x1d4] ss:$8 sps:$4 sm:$0xff]  }
 0x183   : > { %v1927_v10 = vcombine.high %v1919_v60, %v1919_v60  ;;  %v1957_v42 = vadd.f32 %v1919_v60, %v9038_v48  ;;  %v2351_v13 = vrot.slane %v2343_v49, %v8337_v44  ;;  %v7625_v48 = vld [vmem:[%s10490_s2 + $0xa0] ss:$8 sps:$4 sm:$0xff]   ;;  %4254 = vmatprep.subr.bf16.mxu1 %v7630_v29  ;;  %v7646_v14 = vld [vmem:[%s10490_s2 + $0x1d0] ss:$8 sps:$4 sm:$0xff]   ;;  %v7654_v22 = vld [vmem:[%s10490_s2 + $0x1e4] ss:$8 sps:$4 sm:$0xff]  }
 0x184   : > { %v1928_v50 = vcombine.high %v1926_v43, %v1926_v43  ;;  %v1959_v7 = vadd.f32 %v1926_v43, %v9050_v57  ;;  %v2358_v35 = vrot.slane %v2344_v47, %v8337_v44  ;;  %v7649_v34 = vld [vmem:[%s10490_s2 + $0xe0] ss:$8 sps:$4 sm:$0xff]   ;;  %v7657_v41 = vld [vmem:[%s10490_s2 + $0xf4] ss:$8 sps:$4 sm:$0xff]   ;;  %v7655_v4 = vld [vmem:[%s10490_s2 + $0xf0] ss:$8 sps:$4 sm:$0xff]  }
 0x185   : > { %v9203_v51 = vadd.f32 %v2342_v18, %v1957_v42  ;;  %v1958_v45 = vadd.f32 %v1927_v10, %v9044_v0  ;;  %v2359_v46 = vcombine.high %v2351_v13, %v2351_v13  ;;  %3871 = vmatpush1.bf16.msra.mxu0 %v7625_v48  ;;  %v7631_v0 = vld [vmem:[%s10490_s2 + $0xb0] ss:$8 sps:$4 sm:$0xff]   ;;  %v7652_v20 = vld [vmem:[%s10490_s2 + $0x1e0] ss:$8 sps:$4 sm:$0xff]   ;;  %v7660_v36 = vld [vmem:[%s10490_s2 + $0x1f4] ss:$8 sps:$4 sm:$0xff]  }
 0x186   : > { %v1960_v57 = vadd.f32 %v1928_v50, %v9046_v3  ;;  %4255 = vmatpush1.bf16.msra.mxu1 %v7628_v54  ;;  %3872 = vmatprep.subr.bf16.mxu0 %v7633_v8  ;;  %v7634_v3 = vld [vmem:[%s10490_s2 + $0x1b0] ss:$8 sps:$4 sm:$0xff]   ;;  %v7663_v17 = vld [vmem:[%s10490_s2 + $0x204] ss:$8 sps:$4 sm:$0xff]   ;;  %v3218_v27 = vsub.s32 0, %v8326_v28  ;;  %v3222_v55 = vsub.s32 1, %v8326_v28 }
 0x187   : > { %v9210_v52 = vadd.f32 %v2351_v13, %v1958_v45  ;;  %v9212_v53 = vadd.f32 %v2359_v46, %v1959_v7  ;;  %4256 = vmatprep.subr.bf16.mxu1 %v7636_v61  ;;  %v7658_v1 = vld [vmem:[%s10490_s2 + $0x1f0] ss:$8 sps:$4 sm:$0xff]   ;;  %v7666_v16 = vld [vmem:[%s10490_s2 + $0x304] ss:$8 sps:$4 sm:$0xff]   ;;  %v3214_v2 = vld [vmem:[%s209_s30] sm:$0x3] }
 0x188   : > { %v9217_v59 = vadd.f32 %v2358_v35, %v1960_v57  ;;  %v3219_v37 = vrot.slane %v3214_v2, %v3218_v27  ;;  %v3223_v18 = vrot.slane %v3214_v2, %v3222_v55  ;;  %s7254_s30 = sshll.u32 %s10541_s16, 6 }
 0x189   : > { %3873 = vmatpush1.bf16.msra.mxu0 %v7631_v0  ;;  %s10414_s7 = scalar_lea.vmem %s10492_s4, %s7254_s30 }
 0x18a   : > { %4257 = vmatpush1.bf16.msra.mxu1 %v7634_v3  ;;  %3874 = vmatprep.subr.bf16.mxu0 %v7639_v62  ;;  %v3224_v60 = vcombine.low %v3219_v37, %v3223_v18  ;;  %v3225_v49 = vcombine.high %v3219_v37, %v3223_v18 }
 0x18b   : > { %4258 = vmatprep.subr.bf16.mxu1 %v7642_v31 }
 0x18c   : > { %v9289_v40 = vrot.slane %v3224_v60, %v8337_v44  ;;  %v9292_v43 = vrot.slane %v3225_v49, %v8337_v44 }
 0x18d   : > { %3875 = vmatpush1.bf16.msra.mxu0 %v7637_v33 }
 0x18e   : > { %3876 = vmatprep.subr.bf16.mxu0 %v7645_v9  ;;  %4259 = vmatpush1.bf16.msra.mxu1 %v7640_v38  ;;  %v9296_v45 = vcombine.high %v9289_v40, %v9289_v40  ;;  %v9300_v54 = vcombine.high %v9292_v43, %v9292_v43 }
 0x18f   : > { %4260 = vmatprep.subr.bf16.mxu1 %v7648_v25 }
 0x191   : > { %3877 = vmatpush1.bf16.msra.mxu0 %v7643_v11 }
 0x192   : > { %3878 = vmatprep.subr.bf16.mxu0 %v7651_v19  ;;  %4261 = vmatpush1.bf16.msra.mxu1 %v7646_v14 }
 0x193   : > { %4262 = vmatprep.subr.bf16.mxu1 %v7654_v22 }
 0x195   : > { %3879 = vmatpush1.bf16.msra.mxu0 %v7649_v34 }
 0x196   : > { %3880 = vmatprep.subr.bf16.mxu0 %v7657_v41  ;;  %4263 = vmatpush1.bf16.msra.mxu1 %v7652_v20 }
 0x197   : > { %4264 = vmatprep.subr.bf16.mxu1 %v7660_v36 }
 0x199   : > { %3881 = vmatpush1.bf16.msra.mxu0 %v7655_v4 }
 0x19a   : > { %4672 = vmatprep.subr.bf16.mxu0 %v7663_v17  ;;  %4265 = vmatpush1.bf16.msra.mxu1 %v7658_v1 }
 0x19b   : > { %5102 = vmatprep.subr.bf16.mxu1 %v7666_v16 }
 0x1ad   : > { %v2619_v47 = vpop.f32.mrb[24].mxu0  ;;  %v3057_v10 = vpop.f32.mrb[24].mxu1 }
 0x1ae   : > { %v2621_v42 = vpop.f32.mrb[25].mxu0  ;;  %v3059_v13 = vpop.f32.mrb[25].mxu1 }
 0x1af   : > { %v2656_v30 = vcombine.low %v2619_v47, %v2621_v42  ;;  %v2657_v29 = vcombine.high %v2619_v47, %v2621_v42  ;;  %v2623_v50 = vpop.f32.mrb[26].mxu0  ;;  %v3094_v28 = vcombine.low %v3057_v10, %v3059_v13  ;;  %v3095_v7 = vcombine.high %v3057_v10, %v3059_v13  ;;  %v3061_v35 = vpop.f32.mrb[26].mxu1 }
 0x1b0   : > { %v2625_v48 = vpop.f32.mrb[27].mxu0  ;;  %v3063_v46 = vpop.f32.mrb[27].mxu1 }
 0x1b1   : > { %v2664_v57 = vrot.slane %v2656_v30, %v8337_v44  ;;  %v2671_v8 = vrot.slane %v2657_v29, %v8337_v44  ;;  %v2674_v0 = vcombine.low %v2623_v50, %v2625_v48  ;;  %v2675_v3 = vcombine.high %v2623_v50, %v2625_v48 }
 0x1b2   : > { %v3102_v61 = vrot.slane %v3094_v28, %v8337_v44  ;;  %v3109_v33 = vrot.slane %v3095_v7, %v8337_v44  ;;  %v3112_v62 = vcombine.low %v3061_v35, %v3063_v46  ;;  %v3113_v31 = vcombine.high %v3061_v35, %v3063_v46 }
 0x1b3   : > { %v2672_v38 = vcombine.high %v2664_v57, %v2664_v57  ;;  %v2673_v9 = vcombine.high %v2671_v8, %v2671_v8  ;;  %v6784_v25 = vrot.slane %v2664_v57, 9  ;;  %v2751_v11 = vrot.slane %v2671_v8, 7 }
 0x1b4   : > { %v2682_v14 = vrot.slane %v2674_v0, %v8337_v44  ;;  %v2689_v19 = vrot.slane %v2675_v3, %v8337_v44  ;;  %v3110_v22 = vcombine.high %v3102_v61, %v3102_v61  ;;  %v3111_v34 = vcombine.high %v3109_v33, %v3109_v33 }
 0x1b5   : > { %v2748_v20 = vrot.slane %v2672_v38, 7  ;;  %v2753_v41 = vrot.slane %v2751_v11, 2  ;;  %v2754_v36 = vrot.slane %v2673_v9, 7  ;;  %v3120_v4 = vrot.slane %v3112_v62, %v8337_v44  ;;  %v2629_v1 = vpop.f32.mrb[28].mxu0  ;;  %v9309_v17 = vpop.f32.mrb[28].mxu1 }
 0x1b6   : > { %v2690_v16 = vcombine.high %v2682_v14, %v2682_v14  ;;  %v2691_v27 = vcombine.high %v2689_v19, %v2689_v19  ;;  %v2757_v55 = vrot.slane %v2682_v14, 7  ;;  %v2761_v2 = vrot.slane %v2689_v19, 7  ;;  %v2631_v37 = vpop.f32.mrb[29].mxu0  ;;  %v9311_v18 = vpop.f32.mrb[29].mxu1 }
 0x1b7   : > { %v2750_v60 = vrot.slane %v2748_v20, 2  ;;  %v2756_v49 = vrot.slane %v2754_v36, 2  ;;  %v2749_v47 = vsel %vm8918_vm7, %v6784_v25, %v2748_v20  ;;  %v2755_v10 = vsel %vm8918_vm7, %v2753_v41, %v2754_v36  ;;  %v9317_v42 = vpop.f32.mrb[30].mxu0  ;;  %v9319_v13 = vpop.f32.mrb[30].mxu1 }
 0x1b8   : > { %v6785_v30 = vrot.slane %v2690_v16, 9  ;;  %v2763_v29 = vrot.slane %v2761_v2, 2  ;;  %v9321_v50 = vrot.slane %v2691_v27, 7  ;;  %v2814_v28 = vadd.f32 %v2749_v47, %v9115_v6  ;;  %v9324_v7 = vpop.f32.mrb[31].mxu0  ;;  %v9326_v35 = vpop.f32.mrb[31].mxu1 }
 0x1b9   : > { %v2752_v48 = vsel %vm8918_vm7, %v2750_v60, %v2751_v11  ;;  %v2816_v46 = vadd.f32 %v2755_v10, %v9117_v24  ;;  %v2758_v57 = vsel %vm8918_vm7, %v2756_v49, %v2757_v55  ;;  %v3127_v8 = vrot.slane %v3113_v31, %v8337_v44 }
 0x1ba   : > { %v2766_v0 = vrot.slane %v9321_v50, 2  ;;  %v2815_v3 = vadd.f32 %v2752_v48, %v9107_v32  ;;  %v3198_v61 = vadd.f32 %v3110_v22, %v2814_v28  ;;  %v2762_v6 = vsel %vm8918_vm7, %v6785_v30, %v2761_v2 }
 0x1bb   : > { %v3200_v62 = vadd.f32 %v3111_v34, %v2816_v46  ;;  %v2765_v38 = vsel %vm8918_vm7, %v2763_v29, %v9321_v50  ;;  %v2817_v24 = vadd.f32 %v2758_v57, %v9125_v63  ;;  %v2818_v9 = vadd.f32 %v2762_v6, %v9128_v15 }
 0x1bc   : > { %v3199_v25 = vadd.f32 %v3109_v33, %v2815_v3  ;;  %v9344_v31 = vmul.f32 %v9289_v40, %v3198_v61  ;;  %v2819_v11 = vadd.f32 %v2765_v38, %v9137_v23  ;;  %v3128_v32 = vcombine.high %v3127_v8, %v3127_v8 }
 0x1bd   : > { %v9348_v14 = vmul.f32 %v9292_v43, %v3200_v62  ;;  %v3201_v19 = vadd.f32 %v3120_v4, %v2817_v24  ;;  %v3202_v22 = vadd.f32 %v3127_v8, %v2818_v9  ;;  %v2692_v34 = vcombine.low %v2629_v1, %v2631_v37  ;;  %v9350_v20 = vpop.f32.mrb[32].mxu0  ;;  %v9352_v41 = vpop.f32.mrb[32].mxu1 }
 0x1be   : > { %v9355_v63 = vmul.f32 %v9296_v45, %v3199_v25  ;;  %v3262_v15 = vsub.f32 0.0, %v9344_v31  ;;  %v3203_v33 = vadd.f32 %v3128_v32, %v2819_v11  ;;  %v2693_v36 = vcombine.high %v2629_v1, %v2631_v37  ;;  %v9358_v16 = vpop.f32.mrb[33].mxu0  ;;  %v9360_v23 = vpop.f32.mrb[33].mxu1 }
 0x1bf   : > { %v3264_v27 = vsub.f32 0.0, %v9348_v14  ;;  %v9364_v4 = vmul.f32 %v9300_v54, %v3201_v19  ;;  %v9367_v55 = vmul.f32 %v9289_v40, %v3202_v22  ;;  %v2700_v2 = vrot.slane %v2692_v34, %v8337_v44  ;;  %v2643_v60 = vpop.f32.mrb[34].mxu0  ;;  %v3081_v49 = vpop.f32.mrb[34].mxu1 }
 0x1c0   : > { %v3263_v47 = vsub.f32 0.0, %v9355_v63  ;;  %v3278_v10 = vmul.f32 1.442695, %v3262_v15  ;;  %v9372_v1 = vmul.f32 %v9296_v45, %v3203_v33  ;;  %v2707_v37 = vrot.slane %v2693_v36, %v8337_v44  ;;  %v2644_v30 = vpop.f32.mrb[35].mxu0  ;;  %v3082_v29 = vpop.f32.mrb[35].mxu1 }
 0x1c1   : > { %v3282_v50 = vmul.f32 1.442695, %v3264_v27  ;;  %v3265_v28 = vsub.f32 0.0, %v9364_v4  ;;  %v3266_v48 = vsub.f32 0.0, %v9367_v55  ;;  %v2708_v46 = vcombine.high %v2700_v2, %v2700_v2 }
 0x1c2   : > { %7937 = vpow2.f32 %v3278_v10  ;;  %v3280_v57 = vmul.f32 1.442695, %v3263_v47  ;;  %v3267_v8 = vsub.f32 0.0, %v9372_v1  ;;  %v2709_v3 = vcombine.high %v2707_v37, %v2707_v37 }
 0x1c3   : > { %7939 = vpow2.f32 %v3282_v50  ;;  %v3284_v61 = vmul.f32 1.442695, %v3265_v28  ;;  %v3286_v6 = vmul.f32 1.442695, %v3266_v48  ;;  %v2767_v62 = vrot.slane %v2700_v2, 7 }
 0x1c4   : > { %7941 = vpow2.f32 %v3280_v57  ;;  %v3288_v38 = vmul.f32 1.442695, %v3267_v8  ;;  %v2770_v24 = vrot.slane %v2708_v46, 7  ;;  %v6786_v9 = vrot.slane %v2707_v37, 9 }
 0x1c5   : > { %7943 = vpow2.f32 %v3284_v61  ;;  %v2769_v25 = vrot.slane %v2767_v62, 2  ;;  %v2774_v11 = vrot.slane %v2709_v3, 7  ;;  %v2710_v32 = vcombine.low %v9317_v42, %v9324_v7 }
 0x1c6   : > { %7945 = vpow2.f32 %v3286_v6  ;;  %v2711_v19 = vcombine.high %v9317_v42, %v9324_v7  ;;  %v2768_v22 = vsel %vm8918_vm7, %v2766_v0, %v2767_v62  ;;  %v3129_v34 = vcombine.low %v9309_v17, %v9311_v18 }
 0x1c7   : > { %7947 = vpow2.f32 %v3288_v38  ;;  %v2776_v15 = vrot.slane %v2774_v11, 2  ;;  %v2718_v33 = vrot.slane %v2710_v32, %v8337_v44  ;;  %v2771_v36 = vsel %vm8918_vm7, %v2769_v25, %v2770_v24 }
 0x1c8   : > { %v2725_v27 = vrot.slane %v2711_v19, %v8337_v44  ;;  %v2775_v2 = vsel %vm8918_vm7, %v6786_v9, %v2774_v11  ;;  %v2820_v42 = vadd.f32 %v2768_v22, %v9154_v58  ;;  %v2821_v7 = vadd.f32 %v2771_v36, %v9164_v56 }
 0x1c9   : > { %v2726_v0 = vcombine.high %v2718_v33, %v2718_v33  ;;  %v2777_v60 = vrot.slane %v2718_v33, 7  ;;  %v2822_v49 = vadd.f32 %v2775_v2, %v9173_v26  ;;  %v3130_v47 = vcombine.high %v9309_v17, %v9311_v18 }
 0x1ca   : > { %v2727_v10 = vcombine.high %v2725_v27, %v2725_v27  ;;  %v2783_v37 = vrot.slane %v2725_v27, 7  ;;  %v3137_v30 = vrot.slane %v3129_v34, %v8337_v44  ;;  %v3147_v29 = vcombine.low %v9319_v13, %v9326_v35 }
 0x1cb   : > { %v2779_v50 = vrot.slane %v2777_v60, 2  ;;  %v2780_v28 = vrot.slane %v2726_v0, 7  ;;  %v3144_v58 = vrot.slane %v3130_v47, %v8337_v44  ;;  %v2778_v56 = vsel %vm8918_vm7, %v2776_v15, %v2777_v60 }
 0x1cc   : > { %v7938_v48 = vpop.eup %7937  ;;  %v9403_v46 = vrot.slane %v2727_v10, 9  ;;  %v3145_v26 = vcombine.high %v3137_v30, %v3137_v30  ;;  %v3204_v57 = vadd.f32 %v3137_v30, %v2820_v42  ;;  %v2823_v17 = vadd.f32 %v2778_v56, %v9175_v12 }
 0x1cd   : > { %v7940_v18 = vpop.eup %7939  ;;  %v3310_v8 = vadd.f32 1.0, %v7938_v48  ;;  %v2782_v3 = vrot.slane %v2780_v28, 2  ;;  %v3146_v61 = vcombine.high %v3144_v58, %v3144_v58  ;;  %v2781_v6 = vsel %vm8918_vm7, %v2779_v50, %v2780_v28 }
 0x1ce   : > { %v7942_v62 = vpop.eup %7941  ;;  %v3312_v38 = vadd.f32 1.0, %v7940_v18  ;;  %v3205_v24 = vadd.f32 %v3145_v26, %v2821_v7  ;;  %v9409_v9 = vmul.f32 %v9292_v43, %v3204_v57  ;;  %v2824_v25 = vadd.f32 %v2781_v6, %v9187_v5 }
 0x1cf   : > { %v7944_v11 = vpop.eup %7943  ;;  %v3311_v32 = vadd.f32 1.0, %v7942_v62  ;;  %7949 = vrcp.f32 %v3310_v8  ;;  %v3206_v19 = vadd.f32 %v3146_v61, %v2822_v49  ;;  %v2784_v12 = vsel %vm8918_vm7, %v2782_v3, %v2783_v37 }
 0x1d0   : > { %v7946_v22 = vpop.eup %7945  ;;  %7951 = vrcp.f32 %v3312_v38  ;;  %v3313_v34 = vadd.f32 1.0, %v7944_v11  ;;  %v9415_v15 = vmul.f32 %v9300_v54, %v3205_v24  ;;  %v3268_v33 = vsub.f32 0.0, %v9409_v9 }
 0x1d1   : > { %v7948_v36 = vpop.eup %7947  ;;  %7953 = vrcp.f32 %v3311_v32  ;;  %v3314_v27 = vadd.f32 1.0, %v7946_v22  ;;  %v9419_v5 = vmul.f32 %v9289_v40, %v3206_v19  ;;  %v2825_v2 = vadd.f32 %v2784_v12, %v9181_v39 }
 0x1d2   : > { %v3315_v42 = vadd.f32 1.0, %v7948_v36  ;;  %7955 = vrcp.f32 %v3313_v34  ;;  %v3269_v7 = vsub.f32 0.0, %v9415_v15  ;;  %v3290_v0 = vmul.f32 1.442695, %v3268_v33 }
 0x1d3   : > { %7957 = vrcp.f32 %v3314_v27  ;;  %v3270_v60 = vsub.f32 0.0, %v9419_v5  ;;  %v3148_v49 = vcombine.high %v9319_v13, %v9326_v35  ;;  %v3155_v47 = vrot.slane %v3147_v29, %v8337_v44 }
 0x1d4   : > { %7959 = vrcp.f32 %v3315_v42  ;;  %v3292_v10 = vmul.f32 1.442695, %v3269_v7  ;;  %v2728_v37 = vcombine.low %v9350_v20, %v9358_v16  ;;  %v2729_v39 = vcombine.high %v9350_v20, %v9358_v16 }
 0x1d5   : > { %7961 = vpow2.f32 %v3290_v0  ;;  %v3294_v30 = vmul.f32 1.442695, %v3270_v60  ;;  %v3162_v50 = vrot.slane %v3148_v49, %v8337_v44  ;;  %v3163_v28 = vcombine.high %v3155_v47, %v3155_v47 }
 0x1d6   : > { %7963 = vpow2.f32 %v3292_v10  ;;  %v3207_v58 = vadd.f32 %v3155_v47, %v2823_v17  ;;  %v2736_v56 = vrot.slane %v2728_v37, %v8337_v44  ;;  %v2743_v13 = vrot.slane %v2729_v39, %v8337_v44 }
 0x1d7   : > { %7965 = vpow2.f32 %v3294_v30  ;;  %v3208_v35 = vadd.f32 %v3163_v28, %v2824_v25  ;;  %v3209_v29 = vadd.f32 %v3162_v50, %v2825_v2  ;;  %v3164_v48 = vcombine.low %v9352_v41, %v9360_v23 }
 0x1d8   : > { %v9437_v26 = vmul.f32 %v9296_v45, %v3207_v58  ;;  %v2744_v20 = vcombine.high %v2736_v56, %v2736_v56  ;;  %v2745_v16 = vcombine.high %v2743_v13, %v2743_v13  ;;  %v2787_v57 = vrot.slane %v2736_v56, 7 }
 0x1d9   : > { %v7950_v18 = vpop.eup %7949  ;;  %v9440_v8 = vmul.f32 %v9292_v43, %v3208_v35  ;;  %v9443_v17 = vmul.f32 %v9300_v54, %v3209_v29  ;;  %v2793_v3 = vrot.slane %v2743_v13, 7  ;;  %v3165_v61 = vcombine.high %v9352_v41, %v9360_v23 }
 0x1da   : > { %v7952_v6 = vpop.eup %7951  ;;  %v3342_v62 = vmul.f32 %v7950_v18, %v9344_v31  ;;  %v3271_v38 = vsub.f32 0.0, %v9437_v26  ;;  %v2789_v24 = vrot.slane %v2787_v57, 2  ;;  %v2790_v25 = vrot.slane %v2744_v20, 7 }
 0x1db   : > { %v7954_v11 = vpop.eup %7953  ;;  %v3344_v32 = vmul.f32 %v7952_v6, %v9348_v14  ;;  %v3272_v19 = vsub.f32 0.0, %v9440_v8  ;;  %v3273_v12 = vsub.f32 0.0, %v9443_v17  ;;  %v2795_v22 = vrot.slane %v2793_v3, 2 }
 0x1dc   : > { %v7956_v34 = vpop.eup %7955  ;;  %v3343_v33 = vmul.f32 %v7954_v11, %v9355_v63  ;;  %v3358_v36 = vmul.f32 1.6778524, %v3342_v62  ;;  %v3296_v27 = vmul.f32 1.442695, %v3271_v38  ;;  %v2792_v2 = vrot.slane %v2790_v25, 2 }
 0x1dd   : > { %v7958_v42 = vpop.eup %7957  ;;  %v3360_v31 = vmul.f32 1.6778524, %v3344_v32  ;;  %v3345_v7 = vmul.f32 %v7956_v34, %v9364_v4  ;;  %v3298_v0 = vmul.f32 1.442695, %v3272_v19  ;;  %v3300_v60 = vmul.f32 1.442695, %v3273_v12 }
 0x1de   : > { %v7960_v14 = vpop.eup %7959  ;;  %v3359_v49 = vmul.f32 1.6778524, %v3343_v33  ;;  %v3346_v47 = vmul.f32 %v7958_v42, %v9367_v55  ;;  %7967 = vpow2.f32 %v3296_v27  ;;  %v2796_v10 = vrot.slane %v2745_v16, 7 }
 0x1df   : > { %v7962_v37 = vpop.eup %7961  ;;  %v3347_v63 = vmul.f32 %v7960_v14, %v9372_v1  ;;  %v3361_v39 = vmul.f32 1.6778524, %v3345_v7  ;;  %7969 = vpow2.f32 %v3298_v0  ;;  %v2788_v30 = vsel %vm8918_vm7, %v9403_v46, %v2787_v57 }
 0x1e0   : > { %v7964_v4 = vpop.eup %7963  ;;  %v3390_v50 = vcombine.low %v3358_v36, %v3359_v49  ;;  %v9459_v28 = vmul.f32 1.6778524, %v3346_v47  ;;  %v3316_v58 = vadd.f32 1.0, %v7962_v37  ;;  %7971 = vpow2.f32 %v3300_v60  ;;  %v3508_v47 = vld [vmem:[#allocation3 + $0x8] sm:$0xee] }
 0x1e1   : > { %v7966_v56 = vpop.eup %7965  ;;  %v9461_v13 = vmul.f32 1.6778524, %v3347_v63  ;;  %v3391_v55 = vcombine.low %v3360_v31, %v3361_v39  ;;  %v3317_v35 = vadd.f32 1.0, %v7964_v4  ;;  %v2791_v1 = vsel %vm8918_vm7, %v2789_v24, %v2790_v25  ;;  %v7672_v36 = vld [vmem:[%s10490_s2 + $0x314] ss:$8 sps:$4 sm:$0xff]  }
 0x1e2   : > { %v3398_v29 = vrot.slane %v3390_v50, %v8337_v44  ;;  %v3318_v20 = vadd.f32 1.0, %v7966_v56  ;;  %7973 = vrcp.f32 %v3316_v58  ;;  %v2794_v46 = vsel %vm8918_vm7, %v2792_v2, %v2793_v3  ;;  %v7698_v60 = vld [vmem:[%s10490_s2 + $0x350] ss:$8 sps:$4 sm:$0xff]  }
 0x1e3   : > { %v3405_v16 = vrot.slane %v3391_v55, %v8337_v44  ;;  %v3408_v57 = vcombine.low %v9459_v28, %v9461_v13  ;;  %7975 = vrcp.f32 %v3317_v35  ;;  %v2797_v18 = vsel %vm8918_vm7, %v2795_v22, %v2796_v10 }
 0x1e4   : > { %v2826_v6 = vadd.f32 %v2788_v30, %v9203_v51  ;;  %v2827_v62 = vadd.f32 %v2791_v1, %v9210_v52  ;;  %v2828_v38 = vadd.f32 %v2794_v46, %v9212_v53  ;;  %v2829_v3 = vadd.f32 %v2797_v18, %v9217_v59 }
 0x1e5   : > { %v3406_v24 = vcombine.low %v3398_v29, %v3405_v16  ;;  %v3407_v25 = vcombine.high %v3398_v29, %v3405_v16  ;;  %7977 = vrcp.f32 %v3318_v20  ;;  %v3172_v11 = vrot.slane %v3164_v48, %v8337_v44 }
 0x1e6   : > { %v3179_v32 = vrot.slane %v3165_v61, %v8337_v44 }
 0x1e7   : > { %v7262_v19 = vpack.c.bf16 %v3407_v25, %v3406_v24  ;;  %v3180_v53 = vcombine.high %v3172_v11, %v3172_v11  ;;  %v3210_v12 = vadd.f32 %v3172_v11, %v2826_v6 }
 0x1e8   : > { %v7968_v51 = vpop.eup %7967  ;;  %v3181_v59 = vcombine.high %v3179_v32, %v3179_v32  ;;  %v3212_v22 = vadd.f32 %v3179_v32, %v2828_v38 }
 0x1e9   : > { %v7970_v34 = vpop.eup %7969  ;;  %v3491_v41 = vshrl.u32 %v7262_v19, 16  ;;  %v3494_v23 = vshll.u32 %v7262_v19, 16  ;;  %v3319_v61 = vadd.f32 1.0, %v7968_v51  ;;  %v3211_v2 = vadd.f32 %v3180_v53, %v2827_v62  ;;  %v9546_v53 = vld [vmem:[#allocation3] sm:$0xff] }
 0x1ea   : > { %v7972_v33 = vpop.eup %7971  ;;  %v3320_v27 = vadd.f32 1.0, %v7970_v34  ;;  %v3213_v42 = vadd.f32 %v3181_v59, %v2829_v3  ;;  %v9501_v31 = vmul.f32 %v9289_v40, %v3210_v12  ;;  %v9517_v10 = vmul.f32 %v9292_v43, %v3212_v22  ;;  %v7669_v34 = vld [vmem:[%s10490_s2 + $0x214] ss:$8 sps:$4 sm:$0xff]  }
 0x1eb   : > { %v3493_v7 = vrot.slane %v3491_v41, 6  ;;  %v3496_v0 = vrot.slane %v3494_v23, 7  ;;  %v3321_v14 = vadd.f32 1.0, %v7972_v33  ;;  %7979 = vrcp.f32 %v3319_v61 }
 0x1ec   : > { %v7974_v49 = vpop.eup %7973  ;;  %7981 = vrcp.f32 %v3320_v27  ;;  %v9514_v40 = vmul.f32 %v9296_v45, %v3211_v2  ;;  %v9520_v37 = vmul.f32 %v9300_v54, %v3213_v42  ;;  %v3274_v4 = vsub.f32 0.0, %v9501_v31  ;;  %v3518_v45 = vld [vmem:[#allocation3 + $0x10] sm:$0x33] }
 0x1ed   : > { %v7976_v63 = vpop.eup %7975  ;;  %v3497_v39 = vor.u32 %v3496_v0, %v3493_v7  ;;  %v3348_v30 = vmul.f32 %v7974_v49, %v9409_v9  ;;  %7983 = vrcp.f32 %v3321_v14  ;;  %v3276_v54 = vsub.f32 0.0, %v9517_v10  ;;  %v3544_v0 = vld [vmem:[#allocation3 + $0x10] sm:$0xcc] }
 0x1ee   : > { %v3349_v50 = vmul.f32 %v7976_v63, %v9415_v15  ;;  %v3275_v43 = vsub.f32 0.0, %v9514_v40  ;;  %v3277_v58 = vsub.f32 0.0, %v9520_v37  ;;  %v3302_v29 = vmul.f32 1.442695, %v3274_v4  ;;  %v7667_v63 = vld [vmem:[%s10490_s2 + $0x210] ss:$8 sps:$4 sm:$0xff]  }
 0x1ef   : > { %v3498_v56 = vrot.slane %v3497_v39, 4  ;;  %v3509_v9 = vsel %vm3507_vm8, %v3497_v39, %v3508_v47  ;;  %v3364_v55 = vmul.f32 1.6778524, %v3348_v30  ;;  %v7978_v35 = vpop.eup %7977  ;;  %v3306_v46 = vmul.f32 1.442695, %v3276_v54  ;;  %vm9580_vm8 = vmand %vm3547_vm14, %vm3548_vm15 }
 0x1f0   : > { %3510 = vst [vmem:[#allocation3 + $0x8] sm:$0xee] %v3509_v9  ;;  %v3365_v1 = vmul.f32 1.6778524, %v3349_v50  ;;  %v3304_v20 = vmul.f32 1.442695, %v3275_v43  ;;  %7985 = vpow2.f32 %v3302_v29  ;;  %v3350_v6 = vmul.f32 %v7978_v35, %v9419_v5  ;;  %vm3553_vm15 = vmor %vm9588_vm11, %vm9580_vm8 }
 0x1f1   : > { %v3519_v15 = vsel %vm3517_vm9, %v3498_v56, %v3518_v45  ;;  %v3308_v16 = vmul.f32 1.442695, %v3277_v58  ;;  %v3416_v62 = vrot.slane %v3408_v57, %v8337_v44  ;;  %vm3573_vm9 = vcmask 1043459   ;;  %v7670_v39 = vld [vmem:[%s10490_s2 + $0x310] ss:$8 sps:$4 sm:$0xff]  }
 0x1f2   : > { %3520 = vst [vmem:[#allocation3 + $0x10] sm:$0x33] %v3519_v15  ;;  %v3409_v18 = vcombine.low %v3364_v55, %v3365_v1  ;;  %7987 = vpow2.f32 %v3304_v20  ;;  %v3366_v19 = vmul.f32 1.6778524, %v3350_v6  ;;  %vm3576_vm14 = vcmask 1047559   ;;  %vm9623_vm2 = vmand %vm3573_vm9, %vm3574_vm10 }
 0x1f3   : > { %7989 = vpow2.f32 %v3306_v46  ;;  %v7676_v54 = vld [vmem:[%s10490_s2 + $0x224] ss:$8 sps:$4 sm:$0xff]   ;;  %v3554_v9 = vld [vmem:[#allocation3 + $0x18] sm:$0x77]  ;;  %vm9629_vm4 = vmand %vm3576_vm14, %vm3577_vm12  ;;  %vm3587_vm9 = vsmask.f32 7424 }
 0x1f4   : > { %v3423_v38 = vrot.slane %v3409_v18, %v8337_v44  ;;  %7991 = vpow2.f32 %v3308_v16  ;;  %v7679_v58 = vld [vmem:[%s10490_s2 + $0x324] ss:$8 sps:$4 sm:$0xff]   ;;  %v7674_v18 = vld [vmem:[%s10490_s2 + $0x220] ss:$8 sps:$4 sm:$0xff]   ;;  %vm3579_vm8 = vmor %vm9629_vm4, %vm9623_vm2  ;;  %vm3610_vm14 = vsmask.f32 7954 }
 0x1f5   : > { %v7980_v24 = vpop.eup %7979  ;;  %v7677_v6 = vld [vmem:[%s10490_s2 + $0x320] ss:$8 sps:$4 sm:$0xff]   ;;  %vm9655_vm10 = vmand %vm3583_vm0, %vm3584_vm5  ;;  %vm3620_vm4 = vsmask.f32 4352 }
 0x1f6   : > { %v7982_v25 = vpop.eup %7981  ;;  %v3424_v3 = vcombine.low %v3416_v62, %v3423_v38  ;;  %v3425_v11 = vcombine.high %v3416_v62, %v3423_v38  ;;  %v3351_v5 = vmul.f32 %v7980_v24, %v9437_v26  ;;  %v7661_v26 = vld [vmem:[%s10490_s2 + $0x200] ss:$8 sps:$4 sm:$0xff]   ;;  %v7683_v24 = vld [vmem:[%s10490_s2 + $0x234] ss:$8 sps:$4 sm:$0xff]   ;;  %vm9666_vm11 = vmand %vm3586_vm6, %vm3587_vm9 }
 0x1f7   : > { %v7984_v32 = vpop.eup %7983  ;;  %v3352_v28 = vmul.f32 %v7982_v25, %v9440_v8  ;;  %v3627_v13 = vld [vmem:[#allocation3 + $0x8] sm:$0xff]  ;;  %v7686_v25 = vld [vmem:[%s10490_s2 + $0x334] ss:$8 sps:$4 sm:$0xff]   ;;  %vm3589_vm12 = vmor %vm9666_vm11, %vm9655_vm10 }
 0x1f8   : > { %v7263_v57 = vpack.c.bf16 %v3425_v11, %v3424_v3  ;;  %v3353_v51 = vmul.f32 %v7984_v32, %v9443_v17  ;;  %v3367_v52 = vmul.f32 1.6778524, %v3351_v5  ;;  %v9549_v59 = vcombine.low %v9546_v53, %v3627_v13  ;;  %v7664_v17 = vld [vmem:[%s10490_s2 + $0x300] ss:$8 sps:$4 sm:$0xff]   ;;  %v3580_v5 = vld [vmem:[#allocation3 + $0x18] sm:$0x88]  ;;  %vm9770_vm5 = vmand %vm3586_vm6, %vm3610_vm14 }
 0x1f9   : > { %v3368_v8 = vmul.f32 1.6778524, %v3352_v28  ;;  %v9561_v22 = vcombine.high %v9546_v53, %v3627_v13  ;;  %v7684_v28 = vld [vmem:[%s10490_s2 + $0x330] ss:$8 sps:$4 sm:$0xff]   ;;  %vm9783_vm9 = vmand %vm1489_vm3, %vm3620_vm4  ;;  %vm10528_vm3 = vcmask 1046528  }
 0x1fa   : > { %v3527_v41 = vshrl.u32 %v7263_v57, 16  ;;  %v3530_v23 = vshll.u32 %v7263_v57, 16  ;;  %v3369_v61 = vmul.f32 1.6778524, %v3353_v51  ;;  %v3426_v33 = vcombine.low %v3366_v19, %v3367_v52  ;;  %v7986_v2 = vpop.eup %7985  ;;  %v7681_v19 = vld [vmem:[%s10490_s2 + $0x230] ss:$8 sps:$4 sm:$0xff]   ;;  %vm10530_vm10 = vmmov %vm10528_vm3 }
 0x1fb   : > { %3882 = vmatprep.mubr.bf16.mxu0 %v9561_v22  ;;  %4266 = vmatprep.mubr.bf16.mxu1 %v9561_v22  ;;  %v3322_v47 = vadd.f32 1.0, %v7986_v2  ;;  %v7689_v52 = vld [vmem:[%s10490_s2 + $0x244] ss:$8 sps:$4 sm:$0xff]   ;;  %v7716_v51 = vld [vmem:[%s10490_s2 + $0x380] ss:$8 sps:$4 sm:$0xff]   ;;  %vm10531_vm11 = vmmov %vm10528_vm3 }
 0x1fc   : > { %v3529_v42 = vrot.slane %v3527_v41, 5  ;;  %v3532_v7 = vrot.slane %v3530_v23, 6  ;;  %v3427_v14 = vcombine.low %v3368_v8, %v3369_v61  ;;  %3883 = vmatmul.mubr.bf16.vlgmr.msra.gmra.mrb[36].mxu0 %v9549_v59  ;;  %4267 = vmatmul.mubr.bf16.vlgmr.msra.gmra.mrb[36].mxu1 %v9549_v59  ;;  %v7988_v49 = vpop.eup %7987  ;;  %v3434_v45 = vrot.slane %v3426_v33, %v8337_v44  ;;  %v7690_v41 = vld [vmem:[%s10490_s2 + $0x340] ss:$8 sps:$4 sm:$0xff]   ;;  %v7697_v61 = vld [vmem:[%s10490_s2 + $0x254] ss:$8 sps:$4 sm:$0xff]   ;;  %vm10534_vm14 = vmmov %vm10528_vm3 }
 0x1fd   : > { %4673 = vmatpush1.bf16.msra.mxu0 %v7661_v26  ;;  %5103 = vmatpush1.bf16.msra.mxu1 %v7664_v17  ;;  %v7990_v30 = vpop.eup %7989  ;;  %v3323_v43 = vadd.f32 1.0, %v7988_v49  ;;  %7993 = vrcp.f32 %v3322_v47  ;;  %v7692_v26 = vld [vmem:[%s10490_s2 + $0x344] ss:$8 sps:$4 sm:$0xff]   ;;  %v7700_v33 = vld [vmem:[%s10490_s2 + $0x354] ss:$8 sps:$4 sm:$0xff]  }
 0x1fe   : > { %v3533_v4 = vor.u32 %v3532_v7, %v3529_v42  ;;  %v3441_v50 = vrot.slane %v3427_v14, %v8337_v44  ;;  %4674 = vmatprep.subr.bf16.mxu0 %v7669_v34  ;;  %5104 = vmatprep.subr.bf16.mxu1 %v7672_v36  ;;  %v7992_v56 = vpop.eup %7991  ;;  %v3324_v55 = vadd.f32 1.0, %v7990_v30  ;;  %v7687_v34 = vld [vmem:[%s10490_s2 + $0x240] ss:$8 sps:$4 sm:$0xff]  }
 0x1ff   : > { %v3325_v16 = vadd.f32 1.0, %v7992_v56  ;;  %7995 = vrcp.f32 %v3323_v43  ;;  %v7701_v43 = vld [vmem:[%s10490_s2 + $0x260] ss:$8 sps:$4 sm:$0xff]  }
 0x200   : > { %v3534_v35 = vrot.slane %v3533_v4, 4  ;;  %v3545_v1 = vsel %vm3543_vm13, %v3533_v4, %v3544_v0  ;;  %v3442_v29 = vcombine.low %v3434_v45, %v3441_v50  ;;  %v3443_v20 = vcombine.high %v3434_v45, %v3441_v50  ;;  %v7695_v0 = vld [vmem:[%s10490_s2 + $0x250] ss:$8 sps:$4 sm:$0xff]   ;;  %v7704_v56 = vld [vmem:[%s10490_s2 + $0x360] ss:$8 sps:$4 sm:$0xff]  }
 0x201   : > { %3546 = vst [vmem:[#allocation3 + $0x10] sm:$0xcc] %v3545_v1  ;;  %4675 = vmatpush1.bf16.msra.mxu0 %v7667_v63  ;;  %5105 = vmatpush1.bf16.msra.mxu1 %v7670_v39  ;;  %7997 = vrcp.f32 %v3324_v55  ;;  %vm3608_vm13 = vsmask.f32 7938 }
 0x202   : > { %v3555_v62 = vsel %vm3553_vm15, %v3534_v35, %v3554_v9  ;;  %v7264_v38 = vpack.c.bf16 %v3443_v20, %v3442_v29  ;;  %4676 = vmatprep.subr.bf16.mxu0 %v7676_v54  ;;  %5106 = vmatprep.subr.bf16.mxu1 %v7679_v58  ;;  %7999 = vrcp.f32 %v3325_v16  ;;  %v7706_v54 = vld [vmem:[%s10490_s2 + $0x364] ss:$8 sps:$4 sm:$0xff]   ;;  %v7709_v9 = vld [vmem:[%s10490_s2 + $0x274] ss:$8 sps:$4 sm:$0xff]   ;;  %vm3617_vm15 = vsmask.f32 256  ;;  %vm9758_vm2 = vmand %vm3583_vm0, %vm3608_vm13 }
 0x203   : > { %3556 = vst [vmem:[#allocation3 + $0x18] sm:$0x77] %v3555_v62  ;;  %v7712_v29 = vld [vmem:[%s10490_s2 + $0x374] ss:$8 sps:$4 sm:$0xff]   ;;  %v9749_v20 = vld [vmem:[#allocation3 + $0x8] sm:$0xee]  ;;  %vm9778_vm0 = vmand %vm1486_vm1, %vm3617_vm15 }
 0x204   : > { %v3563_v3 = vshll.u32 %v7264_v38, 16  ;;  %v3566_v11 = vshrl.u32 %v7264_v38, 16  ;;  %v7710_v62 = vld [vmem:[%s10490_s2 + $0x370] ss:$8 sps:$4 sm:$0xff]   ;;  %v7715_v38 = vld [vmem:[%s10490_s2 + $0x284] ss:$8 sps:$4 sm:$0xff]   ;;  %vm3612_vm1 = vmor %vm9770_vm5, %vm9758_vm2 }
 0x205   : > { %4677 = vmatpush1.bf16.msra.mxu0 %v7674_v18  ;;  %5107 = vmatpush1.bf16.msra.mxu1 %v7677_v6  ;;  %v7707_v18 = vld [vmem:[%s10490_s2 + $0x270] ss:$8 sps:$4 sm:$0xff]   ;;  %vm3622_vm6 = vmor %vm9783_vm9, %vm9778_vm0 }
 0x206   : > { %v3565_v13 = vrot.slane %v3563_v3, 5  ;;  %v3568_v57 = vrot.slane %v3566_v11, 4  ;;  %4678 = vmatprep.subr.bf16.mxu0 %v7683_v24  ;;  %5108 = vmatprep.subr.bf16.mxu1 %v7686_v25  ;;  %v7772_v11 = vld [vmem:[%s10490_s2 + $0x514] ss:$8 sps:$4 sm:$0xff]   ;;  %vm10533_vm13 = vmmov %vm10528_vm3 }
 0x207   : > { %v7994_v17 = vpop.eup %7993  ;;  %vm10535_vm15 = vmmov %vm10528_vm3 }
 0x208   : > { %v3569_v12 = vor.u32 %v3568_v57, %v3565_v13  ;;  %v3581_v8 = vsel %vm3579_vm8, %v3565_v13, %v3580_v5  ;;  %v3354_v48 = vmul.f32 %v7994_v17, %v9501_v31  ;;  %v9708_v30 = vld [vmem:[#allocation3 + $0x10] sm:$0xff]  ;;  %v7724_v17 = vld [vmem:[%s10490_s2 + $0x394] ss:$8 sps:$4 sm:$0xff]   ;;  %vm10529_vm8 = vmmov %vm10528_vm3 }
 0x209   : > { %3582 = vst [vmem:[#allocation3 + $0x18] sm:$0x88] %v3581_v8  ;;  %4679 = vmatpush1.bf16.msra.mxu0 %v7681_v19  ;;  %5109 = vmatpush1.bf16.msra.mxu1 %v7684_v28  ;;  %v7996_v36 = vpop.eup %7995  ;;  %v7059_v16 = vcombine.high %v9749_v20, %v9708_v30  ;;  %v7713_v13 = vld [vmem:[%s10490_s2 + $0x280] ss:$8 sps:$4 sm:$0xff]   ;;  %v7718_v57 = vld [vmem:[%s10490_s2 + $0x384] ss:$8 sps:$4 sm:$0xff]   ;;  %vm10537_vm2 = vmmov %vm10528_vm3 }
 0x20a   : > { %v3570_v23 = vrot.slane %v3569_v12, 4  ;;  %4680 = vmatprep.subr.bf16.mxu0 %v7689_v52  ;;  %5110 = vmatprep.subr.bf16.mxu1 %v7692_v26  ;;  %v3355_v42 = vmul.f32 %v7996_v36, %v9514_v40  ;;  %v3370_v49 = vmul.f32 1.6778524, %v3354_v48  ;;  %v7703_v40 = vld [vmem:[%s10490_s2 + $0x264] ss:$8 sps:$4 sm:$0xff]   ;;  %vm10538_vm4 = vmmov %vm10537_vm2 }
 0x20b   : > { %v7998_v27 = vpop.eup %7997  ;;  %v4929_v28 = vrot.slane %v7059_v16, 1  ;;  %v7721_v52 = vld [vmem:[%s10490_s2 + $0x294] ss:$8 sps:$4 sm:$0xff]   ;;  %v7719_v48 = vld [vmem:[%s10490_s2 + $0x290] ss:$8 sps:$4 sm:$0xff]   ;;  %v7058_v16 = vcombine.low %v9749_v20, %v9708_v30  ;;  %vm10539_vm5 = vmmov %vm10537_vm2 }
 0x20c   : > { %v9694_v2 = vsel %vm3589_vm12, %v3570_v23, %v9546_v53  ;;  %v8000_v7 = vpop.eup %7999  ;;  %v3356_v31 = vmul.f32 %v7998_v27, %v9517_v10  ;;  %v3371_v47 = vmul.f32 1.6778524, %v3355_v42  ;;  %v7730_v27 = vld [vmem:[%s10490_s2 + $0x3a4] ss:$8 sps:$4 sm:$0xff]   ;;  %v7725_v42 = vld [vmem:[%s10490_s2 + $0x2a0] ss:$8 sps:$4 sm:$0xff]   ;;  %vm10532_vm12 = vmmov %vm10528_vm3 }
 0x20d   : > { %4681 = vmatpush1.bf16.msra.mxu0 %v7687_v34  ;;  %5111 = vmatpush1.bf16.msra.mxu1 %v7690_v41  ;;  %v3357_v14 = vmul.f32 %v8000_v7, %v9520_v37  ;;  %v9730_v58 = vcombine.high %v9694_v2, %v9694_v2  ;;  %v9789_v19 = vcombine.low %v9694_v2, %v9694_v2  ;;  %v3623_v34 = vld [vmem:[#allocation3 + $0x30] sm:$0x11] }
 0x20e   : > { %4682 = vmatprep.subr.bf16.mxu0 %v7697_v61  ;;  %5112 = vmatprep.subr.bf16.mxu1 %v7700_v33  ;;  %v3372_v10 = vmul.f32 1.6778524, %v3356_v31  ;;  %v3444_v39 = vcombine.low %v3370_v49, %v3371_v47  ;;  %v7722_v61 = vld [vmem:[%s10490_s2 + $0x390] ss:$8 sps:$4 sm:$0xff]   ;;  %v7728_v7 = vld [vmem:[%s10490_s2 + $0x3a0] ss:$8 sps:$4 sm:$0xff]  }
 0x20f   : > { %v3373_v63 = vmul.f32 1.6778524, %v3357_v14  ;;  %v7736_v31 = vld [vmem:[%s10490_s2 + $0x3b4] ss:$8 sps:$4 sm:$0xff]   ;;  %v7739_v14 = vld [vmem:[%s10490_s2 + $0x2c4] ss:$8 sps:$4 sm:$0xff]  }
 0x210   : > { %v9710_v4 = vld [vmem:[#allocation3 + $0x18] sm:$0xff]  ;;  %v3452_v55 = vrot.slane %v3444_v39, %v8337_v44  ;;  %v7742_v49 = vld [vmem:[%s10490_s2 + $0x3c4] ss:$8 sps:$4 sm:$0xff]   ;;  %v7737_v47 = vld [vmem:[%s10490_s2 + $0x2c0] ss:$8 sps:$4 sm:$0xff]  }
 0x211   : > { %v9714_v45 = vcombine.high %v9708_v30, %v9710_v4  ;;  %v9718_v37 = vcombine.low %v9708_v30, %v9710_v4  ;;  %4683 = vmatpush1.bf16.msra.mxu0 %v7695_v0  ;;  %v3445_v50 = vcombine.low %v3372_v10, %v3373_v63  ;;  %5113 = vmatpush1.bf16.msra.mxu1 %v7698_v60  ;;  %v7731_v0 = vld [vmem:[%s10490_s2 + $0x2b0] ss:$8 sps:$4 sm:$0xff]   ;;  %v7745_v10 = vld [vmem:[%s10490_s2 + $0x2d4] ss:$8 sps:$4 sm:$0xff]   ;;  %v4926_v30 = vrot.slane %v7058_v16, 1 }
 0x212   : > { %4684 = vmatprep.subr.bf16.mxu0 %v7703_v40  ;;  %v7061_v1 = vcombine.high %v9710_v4, %v9694_v2  ;;  %5114 = vmatprep.subr.bf16.mxu1 %v7706_v54  ;;  %v7734_v60 = vld [vmem:[%s10490_s2 + $0x3b0] ss:$8 sps:$4 sm:$0xff]   ;;  %v7740_v40 = vld [vmem:[%s10490_s2 + $0x3c0] ss:$8 sps:$4 sm:$0xff]   ;;  %v7748_v63 = vld [vmem:[%s10490_s2 + $0x3d4] ss:$8 sps:$4 sm:$0xff]  }
 0x213   : > { %3892 = vmatprep.mubr.bf16.mxu0 %v9714_v45  ;;  %4276 = vmatprep.mubr.bf16.mxu1 %v9714_v45  ;;  %v3459_v35 = vrot.slane %v3445_v50, %v8337_v44  ;;  %v7743_v39 = vld [vmem:[%s10490_s2 + $0x2d0] ss:$8 sps:$4 sm:$0xff]   ;;  %v7754_v54 = vld [vmem:[%s10490_s2 + $0x3e4] ss:$8 sps:$4 sm:$0xff]   ;;  %v7761_v20 = vld [vmem:[%s10490_s2 + $0x400] ss:$8 sps:$4 sm:$0xff]  }
 0x214   : > { %3893 = vmatmul.mubr.bf16.gmra.mrb[40].mxu0 %v9718_v37  ;;  %4277 = vmatmul.mubr.bf16.gmra.mrb[40].mxu1 %v9718_v37  ;;  %v9774_v3 = vrot.slane %v7061_v1, 1  ;;  %v7746_v50 = vld [vmem:[%s10490_s2 + $0x3d0] ss:$8 sps:$4 sm:$0xff]   ;;  %v7760_v1 = vld [vmem:[%s10490_s2 + $0x3f4] ss:$8 sps:$4 sm:$0xff]  }
 0x215   : > { %3902 = vmatprep.mubr.bf16.mxu0 %v9730_v58  ;;  %4286 = vmatprep.mubr.bf16.mxu1 %v9730_v58  ;;  %v3460_v15 = vcombine.low %v3452_v55, %v3459_v35  ;;  %v3461_v46 = vcombine.high %v3452_v55, %v3459_v35  ;;  %v7757_v55 = vld [vmem:[%s10490_s2 + $0x2f4] ss:$8 sps:$4 sm:$0xff]  }
 0x216   : > { %4685 = vmatpush1.bf16.msra.mxu0 %v7701_v43  ;;  %5115 = vmatpush1.bf16.msra.mxu1 %v7704_v56  ;;  %v9811_v8 = vsel %vm10528_vm3, %v4929_v28, %v9774_v3  ;;  %v7751_v43 = vld [vmem:[%s10490_s2 + $0x2e4] ss:$8 sps:$4 sm:$0xff]   ;;  %v7749_v56 = vld [vmem:[%s10490_s2 + $0x2e0] ss:$8 sps:$4 sm:$0xff]   ;;  %v7770_v28 = vld [vmem:[%s10490_s2 + $0x510] ss:$8 sps:$4 sm:$0xff]  }
 0x217   : > { %4686 = vmatprep.subr.bf16.mxu0 %v7709_v9  ;;  %v7265_v24 = vpack.c.bf16 %v3461_v46, %v3460_v15  ;;  %5116 = vmatprep.subr.bf16.mxu1 %v7712_v29  ;;  %v7752_v9 = vld [vmem:[%s10490_s2 + $0x3e0] ss:$8 sps:$4 sm:$0xff]   ;;  %v7060_v29 = vcombine.low %v9710_v4, %v9694_v2  ;;  %v7755_v15 = vld [vmem:[%s10490_s2 + $0x2f0] ss:$8 sps:$4 sm:$0xff]   ;;  %v7763_v2 = vld [vmem:[%s10490_s2 + $0x404] ss:$8 sps:$4 sm:$0xff]  }
 0x218   : > { %v7766_v4 = vld [vmem:[%s10490_s2 + $0x504] ss:$8 sps:$4 sm:$0xff]   ;;  %v7841_v16 = vld [vmem:[%s10490_s2 + $0x4d4] ss:$8 sps:$4 sm:$0xff]  }
 0x219   : > { %v3599_v5 = vshrl.u32 %v7265_v24, 16  ;;  %v3602_v12 = vshll.u32 %v7265_v24, 16  ;;  %v4927_v6 = vrot.slane %v7060_v29, 1  ;;  %v7769_v24 = vld [vmem:[%s10490_s2 + $0x414] ss:$8 sps:$4 sm:$0xff]  }
 0x21a   : > { %4687 = vmatpush1.bf16.msra.mxu0 %v7707_v18  ;;  %5117 = vmatpush1.bf16.msra.mxu1 %v7710_v62  ;;  %v7758_v18 = vld [vmem:[%s10490_s2 + $0x3f0] ss:$8 sps:$4 sm:$0xff]   ;;  %v7838_v29 = vld [vmem:[%s10490_s2 + $0x5c4] ss:$8 sps:$4 sm:$0xff]  }
 0x21b   : > { %4688 = vmatprep.subr.bf16.mxu0 %v7715_v38  ;;  %v3601_v26 = vrot.slane %v3599_v5, 7  ;;  %5118 = vmatprep.subr.bf16.mxu1 %v7718_v57  ;;  %v7764_v38 = vld [vmem:[%s10490_s2 + $0x500] ss:$8 sps:$4 sm:$0xff]   ;;  %v9932_v25 = vsel %vm10529_vm8, %v4926_v30, %v4927_v6  ;;  %v7850_v30 = vld [vmem:[%s10490_s2 + $0x5e4] ss:$8 sps:$4 sm:$0xff]  }
 0x21c   : > { %3903 = vmatmul.mubr.bf16.gmra.mrb[44].mxu0 %v9789_v19  ;;  %4287 = vmatmul.mubr.bf16.gmra.mrb[44].mxu1 %v9789_v19  ;;  %v7773_v57 = vld [vmem:[%s10490_s2 + $0x420] ss:$8 sps:$4 sm:$0xff]  }
 0x21d   : > { %4704 = vmatprep.mubr.bf16.mxu0 %v9561_v22  ;;  %5134 = vmatprep.mubr.bf16.mxu1 %v9811_v8  ;;  %v3604_v41 = vor.u32 %v3602_v12, %v3601_v26  ;;  %v3605_v23 = vrot.slane %v3601_v26, 4  ;;  %v7727_v22 = vld [vmem:[%s10490_s2 + $0x2a4] ss:$8 sps:$4 sm:$0xff]   ;;  %v7784_v12 = vld [vmem:[%s10490_s2 + $0x534] ss:$8 sps:$4 sm:$0xff]  }
 0x21e   : > { %4689 = vmatpush1.bf16.msra.mxu0 %v7713_v13  ;;  %5119 = vmatpush1.bf16.msra.mxu1 %v7716_v51  ;;  %v7778_v13 = vld [vmem:[%s10490_s2 + $0x524] ss:$8 sps:$4 sm:$0xff]   ;;  %v7776_v51 = vld [vmem:[%s10490_s2 + $0x520] ss:$8 sps:$4 sm:$0xff]  }
 0x21f   : > { %4690 = vmatprep.subr.bf16.mxu0 %v7721_v52  ;;  %v9837_v33 = vsel %vm3612_vm1, %v3604_v41, %v9546_v53  ;;  %v3624_v36 = vsel %vm3622_vm6, %v3605_v23, %v3623_v34  ;;  %5120 = vmatprep.subr.bf16.mxu1 %v7724_v17  ;;  %v7733_v53 = vld [vmem:[%s10490_s2 + $0x2b4] ss:$8 sps:$4 sm:$0xff]   ;;  %v7782_v17 = vld [vmem:[%s10490_s2 + $0x530] ss:$8 sps:$4 sm:$0xff]   ;;  %v7787_v34 = vld [vmem:[%s10490_s2 + $0x444] ss:$8 sps:$4 sm:$0xff]  }
 0x220   : > { %3625 = vst [vmem:[#allocation3 + $0x30] sm:$0x11] %v3624_v36  ;;  %v7781_v52 = vld [vmem:[%s10490_s2 + $0x434] ss:$8 sps:$4 sm:$0xff]   ;;  %v7785_v41 = vld [vmem:[%s10490_s2 + $0x440] ss:$8 sps:$4 sm:$0xff]  }
 0x221   : > { %v7788_v23 = vld [vmem:[%s10490_s2 + $0x540] ss:$8 sps:$4 sm:$0xff]   ;;  %v7802_v36 = vld [vmem:[%s10490_s2 + $0x564] ss:$8 sps:$4 sm:$0xff]  }
 0x222   : > { %4691 = vmatpush1.bf16.msra.mxu0 %v7719_v48  ;;  %5121 = vmatpush1.bf16.msra.mxu1 %v7722_v61  ;;  %v7793_v48 = vld [vmem:[%s10490_s2 + $0x454] ss:$8 sps:$4 sm:$0xff]  }
 0x223   : > { %4692 = vmatprep.subr.bf16.mxu0 %v7727_v22  ;;  %5122 = vmatprep.subr.bf16.mxu1 %v7730_v27  ;;  %v7796_v61 = vld [vmem:[%s10490_s2 + $0x554] ss:$8 sps:$4 sm:$0xff]   ;;  %v7791_v22 = vld [vmem:[%s10490_s2 + $0x450] ss:$8 sps:$4 sm:$0xff]   ;;  %v7800_v27 = vld [vmem:[%s10490_s2 + $0x560] ss:$8 sps:$4 sm:$0xff]  }
 0x226   : > { %4693 = vmatpush1.bf16.msra.mxu0 %v7725_v42  ;;  %5123 = vmatpush1.bf16.msra.mxu1 %v7728_v7  ;;  %v7805_v42 = vld [vmem:[%s10490_s2 + $0x474] ss:$8 sps:$4 sm:$0xff]  }
 0x227   : > { %4694 = vmatprep.subr.bf16.mxu0 %v7733_v53  ;;  %5124 = vmatprep.subr.bf16.mxu1 %v7736_v31  ;;  %v4868_v35 = vld [vmem:[#allocation3 + $0x30] sm:$0x11]  ;;  %v7808_v7 = vld [vmem:[%s10490_s2 + $0x574] ss:$8 sps:$4 sm:$0xff]   ;;  %v7803_v53 = vld [vmem:[%s10490_s2 + $0x470] ss:$8 sps:$4 sm:$0xff]  }
 0x228   : > { %v7063_v46 = vcombine.high %v9837_v33, %v4868_v35  ;;  %v7062_v5 = vcombine.low %v9837_v33, %v4868_v35  ;;  %v7799_v33 = vld [vmem:[%s10490_s2 + $0x464] ss:$8 sps:$4 sm:$0xff]   ;;  %v7806_v31 = vld [vmem:[%s10490_s2 + $0x570] ss:$8 sps:$4 sm:$0xff]  }
 0x229   : > { %v7830_v35 = vld [vmem:[%s10490_s2 + $0x5b0] ss:$8 sps:$4 sm:$0xff]  }
 0x22a   : > { %4695 = vmatpush1.bf16.msra.mxu0 %v7731_v0  ;;  %5125 = vmatpush1.bf16.msra.mxu1 %v7734_v60  ;;  %v9919_v62 = vrot.slane %v7063_v46, 1  ;;  %v7811_v0 = vld [vmem:[%s10490_s2 + $0x484] ss:$8 sps:$4 sm:$0xff]   ;;  %v7836_v46 = vld [vmem:[%s10490_s2 + $0x5c0] ss:$8 sps:$4 sm:$0xff]  }
 0x22b   : > { %4696 = vmatprep.subr.bf16.mxu0 %v7739_v14  ;;  %5126 = vmatprep.subr.bf16.mxu1 %v7742_v49  ;;  %v7814_v60 = vld [vmem:[%s10490_s2 + $0x584] ss:$8 sps:$4 sm:$0xff]   ;;  %v7809_v14 = vld [vmem:[%s10490_s2 + $0x480] ss:$8 sps:$4 sm:$0xff]  }
 0x22c   : > { %v9943_v32 = vsel %vm10530_vm10, %v9774_v3, %v9919_v62  ;;  %v9955_v3 = vrot.slane %v7062_v5, 1  ;;  %v7812_v49 = vld [vmem:[%s10490_s2 + $0x580] ss:$8 sps:$4 sm:$0xff]   ;;  %v7851_v5 = vld [vmem:[%s10490_s2 + $0x4f0] ss:$8 sps:$4 sm:$0xff]  }
 0x22e   : > { %4697 = vmatpush1.bf16.msra.mxu0 %v7737_v47  ;;  %5127 = vmatpush1.bf16.msra.mxu1 %v7740_v40  ;;  %v9972_v26 = vsel %vm10531_vm11, %v4927_v6, %v9955_v3  ;;  %v7817_v47 = vld [vmem:[%s10490_s2 + $0x494] ss:$8 sps:$4 sm:$0xff]   ;;  %v7847_v6 = vld [vmem:[%s10490_s2 + $0x4e4] ss:$8 sps:$4 sm:$0xff]  }
 0x22f   : > { %4698 = vmatprep.subr.bf16.mxu0 %v7745_v10  ;;  %5128 = vmatprep.subr.bf16.mxu1 %v7748_v63  ;;  %v7820_v40 = vld [vmem:[%s10490_s2 + $0x594] ss:$8 sps:$4 sm:$0xff]   ;;  %v7815_v10 = vld [vmem:[%s10490_s2 + $0x490] ss:$8 sps:$4 sm:$0xff]  }
 0x230   : > { %v7818_v63 = vld [vmem:[%s10490_s2 + $0x590] ss:$8 sps:$4 sm:$0xff]  }
 0x232   : > { %4699 = vmatpush1.bf16.msra.mxu0 %v7743_v39  ;;  %5129 = vmatpush1.bf16.msra.mxu1 %v7746_v50  ;;  %v7823_v39 = vld [vmem:[%s10490_s2 + $0x4a4] ss:$8 sps:$4 sm:$0xff]  }
 0x233   : > { %4700 = vmatprep.subr.bf16.mxu0 %v7751_v43  ;;  %5130 = vmatprep.subr.bf16.mxu1 %v7754_v54  ;;  %v7826_v50 = vld [vmem:[%s10490_s2 + $0x5a4] ss:$8 sps:$4 sm:$0xff]   ;;  %v7821_v43 = vld [vmem:[%s10490_s2 + $0x4a0] ss:$8 sps:$4 sm:$0xff]  }
 0x234   : > { %v7824_v54 = vld [vmem:[%s10490_s2 + $0x5a0] ss:$8 sps:$4 sm:$0xff]  }
 0x236   : > { %4701 = vmatpush1.bf16.msra.mxu0 %v7749_v56  ;;  %5131 = vmatpush1.bf16.msra.mxu1 %v7752_v9  ;;  %v7829_v56 = vld [vmem:[%s10490_s2 + $0x4b4] ss:$8 sps:$4 sm:$0xff]  }
 0x237   : > { %4702 = vmatprep.subr.bf16.mxu0 %v7757_v55  ;;  %5132 = vmatprep.subr.bf16.mxu1 %v7760_v1  ;;  %v7832_v9 = vld [vmem:[%s10490_s2 + $0x5b4] ss:$8 sps:$4 sm:$0xff]   ;;  %v7827_v55 = vld [vmem:[%s10490_s2 + $0x4b0] ss:$8 sps:$4 sm:$0xff]   ;;  %v7835_v1 = vld [vmem:[%s10490_s2 + $0x4c4] ss:$8 sps:$4 sm:$0xff]  }
 0x23a   : > { %4703 = vmatpush1.bf16.msra.mxu0 %v7755_v15  ;;  %5133 = vmatpush1.bf16.msra.mxu1 %v7758_v18  ;;  %v7833_v15 = vld [vmem:[%s10490_s2 + $0x4c0] ss:$8 sps:$4 sm:$0xff]   ;;  %v7844_v18 = vld [vmem:[%s10490_s2 + $0x5d4] ss:$8 sps:$4 sm:$0xff]  }
 0x23b   : > { %5486 = vmatprep.subr.bf16.mxu0 %v7763_v2  ;;  %5924 = vmatprep.subr.bf16.mxu1 %v7766_v4  ;;  %v7839_v2 = vld [vmem:[%s10490_s2 + $0x4d0] ss:$8 sps:$4 sm:$0xff]  }
 0x23c   : > { %v7842_v4 = vld [vmem:[%s10490_s2 + $0x5d0] ss:$8 sps:$4 sm:$0xff]  }
 0x23d   : > { %4705 = vmatmul.mubr.bf16.vlgmr.msra.gmra.mrb[48].mxu0 %v9549_v59  ;;  %5135 = vmatmul.mubr.bf16.vlgmr.msra.gmra.mrb[48].mxu1 %v9932_v25  ;;  %v7767_v59 = vld [vmem:[%s10490_s2 + $0x410] ss:$8 sps:$4 sm:$0xff]  }
 0x23e   : > { %4714 = vmatprep.mubr.bf16.mxu0 %v9714_v45  ;;  %5144 = vmatprep.mubr.bf16.mxu1 %v9943_v32  ;;  %v7775_v45 = vld [vmem:[%s10490_s2 + $0x424] ss:$8 sps:$4 sm:$0xff]  }
 0x23f   : > { %5487 = vmatpush1.bf16.msra.mxu0 %v7761_v20  ;;  %5925 = vmatpush1.bf16.msra.mxu1 %v7764_v38  ;;  %v7845_v20 = vld [vmem:[%s10490_s2 + $0x4e0] ss:$8 sps:$4 sm:$0xff]  }
 0x240   : > { %5488 = vmatprep.subr.bf16.mxu0 %v7769_v24  ;;  %5926 = vmatprep.subr.bf16.mxu1 %v7772_v11  ;;  %v7848_v38 = vld [vmem:[%s10490_s2 + $0x5e0] ss:$8 sps:$4 sm:$0xff]   ;;  %v7853_v24 = vld [vmem:[%s10490_s2 + $0x4f4] ss:$8 sps:$4 sm:$0xff]  }
 0x241   : > { %v7856_v11 = vld [vmem:[%s10490_s2 + $0x5f4] ss:$8 sps:$4 sm:$0xff]  }
 0x243   : > { %5489 = vmatpush1.bf16.msra.mxu0 %v7767_v59  ;;  %5927 = vmatpush1.bf16.msra.mxu1 %v7770_v28  ;;  %v7854_v59 = vld [vmem:[%s10490_s2 + $0x5f0] ss:$8 sps:$4 sm:$0xff]  }
 0x244   : > { %5490 = vmatprep.subr.bf16.mxu0 %v7775_v45  ;;  %5928 = vmatprep.subr.bf16.mxu1 %v7778_v13 }
 0x245   : > { %4715 = vmatmul.mubr.bf16.gmra.mrb[52].mxu0 %v9718_v37  ;;  %5145 = vmatmul.mubr.bf16.gmra.mrb[52].mxu1 %v9972_v26  ;;  %v7779_v37 = vld [vmem:[%s10490_s2 + $0x430] ss:$8 sps:$4 sm:$0xff]  }
 0x246   : > { %4724 = vmatprep.mubr.bf16.mxu0 %v9730_v58  ;;  %5154 = vmatprep.mubr.bf16.mxu1 %v9919_v62  ;;  %v7790_v58 = vld [vmem:[%s10490_s2 + $0x544] ss:$8 sps:$4 sm:$0xff]  }
 0x247   : > { %5491 = vmatpush1.bf16.msra.mxu0 %v7773_v57  ;;  %5929 = vmatpush1.bf16.msra.mxu1 %v7776_v51 }
 0x248   : > { %5492 = vmatprep.subr.bf16.mxu0 %v7781_v52  ;;  %5930 = vmatprep.subr.bf16.mxu1 %v7784_v12 }
 0x24b   : > { %5493 = vmatpush1.bf16.msra.mxu0 %v7779_v37  ;;  %5931 = vmatpush1.bf16.msra.mxu1 %v7782_v17 }
 0x24c   : > { %5494 = vmatprep.subr.bf16.mxu0 %v7787_v34  ;;  %5932 = vmatprep.subr.bf16.mxu1 %v7790_v58 }
 0x24d   : > { %4725 = vmatmul.mubr.bf16.gmra.mrb[56].mxu0 %v9789_v19  ;;  %5155 = vmatmul.mubr.bf16.gmra.mrb[56].mxu1 %v9955_v3  ;;  %v7794_v19 = vld [vmem:[%s10490_s2 + $0x550] ss:$8 sps:$4 sm:$0xff]  }
 0x24e   : > { %5518 = vmatprep.mubr.bf16.mxu0 %v9811_v8  ;;  %5956 = vmatprep.mubr.bf16.mxu1 %v9811_v8  ;;  %v7797_v8 = vld [vmem:[%s10490_s2 + $0x460] ss:$8 sps:$4 sm:$0xff]  }
 0x24f   : > { %5495 = vmatpush1.bf16.msra.mxu0 %v7785_v41  ;;  %5933 = vmatpush1.bf16.msra.mxu1 %v7788_v23 }
 0x250   : > { %5496 = vmatprep.subr.bf16.mxu0 %v7793_v48  ;;  %5934 = vmatprep.subr.bf16.mxu1 %v7796_v61 }
 0x253   : > { %5497 = vmatpush1.bf16.msra.mxu0 %v7791_v22  ;;  %5935 = vmatpush1.bf16.msra.mxu1 %v7794_v19 }
 0x254   : > { %5498 = vmatprep.subr.bf16.mxu0 %v7799_v33  ;;  %5936 = vmatprep.subr.bf16.mxu1 %v7802_v36 }
 0x257   : > { %5499 = vmatpush1.bf16.msra.mxu0 %v7797_v8  ;;  %5937 = vmatpush1.bf16.msra.mxu1 %v7800_v27 }
 0x258   : > { %5500 = vmatprep.subr.bf16.mxu0 %v7805_v42  ;;  %5938 = vmatprep.subr.bf16.mxu1 %v7808_v7 }
 0x25b   : > { %5501 = vmatpush1.bf16.msra.mxu0 %v7803_v53  ;;  %5939 = vmatpush1.bf16.msra.mxu1 %v7806_v31 }
 0x25c   : > { %5502 = vmatprep.subr.bf16.mxu0 %v7811_v0  ;;  %5940 = vmatprep.subr.bf16.mxu1 %v7814_v60 }
 0x25f   : > { %5503 = vmatpush1.bf16.msra.mxu0 %v7809_v14  ;;  %5941 = vmatpush1.bf16.msra.mxu1 %v7812_v49 }
 0x260   : > { %5504 = vmatprep.subr.bf16.mxu0 %v7817_v47  ;;  %5942 = vmatprep.subr.bf16.mxu1 %v7820_v40 }
 0x263   : > { %5505 = vmatpush1.bf16.msra.mxu0 %v7815_v10  ;;  %5943 = vmatpush1.bf16.msra.mxu1 %v7818_v63 }
 0x264   : > { %5506 = vmatprep.subr.bf16.mxu0 %v7823_v39  ;;  %5944 = vmatprep.subr.bf16.mxu1 %v7826_v50 }
 0x267   : > { %5507 = vmatpush1.bf16.msra.mxu0 %v7821_v43  ;;  %5945 = vmatpush1.bf16.msra.mxu1 %v7824_v54 }
 0x268   : > { %5508 = vmatprep.subr.bf16.mxu0 %v7829_v56  ;;  %5946 = vmatprep.subr.bf16.mxu1 %v7832_v9 }
 0x26b   : > { %5509 = vmatpush1.bf16.msra.mxu0 %v7827_v55  ;;  %5947 = vmatpush1.bf16.msra.mxu1 %v7830_v35 }
 0x26c   : > { %5510 = vmatprep.subr.bf16.mxu0 %v7835_v1  ;;  %5948 = vmatprep.subr.bf16.mxu1 %v7838_v29 }
 0x26f   : > { %5511 = vmatpush1.bf16.msra.mxu0 %v7833_v15  ;;  %5949 = vmatpush1.bf16.msra.mxu1 %v7836_v46 }
 0x270   : > { %5512 = vmatprep.subr.bf16.mxu0 %v7841_v16  ;;  %5950 = vmatprep.subr.bf16.mxu1 %v7844_v18 }
 0x273   : > { %5513 = vmatpush1.bf16.msra.mxu0 %v7839_v2  ;;  %5951 = vmatpush1.bf16.msra.mxu1 %v7842_v4 }
 0x274   : > { %5514 = vmatprep.subr.bf16.mxu0 %v7847_v6  ;;  %5952 = vmatprep.subr.bf16.mxu1 %v7850_v30 }
 0x277   : > { %5515 = vmatpush1.bf16.msra.mxu0 %v7845_v20  ;;  %5953 = vmatpush1.bf16.msra.mxu1 %v7848_v38 }
 0x278   : > { %5516 = vmatprep.subr.bf16.mxu0 %v7853_v24  ;;  %5954 = vmatprep.subr.bf16.mxu1 %v7856_v11 }
 0x27b   : > { %5517 = vmatpush1.bf16.msra.mxu0 %v7851_v5  ;;  %5955 = vmatpush1.bf16.msra.mxu1 %v7854_v59 }
 0x27e   : > { %5519 = vmatmul.mubr.bf16.vlgmr.msra.gmra.mrb[60].mxu0 %v9932_v25  ;;  %5957 = vmatmul.mubr.bf16.vlgmr.msra.gmra.mrb[60].mxu1 %v9932_v25 }
 0x27f   : > { %5528 = vmatprep.mubr.bf16.mxu0 %v9943_v32  ;;  %5966 = vmatprep.mubr.bf16.mxu1 %v9943_v32 }
 0x286   : > { %5529 = vmatmul.mubr.bf16.gmra.mrb[64].mxu0 %v9972_v26  ;;  %5967 = vmatmul.mubr.bf16.gmra.mrb[64].mxu1 %v9972_v26 }
 0x287   : > { %5538 = vmatprep.mubr.bf16.mxu0 %v9919_v62  ;;  %5976 = vmatprep.mubr.bf16.mxu1 %v9919_v62 }
 0x28e   : > { %5539 = vmatmul.mubr.bf16.gmra.mrb[68].mxu0 %v9955_v3  ;;  %5977 = vmatmul.mubr.bf16.gmra.mrb[68].mxu1 %v9955_v3 }
 0x2cf   : > { %v3884_v28 = vpop.f32.mrb[36].mxu0  ;;  %v4268_v45 = vpop.f32.mrb[36].mxu1 }
 0x2d0   : > { %v3886_v13 = vpop.f32.mrb[37].mxu0  ;;  %v4270_v25 = vpop.f32.mrb[37].mxu1 }
 0x2d1   : > { %v3921_v57 = vcombine.low %v3884_v28, %v3886_v13  ;;  %v3922_v51 = vcombine.high %v3884_v28, %v3886_v13  ;;  %v4305_v52 = vcombine.low %v4268_v45, %v4270_v25  ;;  %v4306_v32 = vcombine.high %v4268_v45, %v4270_v25  ;;  %v3888_v12 = vpop.f32.mrb[38].mxu0  ;;  %v4272_v37 = vpop.f32.mrb[38].mxu1 }
 0x2d2   : > { %v3890_v17 = vpop.f32.mrb[39].mxu0  ;;  %v4274_v26 = vpop.f32.mrb[39].mxu1 }
 0x2d3   : > { %v3929_v34 = vrot.slane %v3921_v57, %v8337_v44  ;;  %v3936_v62 = vrot.slane %v3922_v51, %v8337_v44  ;;  %v4313_v58 = vrot.slane %v4305_v52, %v8337_v44  ;;  %v4320_v3 = vrot.slane %v4306_v32, %v8337_v44 }
 0x2d4   : > { %v3939_v41 = vcombine.low %v3888_v12, %v3890_v17  ;;  %v3940_v23 = vcombine.high %v3888_v12, %v3890_v17  ;;  %v4323_v48 = vcombine.low %v4272_v37, %v4274_v26  ;;  %v4324_v61 = vcombine.high %v4272_v37, %v4274_v26 }
 0x2d5   : > { %v4321_v22 = vcombine.high %v4313_v58, %v4313_v58  ;;  %v4322_v19 = vcombine.high %v4320_v3, %v4320_v3  ;;  %v3937_v33 = vcombine.high %v3929_v34, %v3929_v34  ;;  %v4400_v36 = vrot.slane %v4320_v3, 7 }
 0x2d6   : > { %v3947_v8 = vrot.slane %v3939_v41, %v8337_v44  ;;  %v4331_v7 = vrot.slane %v4323_v48, %v8337_v44  ;;  %v4338_v53 = vrot.slane %v4324_v61, %v8337_v44  ;;  %v3938_v31 = vcombine.high %v3936_v62, %v3936_v62 }
 0x2d7   : > { %v4397_v27 = vrot.slane %v4321_v22, 7  ;;  %v4403_v42 = vrot.slane %v4322_v19, 7  ;;  %v6958_v0 = vrot.slane %v4313_v58, 9  ;;  %v4402_v60 = vrot.slane %v4400_v36, 2 }
 0x2d8   : > { %v3955_v14 = vcombine.high %v3947_v8, %v3947_v8  ;;  %v4339_v40 = vcombine.high %v4331_v7, %v4331_v7  ;;  %v4340_v10 = vcombine.high %v4338_v53, %v4338_v53  ;;  %v4406_v63 = vrot.slane %v4331_v7, 7 }
 0x2d9   : > { %v4399_v49 = vrot.slane %v4397_v27, 2  ;;  %v4405_v47 = vrot.slane %v4403_v42, 2  ;;  %v4410_v39 = vrot.slane %v4338_v53, 7  ;;  %v4398_v50 = vsel %vm8918_vm7, %v6958_v0, %v4397_v27 }
 0x2da   : > { %v4404_v43 = vsel %vm8918_vm7, %v4402_v60, %v4403_v42  ;;  %v6959_v54 = vrot.slane %v4339_v40, 9  ;;  %v10155_v56 = vrot.slane %v4340_v10, 7  ;;  %v10159_v55 = vadd.f32 %v4398_v50, %v3929_v34 }
 0x2db   : > { %v4401_v9 = vsel %vm8918_vm7, %v4399_v49, %v4400_v36  ;;  %v4412_v35 = vrot.slane %v4410_v39, 2  ;;  %v10163_v29 = vadd.f32 %v4404_v43, %v3936_v62  ;;  %v4407_v15 = vsel %vm8918_vm7, %v4405_v47, %v4406_v63 }
 0x2dc   : > { %v10161_v1 = vadd.f32 %v4401_v9, %v3937_v33  ;;  %v10168_v46 = vrot.slane %v3940_v23, %v8337_v44  ;;  %v4411_v16 = vsel %vm8918_vm7, %v6959_v54, %v4410_v39  ;;  %v10172_v18 = vadd.f32 %v4407_v15, %v3938_v31 }
 0x2dd   : > { %v10174_v2 = vadd.f32 %v4411_v16, %v3955_v14  ;;  %v4414_v4 = vsel %vm8918_vm7, %v4412_v35, %v10155_v56  ;;  %v4415_v52 = vrot.slane %v10155_v56, 2 }
 0x2de   : > { %v10180_v6 = vadd.f32 %v4414_v4, %v10168_v46  ;;  %v3956_v25 = vcombine.high %v10168_v46, %v10168_v46 }
 0x2e7   : > { %v3894_v30 = vpop.f32.mrb[40].mxu0  ;;  %v4278_v20 = vpop.f32.mrb[40].mxu1 }
 0x2e8   : > { %v3896_v38 = vpop.f32.mrb[41].mxu0  ;;  %v4280_v24 = vpop.f32.mrb[41].mxu1 }
 0x2e9   : > { %v3957_v11 = vcombine.low %v3894_v30, %v3896_v38  ;;  %v3958_v5 = vcombine.high %v3894_v30, %v3896_v38  ;;  %v4341_v59 = vcombine.low %v4278_v20, %v4280_v24  ;;  %v4342_v28 = vcombine.high %v4278_v20, %v4280_v24  ;;  %v3898_v45 = vpop.f32.mrb[42].mxu0  ;;  %v4282_v13 = vpop.f32.mrb[42].mxu1 }
 0x2ea   : > { %v3900_v57 = vpop.f32.mrb[43].mxu0  ;;  %v4284_v51 = vpop.f32.mrb[43].mxu1 }
 0x2eb   : > { %v3972_v32 = vrot.slane %v3958_v5, %v8337_v44  ;;  %v4349_v12 = vrot.slane %v4341_v59, %v8337_v44  ;;  %v4356_v37 = vrot.slane %v4342_v28, %v8337_v44  ;;  %v3974_v17 = vcombine.low %v3898_v45, %v3900_v57 }
 0x2ec   : > { %v3975_v26 = vcombine.high %v3898_v45, %v3900_v57  ;;  %v4359_v34 = vcombine.low %v4282_v13, %v4284_v51  ;;  %v4360_v62 = vcombine.high %v4282_v13, %v4284_v51  ;;  %v3965_v58 = vrot.slane %v3957_v11, %v8337_v44 }
 0x2ed   : > { %v4357_v3 = vcombine.high %v4349_v12, %v4349_v12  ;;  %v4358_v41 = vcombine.high %v4356_v37, %v4356_v37  ;;  %v4416_v23 = vrot.slane %v4349_v12, 7  ;;  %v3973_v48 = vcombine.high %v3972_v32, %v3972_v32 }
 0x2ee   : > { %v3982_v61 = vrot.slane %v3974_v17, %v8337_v44  ;;  %v3989_v22 = vrot.slane %v3975_v26, %v8337_v44  ;;  %v4367_v19 = vrot.slane %v4359_v34, %v8337_v44  ;;  %v6960_v36 = vrot.slane %v4356_v37, 9 }
 0x2ef   : > { %v4418_v33 = vrot.slane %v4416_v23, 2  ;;  %v4423_v8 = vrot.slane %v4358_v41, 7  ;;  %v4374_v27 = vrot.slane %v4360_v62, %v8337_v44  ;;  %v3904_v42 = vpop.f32.mrb[44].mxu0  ;;  %v4288_v7 = vpop.f32.mrb[44].mxu1  ;;  %v4419_v53 = vrot.slane %v4357_v3, 7 }
 0x2f0   : > { %v3990_v31 = vcombine.high %v3982_v61, %v3982_v61  ;;  %v4375_v0 = vcombine.high %v4367_v19, %v4367_v19  ;;  %v4426_v60 = vrot.slane %v4367_v19, 7  ;;  %v3906_v14 = vpop.f32.mrb[45].mxu0  ;;  %v4290_v49 = vpop.f32.mrb[45].mxu1  ;;  %v3991_v40 = vcombine.high %v3989_v22, %v3989_v22 }
 0x2f1   : > { %v4425_v47 = vrot.slane %v4423_v8, 2  ;;  %v4376_v10 = vcombine.high %v4374_v27, %v4374_v27  ;;  %v3992_v63 = vcombine.low %v3904_v42, %v3906_v14  ;;  %v3908_v39 = vpop.f32.mrb[46].mxu0  ;;  %v4292_v50 = vpop.f32.mrb[46].mxu1  ;;  %v4432_v54 = vrot.slane %v4374_v27, 7 }
 0x2f2   : > { %v4429_v43 = vrot.slane %v4375_v0, 7  ;;  %v3993_v56 = vcombine.high %v3904_v42, %v3906_v14  ;;  %v4377_v9 = vcombine.low %v4288_v7, %v4290_v49  ;;  %v3909_v35 = vpop.f32.mrb[47].mxu0  ;;  %v4293_v15 = vpop.f32.mrb[47].mxu1  ;;  %v4428_v46 = vrot.slane %v4426_v60, 2 }
 0x2f3   : > { %v6961_v16 = vrot.slane %v4376_v10, 9  ;;  %v4378_v4 = vcombine.high %v4288_v7, %v4290_v49  ;;  %v4417_v30 = vsel %vm8918_vm7, %v4415_v52, %v4416_v23  ;;  %v4000_v38 = vrot.slane %v3992_v63, %v8337_v44 }
 0x2f4   : > { %v4431_v20 = vrot.slane %v4429_v43, 2  ;;  %v4385_v24 = vrot.slane %v4377_v9, %v8337_v44  ;;  %v4424_v11 = vsel %vm8918_vm7, %v6960_v36, %v4423_v8  ;;  %v4007_v5 = vrot.slane %v3993_v56, %v8337_v44 }
 0x2f5   : > { %v4392_v59 = vrot.slane %v4378_v4, %v8337_v44  ;;  %v10201_v28 = vadd.f32 %v4417_v30, %v3956_v25  ;;  %v10203_v45 = vadd.f32 %v4424_v11, %v3972_v32  ;;  %v4420_v51 = vsel %vm8918_vm7, %v4418_v33, %v4419_v53 }
 0x2f6   : > { %v4393_v13 = vcombine.high %v4385_v24, %v4385_v24  ;;  %v4436_v57 = vrot.slane %v4385_v24, 7  ;;  %v4427_v52 = vsel %vm8918_vm7, %v4425_v47, %v4426_v60  ;;  %v10209_v17 = vadd.f32 %v4420_v51, %v3965_v58 }
 0x2f7   : > { %v4394_v12 = vcombine.high %v4392_v59, %v4392_v59  ;;  %v4442_v37 = vrot.slane %v4392_v59, 7  ;;  %v4433_v26 = vsel %vm8918_vm7, %v4431_v20, %v4432_v54  ;;  %v10213_v62 = vadd.f32 %v4427_v52, %v3973_v48 }
 0x2f8   : > { %v4438_v34 = vrot.slane %v4436_v57, 2  ;;  %v4439_v25 = vrot.slane %v4393_v13, 7  ;;  %v10215_v32 = vadd.f32 %v4433_v26, %v3990_v31  ;;  %v4430_v23 = vsel %vm8918_vm7, %v4428_v46, %v4429_v43 }
 0x2f9   : > { %v4444_v3 = vrot.slane %v4442_v37, 2  ;;  %v4445_v41 = vrot.slane %v4394_v12, 7  ;;  %v4437_v22 = vsel %vm8918_vm7, %v6961_v16, %v4436_v57  ;;  %v10221_v58 = vadd.f32 %v4430_v23, %v3982_v61 }
 0x2fa   : > { %v4441_v19 = vrot.slane %v4439_v25, 2  ;;  %v10223_v33 = vadd.f32 %v4437_v22, %v3991_v40  ;;  %v4440_v36 = vsel %vm8918_vm7, %v4438_v34, %v4439_v25  ;;  %v4008_v48 = vcombine.high %v4000_v38, %v4000_v38 }
 0x2fb   : > { %v4446_v8 = vsel %vm8918_vm7, %v4444_v3, %v4445_v41  ;;  %v10229_v27 = vadd.f32 %v4440_v36, %v4000_v38 }
 0x2fc   : > { %v4443_v42 = vsel %vm8918_vm7, %v4441_v19, %v4442_v37  ;;  %v10233_v7 = vadd.f32 %v4446_v8, %v4007_v5 }
 0x2fd   : > { %v10235_v53 = vadd.f32 %v4443_v42, %v4008_v48 }
 0x310   : > { %v4706_v61 = vpop.f32.mrb[48].mxu0  ;;  %v5136_v31 = vpop.f32.mrb[48].mxu1 }
 0x311   : > { %v4708_v0 = vpop.f32.mrb[49].mxu0  ;;  %v5138_v49 = vpop.f32.mrb[49].mxu1 }
 0x312   : > { %v4743_v60 = vcombine.low %v4706_v61, %v4708_v0  ;;  %v4744_v14 = vcombine.high %v4706_v61, %v4708_v0  ;;  %v4710_v47 = vpop.f32.mrb[50].mxu0  ;;  %v5173_v40 = vcombine.low %v5136_v31, %v5138_v49  ;;  %v5174_v10 = vcombine.high %v5136_v31, %v5138_v49  ;;  %v5140_v63 = vpop.f32.mrb[50].mxu1 }
 0x313   : > { %v4712_v39 = vpop.f32.mrb[51].mxu0  ;;  %v5142_v9 = vpop.f32.mrb[51].mxu1 }
 0x314   : > { %v4751_v50 = vrot.slane %v4743_v60, %v8337_v44  ;;  %v4758_v43 = vrot.slane %v4744_v14, %v8337_v44  ;;  %v4761_v54 = vcombine.low %v4710_v47, %v4712_v39  ;;  %v4762_v56 = vcombine.high %v4710_v47, %v4712_v39 }
 0x315   : > { %v5181_v35 = vrot.slane %v5173_v40, %v8337_v44  ;;  %v5188_v15 = vrot.slane %v5174_v10, %v8337_v44  ;;  %v5191_v46 = vcombine.low %v5140_v63, %v5142_v9  ;;  %v5192_v16 = vcombine.high %v5140_v63, %v5142_v9 }
 0x316   : > { %v4759_v4 = vcombine.high %v4751_v50, %v4751_v50  ;;  %v4760_v30 = vcombine.high %v4758_v43, %v4758_v43  ;;  %v4848_v20 = vadd.f32 %v4758_v43, %v10161_v1  ;;  %v4769_v38 = vrot.slane %v4761_v54, %v8337_v44 }
 0x317   : > { %v5189_v24 = vcombine.high %v5181_v35, %v5181_v35  ;;  %v5190_v11 = vcombine.high %v5188_v15, %v5188_v15  ;;  %v4776_v5 = vrot.slane %v4762_v56, %v8337_v44  ;;  %v5199_v59 = vrot.slane %v5191_v46, %v8337_v44 }
 0x318   : > { %v4847_v13 = vadd.f32 %v4759_v4, %v10159_v55  ;;  %v4849_v57 = vadd.f32 %v4760_v30, %v10163_v29  ;;  %v4850_v51 = vadd.f32 %v4769_v38, %v10172_v18  ;;  %v5206_v52 = vrot.slane %v5192_v16, %v8337_v44  ;;  %v4716_v12 = vpop.f32.mrb[52].mxu0  ;;  %v5146_v25 = vpop.f32.mrb[52].mxu1 }
 0x319   : > { %v10249_v37 = vadd.f32 %v5189_v24, %v4848_v20  ;;  %v4777_v1 = vcombine.high %v4776_v5, %v4776_v5  ;;  %v4851_v26 = vadd.f32 %v4776_v5, %v10174_v2  ;;  %v5207_v34 = vcombine.high %v5199_v59, %v5199_v59  ;;  %v4718_v3 = vpop.f32.mrb[53].mxu0  ;;  %v5148_v22 = vpop.f32.mrb[53].mxu1 }
 0x31a   : > { %v10252_v41 = vadd.f32 %v5181_v35, %v4847_v13  ;;  %v10254_v23 = vadd.f32 %v5188_v15, %v4849_v57  ;;  %v10256_v55 = vadd.f32 %v5190_v11, %v4850_v51  ;;  %v5208_v29 = vcombine.high %v5206_v52, %v5206_v52  ;;  %v4720_v18 = vpop.f32.mrb[54].mxu0  ;;  %v5150_v42 = vpop.f32.mrb[54].mxu1 }
 0x31b   : > { %v4852_v19 = vadd.f32 %v4777_v1, %v10180_v6  ;;  %v10259_v36 = vadd.f32 %v5207_v34, %v4851_v26  ;;  %v4778_v48 = vcombine.low %v4716_v12, %v4718_v3  ;;  %v4779_v8 = vcombine.high %v4716_v12, %v4718_v3  ;;  %v4722_v2 = vpop.f32.mrb[55].mxu0  ;;  %v5152_v14 = vpop.f32.mrb[55].mxu1 }
 0x31c   : > { %v5209_v61 = vcombine.low %v5146_v25, %v5148_v22  ;;  %v5210_v31 = vcombine.high %v5146_v25, %v5148_v22  ;;  %v4796_v0 = vcombine.low %v4720_v18, %v4722_v2  ;;  %v4797_v60 = vcombine.high %v4720_v18, %v4722_v2 }
 0x31d   : > { %v10261_v49 = vadd.f32 %v5206_v52, %v4852_v19  ;;  %v4786_v47 = vrot.slane %v4778_v48, %v8337_v44  ;;  %v4793_v40 = vrot.slane %v4779_v8, %v8337_v44  ;;  %v5226_v10 = vcombine.low %v5150_v42, %v5152_v14 }
 0x31e   : > { %v5217_v6 = vrot.slane %v5209_v61, %v8337_v44  ;;  %v5224_v63 = vrot.slane %v5210_v31, %v8337_v44  ;;  %v4804_v39 = vrot.slane %v4796_v0, %v8337_v44  ;;  %v4811_v50 = vrot.slane %v4797_v60, %v8337_v44 }
 0x31f   : > { %v4794_v43 = vcombine.high %v4786_v47, %v4786_v47  ;;  %v4795_v54 = vcombine.high %v4793_v40, %v4793_v40  ;;  %v4853_v56 = vadd.f32 %v4786_v47, %v10201_v28  ;;  %v5227_v9 = vcombine.high %v5150_v42, %v5152_v14 }
 0x320   : > { %v5225_v35 = vcombine.high %v5224_v63, %v5224_v63  ;;  %v4812_v15 = vcombine.high %v4804_v39, %v4804_v39  ;;  %v4856_v46 = vadd.f32 %v4804_v39, %v10213_v62  ;;  %v4858_v16 = vadd.f32 %v4811_v50, %v10215_v32  ;;  %v4726_v4 = vpop.f32.mrb[56].mxu0  ;;  %v5156_v11 = vpop.f32.mrb[56].mxu1  ;;  %v7231_v50 = vld [vmem:[%s8195_s10 + $0x28] sm:$0x11] }
 0x321   : > { %v4855_v30 = vadd.f32 %v4795_v54, %v10203_v45  ;;  %v10273_v20 = vadd.f32 %v5208_v29, %v4853_v56  ;;  %v4854_v38 = vadd.f32 %v4794_v43, %v10209_v17  ;;  %v5234_v24 = vrot.slane %v5226_v10, %v8337_v44  ;;  %v4728_v5 = vpop.f32.mrb[57].mxu0  ;;  %v5158_v57 = vpop.f32.mrb[57].mxu1  ;;  %v7228_v10 = vld [vmem:[%s8195_s10 + $0x10] sm:$0xff] }
 0x322   : > { %v10277_v59 = vadd.f32 %v5225_v35, %v4856_v46  ;;  %v4857_v28 = vadd.f32 %v4812_v15, %v10221_v58  ;;  %v5241_v13 = vrot.slane %v5227_v9, %v8337_v44  ;;  %v4813_v62 = vcombine.low %v4726_v4, %v4728_v5  ;;  %v4730_v32 = vpop.f32.mrb[58].mxu0  ;;  %v5160_v17 = vpop.f32.mrb[58].mxu1  ;;  %v7232_v54 = vld [vmem:[%s8195_s10 + $0x30] sm:$0xff]  ;;  %v10311_v9 = vld [vmem:[%s8195_s10 + $0x38] sm:$0x11] }
 0x323   : > { %v10281_v51 = vadd.f32 %v5217_v6, %v4854_v38  ;;  %v10283_v45 = vadd.f32 %v5224_v63, %v4855_v30  ;;  %v5242_v52 = vcombine.high %v5234_v24, %v5234_v24  ;;  %v4814_v12 = vcombine.high %v4726_v4, %v4728_v5  ;;  %v4731_v1 = vpop.f32.mrb[59].mxu0  ;;  %v5161_v3 = vpop.f32.mrb[59].mxu1  ;;  %v7229_v6 = vld [vmem:[%s8195_s10 + $0x18] sm:$0x11] }
 0x324   : > { %v10285_v26 = vadd.f32 %v5234_v24, %v4857_v28  ;;  %v4821_v34 = vrot.slane %v4813_v62, %v8337_v44  ;;  %v5244_v25 = vcombine.low %v5156_v11, %v5158_v57  ;;  %v5245_v22 = vcombine.high %v5156_v11, %v5158_v57 }
 0x325   : > { %v10288_v58 = vadd.f32 %v5242_v52, %v4858_v16  ;;  %v4828_v29 = vrot.slane %v4814_v12, %v8337_v44  ;;  %v5243_v18 = vcombine.high %v5241_v13, %v5241_v13  ;;  %v6124_v63 = vunpack.c.l.bf16 %v7228_v10 }
 0x326   : > { %v4829_v19 = vcombine.high %v4821_v34, %v4821_v34  ;;  %v4859_v48 = vadd.f32 %v4821_v34, %v10223_v33  ;;  %v5252_v8 = vrot.slane %v5244_v25, %v8337_v44  ;;  %v5259_v14 = vrot.slane %v5245_v22, %v8337_v44 }
 0x327   : > { %v4830_v42 = vcombine.high %v4828_v29, %v4828_v29  ;;  %v4861_v2 = vadd.f32 %v4828_v29, %v10235_v53  ;;  %v7230_v53 = vld [vmem:[%s8195_s10 + $0x20] sm:$0xff]  ;;  %v6125_v39 = vunpack.c.h.bf16 %v7228_v10  ;;  %v6126_v43 = vunpack.c.l.bf16 %v7229_v6 }
 0x328   : > { %v10294_v61 = vadd.f32 %v5243_v18, %v4859_v48  ;;  %v4860_v31 = vadd.f32 %v4829_v19, %v10229_v27  ;;  %v5260_v0 = vcombine.high %v5252_v8, %v5252_v8  ;;  %v6127_v27 = vunpack.c.h.bf16 %v7229_v6 }
 0x329   : > { %v4862_v60 = vadd.f32 %v4830_v42, %v10233_v7  ;;  %v6128_v56 = vunpack.c.l.bf16 %v7230_v53  ;;  %v6129_v7 = vunpack.c.h.bf16 %v7230_v53  ;;  %v6130_v35 = vunpack.c.l.bf16 %v7231_v50 }
 0x32a   : > { %v10299_v47 = vadd.f32 %v5252_v8, %v4860_v31  ;;  %v10301_v33 = vadd.f32 %v5260_v0, %v4861_v2  ;;  %v6131_v15 = vunpack.c.h.bf16 %v7231_v50  ;;  %v10313_v46 = vmul.f32 0.7, %v6124_v63 }
 0x32b   : > { %v10303_v40 = vadd.f32 %v5259_v14, %v4862_v60  ;;  %v10315_v16 = vmul.f32 0.7, %v6125_v39  ;;  %v6132_v4 = vunpack.c.l.bf16 %v7232_v54  ;;  %v10317_v30 = vmul.f32 0.7, %v6126_v43 }
 0x32c   : > { %v10319_v38 = vmul.f32 0.7, %v6127_v27  ;;  %v6133_v24 = vunpack.c.h.bf16 %v7232_v54  ;;  %v6134_v11 = vunpack.c.l.bf16 %v10311_v9  ;;  %v10322_v28 = vmul.f32 0.7, %v6128_v56 }
 0x32d   : > { %v10324_v13 = vmul.f32 0.7, %v6129_v7  ;;  %v10326_v32 = vmul.f32 0.7, %v6130_v35  ;;  %v10328_v52 = vmul.f32 0.7, %v6131_v15  ;;  %v6135_v25 = vunpack.c.h.bf16 %v10311_v9 }
 0x32e   : > { %v10331_v3 = vmul.f32 0.7, %v6132_v4  ;;  %v10333_v48 = vmul.f32 0.7, %v6133_v24  ;;  %v10335_v8 = vmul.f32 0.7, %v6134_v11 }
 0x351   : > { %v5520_v5 = vpop.f32.mrb[60].mxu0  ;;  %v5958_v62 = vpop.f32.mrb[60].mxu1 }
 0x352   : > { %v5522_v57 = vpop.f32.mrb[61].mxu0  ;;  %v5960_v1 = vpop.f32.mrb[61].mxu1 }
 0x353   : > { %v5557_v12 = vcombine.low %v5520_v5, %v5522_v57  ;;  %v5558_v17 = vcombine.high %v5520_v5, %v5522_v57  ;;  %v5524_v34 = vpop.f32.mrb[62].mxu0  ;;  %v5995_v29 = vcombine.low %v5958_v62, %v5960_v1  ;;  %v5996_v22 = vcombine.high %v5958_v62, %v5960_v1  ;;  %v5962_v18 = vpop.f32.mrb[62].mxu1 }
 0x354   : > { %v5526_v19 = vpop.f32.mrb[63].mxu0  ;;  %v5964_v60 = vpop.f32.mrb[63].mxu1 }
 0x355   : > { %v5565_v42 = vrot.slane %v5557_v12, %v8337_v44  ;;  %v5572_v2 = vrot.slane %v5558_v17, %v8337_v44  ;;  %v5575_v31 = vcombine.low %v5524_v34, %v5526_v19  ;;  %v5576_v0 = vcombine.high %v5524_v34, %v5526_v19 }
 0x356   : > { %v6003_v14 = vrot.slane %v5995_v29, %v8337_v44  ;;  %v6010_v10 = vrot.slane %v5996_v22, %v8337_v44  ;;  %v6013_v6 = vcombine.low %v5962_v18, %v5964_v60  ;;  %v6014_v53 = vcombine.high %v5962_v18, %v5964_v60 }
 0x357   : > { %v5573_v63 = vcombine.high %v5565_v42, %v5565_v42  ;;  %v5574_v39 = vcombine.high %v5572_v2, %v5572_v2  ;;  %v7160_v50 = vrot.slane %v5565_v42, 9  ;;  %v5652_v43 = vrot.slane %v5572_v2, 7 }
 0x358   : > { %v6011_v27 = vcombine.high %v6003_v14, %v6003_v14  ;;  %v6012_v54 = vcombine.high %v6010_v10, %v6010_v10  ;;  %v5583_v56 = vrot.slane %v5575_v31, %v8337_v44  ;;  %v5590_v7 = vrot.slane %v5576_v0, %v8337_v44 }
 0x359   : > { %v5649_v35 = vrot.slane %v5573_v63, 7  ;;  %v5654_v15 = vrot.slane %v5652_v43, 2  ;;  %v5655_v4 = vrot.slane %v5574_v39, 7  ;;  %v6021_v24 = vrot.slane %v6013_v6, %v8337_v44  ;;  %v5530_v11 = vpop.f32.mrb[64].mxu0  ;;  %v5968_v17 = vpop.f32.mrb[64].mxu1 }
 0x35a   : > { %v5591_v5 = vcombine.high %v5583_v56, %v5583_v56  ;;  %v5592_v62 = vcombine.high %v5590_v7, %v5590_v7  ;;  %v5658_v57 = vrot.slane %v5583_v56, 7  ;;  %v5662_v12 = vrot.slane %v5590_v7, 7  ;;  %v5532_v1 = vpop.f32.mrb[65].mxu0  ;;  %v5970_v19 = vpop.f32.mrb[65].mxu1 }
 0x35b   : > { %v5651_v34 = vrot.slane %v5649_v35, 2  ;;  %v5657_v29 = vrot.slane %v5655_v4, 2  ;;  %v5650_v22 = vsel %vm8918_vm7, %v7160_v50, %v5649_v35  ;;  %v5656_v18 = vsel %vm8918_vm7, %v5654_v15, %v5655_v4  ;;  %v10348_v42 = vpop.f32.mrb[66].mxu0  ;;  %v10352_v14 = vpop.f32.mrb[66].mxu1 }
 0x35c   : > { %v5715_v2 = vadd.f32 %v5650_v22, %v10252_v41  ;;  %v5717_v31 = vadd.f32 %v5656_v18, %v10254_v23  ;;  %v7161_v0 = vrot.slane %v5591_v5, 9  ;;  %v5664_v60 = vrot.slane %v5662_v12, 2  ;;  %v10354_v6 = vpop.f32.mrb[67].mxu0  ;;  %v10361_v7 = vpop.f32.mrb[67].mxu1 }
 0x35d   : > { %v5653_v63 = vsel %vm8918_vm7, %v5651_v34, %v5652_v43  ;;  %v5665_v39 = vrot.slane %v5592_v62, 7  ;;  %v5659_v50 = vsel %vm8918_vm7, %v5657_v29, %v5658_v57  ;;  %v6028_v56 = vrot.slane %v6014_v53, %v8337_v44 }
 0x35e   : > { %v5716_v41 = vadd.f32 %v5653_v63, %v10249_v37  ;;  %v6099_v23 = vadd.f32 %v6011_v27, %v5715_v2  ;;  %v6101_v35 = vadd.f32 %v6012_v54, %v5717_v31  ;;  %v5663_v15 = vsel %vm8918_vm7, %v7161_v0, %v5662_v12 }
 0x35f   : > { %v5667_v4 = vrot.slane %v5665_v39, 2  ;;  %v5666_v5 = vsel %vm8918_vm7, %v5664_v60, %v5665_v39  ;;  %v5718_v43 = vadd.f32 %v5659_v50, %v10256_v55  ;;  %v5719_v62 = vadd.f32 %v5663_v15, %v10259_v36 }
 0x360   : > { %v6100_v57 = vadd.f32 %v6010_v10, %v5716_v41  ;;  %v6156_v34 = vmul.f32 0.3, %v6099_v23  ;;  %v6158_v53 = vmul.f32 0.3, %v6101_v35  ;;  %v5720_v29 = vadd.f32 %v5666_v5, %v10261_v49 }
 0x361   : > { %v6029_v22 = vcombine.high %v6028_v56, %v6028_v56  ;;  %v6102_v37 = vadd.f32 %v6021_v24, %v5718_v43  ;;  %v6103_v27 = vadd.f32 %v6028_v56, %v5719_v62  ;;  %v5593_v54 = vcombine.low %v5530_v11, %v5532_v1  ;;  %v10371_v18 = vpop.f32.mrb[68].mxu0  ;;  %v10373_v60 = vpop.f32.mrb[68].mxu1 }
 0x362   : > { %v6157_v12 = vmul.f32 0.3, %v6100_v57  ;;  %v5594_v2 = vcombine.high %v5530_v11, %v5532_v1  ;;  %v6030_v31 = vcombine.low %v5968_v17, %v5970_v19  ;;  %v6031_v0 = vcombine.high %v5968_v17, %v5970_v19  ;;  %v10375_v55 = vpop.f32.mrb[69].mxu0  ;;  %v10378_v49 = vpop.f32.mrb[69].mxu1 }
 0x363   : > { %v6104_v36 = vadd.f32 %v6029_v22, %v5720_v29  ;;  %v6159_v10 = vmul.f32 0.3, %v6102_v37  ;;  %v6160_v63 = vmul.f32 0.3, %v6103_v27  ;;  %v5601_v39 = vrot.slane %v5593_v54, %v8337_v44  ;;  %v5544_v24 = vpop.f32.mrb[70].mxu0  ;;  %v5982_v17 = vpop.f32.mrb[70].mxu1 }
 0x364   : > { %v6188_v50 = vcombine.low %v6156_v34, %v6157_v12  ;;  %v5608_v56 = vrot.slane %v5594_v2, %v8337_v44  ;;  %v6038_v41 = vrot.slane %v6030_v31, %v8337_v44  ;;  %v6045_v11 = vrot.slane %v6031_v0, %v8337_v44  ;;  %v5545_v1 = vpop.f32.mrb[71].mxu0  ;;  %v5983_v5 = vpop.f32.mrb[71].mxu1 }
 0x365   : > { %v6161_v19 = vmul.f32 0.3, %v6104_v36  ;;  %v6189_v23 = vcombine.low %v6158_v53, %v6159_v10  ;;  %v5609_v35 = vcombine.high %v5601_v39, %v5601_v39  ;;  %v5668_v15 = vrot.slane %v5601_v39, 7 }
 0x366   : > { %v6196_v43 = vrot.slane %v6188_v50, %v8337_v44  ;;  %v5610_v62 = vcombine.high %v5608_v56, %v5608_v56  ;;  %v7162_v57 = vrot.slane %v5608_v56, 9  ;;  %v6046_v29 = vcombine.high %v6038_v41, %v6038_v41 }
 0x367   : > { %v6203_v34 = vrot.slane %v6189_v23, %v8337_v44  ;;  %v6206_v22 = vcombine.low %v6160_v63, %v6161_v19  ;;  %v5670_v37 = vrot.slane %v5668_v15, 2  ;;  %v5671_v27 = vrot.slane %v5609_v35, 7 }
 0x368   : > { %v5675_v54 = vrot.slane %v5610_v62, 7  ;;  %v5669_v12 = vsel %vm8918_vm7, %v5667_v4, %v5668_v15  ;;  %v6047_v2 = vcombine.high %v6045_v11, %v6045_v11  ;;  %v5611_v53 = vcombine.low %v10348_v42, %v10354_v6 }
 0x369   : > { %v6204_v31 = vcombine.low %v6196_v43, %v6203_v34  ;;  %v6205_v0 = vcombine.high %v6196_v43, %v6203_v34  ;;  %v6214_v36 = vrot.slane %v6206_v22, %v8337_v44  ;;  %v5672_v10 = vsel %vm8918_vm7, %v5670_v37, %v5671_v27 }
 0x36a   : > { %v5677_v39 = vrot.slane %v5675_v54, 2  ;;  %v5676_v63 = vsel %vm8918_vm7, %v7162_v57, %v5675_v54  ;;  %v5721_v24 = vadd.f32 %v5669_v12, %v10273_v20  ;;  %v5722_v50 = vadd.f32 %v5672_v10, %v10281_v51 }
 0x36b   : > { %v6260_v4 = vrot.slane %v6204_v31, 7  ;;  %v6261_v56 = vrot.slane %v6205_v0, 7  ;;  %v5723_v11 = vadd.f32 %v5676_v63, %v10283_v45  ;;  %v5612_v17 = vcombine.high %v10348_v42, %v10354_v6 }
 0x36c   : > { %v6105_v1 = vadd.f32 %v6038_v41, %v5721_v24  ;;  %v6106_v19 = vadd.f32 %v6046_v29, %v5722_v50  ;;  %v5619_v23 = vrot.slane %v5611_v53, %v8337_v44  ;;  %v6048_v35 = vcombine.low %v10352_v14, %v10361_v7 }
 0x36d   : > { %v6276_v15 = vadd.f32 %v6260_v4, %v10313_v46  ;;  %v6277_v20 = vadd.f32 %v6261_v56, %v10315_v16  ;;  %v6278_v51 = vadd.f32 %v6260_v4, %v10317_v30  ;;  %v6279_v5 = vadd.f32 %v6261_v56, %v10319_v38 }
 0x36e   : > { %v6107_v45 = vadd.f32 %v6047_v2, %v5723_v11  ;;  %v6162_v43 = vmul.f32 0.3, %v6105_v1  ;;  %v6163_v62 = vmul.f32 0.3, %v6106_v19  ;;  %v5626_v42 = vrot.slane %v5612_v17, %v8337_v44 }
 0x36f   : > { %v6292_v6 = vmul.f32 1.3130643, %v6276_v15  ;;  %v6293_v41 = vmul.f32 1.3130643, %v6277_v20  ;;  %v6294_v57 = vmul.f32 1.3130643, %v6278_v51  ;;  %v5627_v29 = vcombine.high %v5619_v23, %v5619_v23 }
 0x370   : > { %v6295_v34 = vmul.f32 1.3130643, %v6279_v5  ;;  %v10408_v22 = vmul.f32 0.3, %v6107_v45  ;;  %v6207_v46 = vcombine.low %v6162_v43, %v6163_v62  ;;  %v5628_v37 = vcombine.high %v5626_v42, %v5626_v42 }
 0x371   : > { %v7236_v16 = vclamps-f32 %v6292_v6, 256.0  ;;  %v7237_v27 = vclamps-f32 %v6293_v41, 256.0  ;;  %v7238_v30 = vclamps-f32 %v6294_v57, 256.0  ;;  %v5678_v54 = vrot.slane %v5619_v23, 7 }
 0x372   : > { %v7239_v38 = vclamps-f32 %v6295_v34, 256.0  ;;  %v6221_v12 = vrot.slane %v6207_v46, %v8337_v44  ;;  %v5681_v2 = vrot.slane %v5627_v29, 7  ;;  %v5684_v53 = vrot.slane %v5626_v42, 7 }
 0x373   : > { %v6357_v31 = vrot.slane %v7236_v16, 1  ;;  %v6358_v0 = vrot.slane %v7238_v30, 1  ;;  %v6360_v10 = vrot.slane %v7237_v27, 1  ;;  %v5680_v63 = vrot.slane %v5678_v54, 2 }
 0x374   : > { %v6361_v24 = vrot.slane %v7239_v38, 1  ;;  %v6222_v50 = vcombine.low %v6214_v36, %v6221_v12  ;;  %v6223_v4 = vcombine.high %v6214_v36, %v6221_v12  ;;  %v5683_v56 = vrot.slane %v5681_v2, 2 }
 0x375   : > { %v6359_v11 = vsel %vm10532_vm12, %v6357_v31, %v6358_v0  ;;  %v7163_v17 = vrot.slane %v5628_v37, 9  ;;  %v5679_v1 = vsel %vm8918_vm7, %v5677_v39, %v5678_v54  ;;  %v5682_v19 = vsel %vm8918_vm7, %v5680_v63, %v5681_v2 }
 0x376   : > { %v6362_v23 = vsel %vm10533_vm13, %v6360_v10, %v6361_v24  ;;  %6389 = vst [vmem:[%s10414_s7] sm:$0xff] %v6359_v11  ;;  %v6262_v15 = vrot.slane %v6222_v50, 7  ;;  %v6263_v20 = vrot.slane %v6223_v4, 7  ;;  %v5685_v51 = vsel %vm8918_vm7, %v5683_v56, %v5684_v53 }
 0x377   : > { %6390 = vst [vmem:[%s10414_s7 + $0x8] sm:$0xff] %v6362_v23  ;;  %v5724_v36 = vadd.f32 %v5679_v1, %v10277_v59  ;;  %v5725_v5 = vadd.f32 %v5682_v19, %v10285_v26  ;;  %v5726_v45 = vadd.f32 %v5685_v51, %v10288_v58  ;;  %v6049_v39 = vcombine.high %v10352_v14, %v10361_v7 }
 0x378   : > { %v6280_v43 = vadd.f32 %v6262_v15, %v10322_v28  ;;  %v6281_v62 = vadd.f32 %v6263_v20, %v10324_v13  ;;  %v6282_v42 = vadd.f32 %v6262_v15, %v10326_v32  ;;  %v6283_v6 = vadd.f32 %v6263_v20, %v10328_v52 }
 0x379   : > { %v6056_v41 = vrot.slane %v6048_v35, %v8337_v44  ;;  %v6063_v57 = vrot.slane %v6049_v39, %v8337_v44  ;;  %v5629_v59 = vcombine.low %v10371_v18, %v10375_v55  ;;  %v5630_v26 = vcombine.high %v10371_v18, %v10375_v55 }
 0x37a   : > { %v6296_v58 = vmul.f32 1.3130643, %v6280_v43  ;;  %v6297_v14 = vmul.f32 1.3130643, %v6281_v62  ;;  %v6298_v7 = vmul.f32 1.3130643, %v6282_v42  ;;  %v6065_v28 = vcombine.low %v10373_v60, %v10378_v49 }
 0x37b   : > { %v6299_v13 = vmul.f32 1.3130643, %v6283_v6  ;;  %v6064_v32 = vcombine.high %v6056_v41, %v6056_v41  ;;  %v6108_v29 = vadd.f32 %v6056_v41, %v5724_v36  ;;  %v6110_v52 = vadd.f32 %v6063_v57, %v5726_v45 }
 0x37c   : > { %v7240_v34 = vclamps-f32 %v6296_v58, 256.0  ;;  %v7241_v35 = vclamps-f32 %v6297_v14, 256.0  ;;  %v7242_v46 = vclamps-f32 %v6298_v7, 256.0  ;;  %v5637_v37 = vrot.slane %v5629_v59, %v8337_v44  ;;  %v7234_v7 = vld [vmem:[%s8195_s10 + $0x40] sm:$0xff] }
 0x37d   : > { %v7243_v16 = vclamps-f32 %v6299_v13, 256.0  ;;  %v6109_v27 = vadd.f32 %v6064_v32, %v5725_v5  ;;  %v6165_v30 = vmul.f32 0.3, %v6108_v29  ;;  %v6167_v18 = vmul.f32 0.3, %v6110_v52 }
 0x37e   : > { %v6363_v55 = vrot.slane %v7240_v34, 1  ;;  %v6364_v54 = vrot.slane %v7242_v46, 1  ;;  %v6366_v38 = vrot.slane %v7241_v35, 1  ;;  %v5644_v12 = vrot.slane %v5630_v26, %v8337_v44 }
 0x37f   : > { %v6367_v2 = vrot.slane %v7243_v16, 1  ;;  %v6166_v53 = vmul.f32 0.3, %v6109_v27  ;;  %v6224_v31 = vcombine.low %v10408_v22, %v6165_v30  ;;  %v5645_v0 = vcombine.high %v5637_v37, %v5637_v37 }
 0x380   : > { %v6365_v10 = vsel %vm10534_vm14, %v6363_v55, %v6364_v54  ;;  %v5646_v63 = vcombine.high %v5644_v12, %v5644_v12  ;;  %v5688_v24 = vrot.slane %v5637_v37, 7  ;;  %v5694_v50 = vrot.slane %v5644_v12, 7 }
 0x381   : > { %v6368_v4 = vsel %vm10535_vm15, %v6366_v38, %v6367_v2  ;;  %6391 = vst [vmem:[%s10414_s7 + $0x10] sm:$0xff] %v6365_v10  ;;  %v6225_v56 = vcombine.low %v6166_v53, %v6167_v18  ;;  %v6232_v11 = vrot.slane %v6224_v31, %v8337_v44  ;;  %v5691_v1 = vrot.slane %v5645_v0, 7 }
 0x382   : > { %6392 = vst [vmem:[%s10414_s7 + $0x18] sm:$0xff] %v6368_v4  ;;  %v5690_v19 = vrot.slane %v5688_v24, 2  ;;  %v5696_v23 = vrot.slane %v5694_v50, 2  ;;  %v5697_v15 = vrot.slane %v5646_v63, 7  ;;  %v5689_v22 = vsel %vm8918_vm7, %v7163_v17, %v5688_v24 }
 0x383   : > { %v6239_v20 = vrot.slane %v6225_v56, %v8337_v44  ;;  %v5693_v51 = vrot.slane %v5691_v1, 2  ;;  %v5727_v36 = vadd.f32 %v5689_v22, %v10294_v61  ;;  %v6066_v5 = vcombine.high %v10373_v60, %v10378_v49 }
 0x384   : > { %v6151_v45 = vmul.f32 0.7, %v6135_v25  ;;  %v5692_v39 = vsel %vm8918_vm7, %v5690_v19, %v5691_v1  ;;  %v5698_v43 = vsel %vm8918_vm7, %v5696_v23, %v5697_v15  ;;  %v6073_v17 = vrot.slane %v6065_v28, %v8337_v44 }
 0x385   : > { %v6240_v62 = vcombine.low %v6232_v11, %v6239_v20  ;;  %v6241_v42 = vcombine.high %v6232_v11, %v6239_v20  ;;  %v5695_v61 = vsel %vm8918_vm7, %v5693_v51, %v5694_v50  ;;  %v5728_v6 = vadd.f32 %v5692_v39, %v10299_v47  ;;  %vm10536_vm7 = vmmov %vm10528_vm3 }
 0x386   : > { %v5729_v9 = vadd.f32 %v5695_v61, %v10301_v33  ;;  %v5730_v25 = vadd.f32 %v5698_v43, %v10303_v40  ;;  %v6080_v60 = vrot.slane %v6066_v5, %v8337_v44  ;;  %v6081_v49 = vcombine.high %v6073_v17, %v6073_v17  ;;  %v7235_v33 = vld [vmem:[%s8195_s10 + $0x48] sm:$0x11] }
 0x387   : > { %v6264_v41 = vrot.slane %v6240_v62, 7  ;;  %v6265_v57 = vrot.slane %v6241_v42, 7  ;;  %v6111_v59 = vadd.f32 %v6073_v17, %v5727_v36  ;;  %v6136_v37 = vunpack.c.l.bf16 %v7234_v7 }
 0x388   : > { %v6082_v26 = vcombine.high %v6080_v60, %v6080_v60  ;;  %v6112_v58 = vadd.f32 %v6081_v49, %v5728_v6  ;;  %v6113_v14 = vadd.f32 %v6080_v60, %v5729_v9  ;;  %v6137_v27 = vunpack.c.h.bf16 %v7234_v7 }
 0x389   : > { %v6284_v21 = vadd.f32 %v6264_v41, %v10331_v3  ;;  %v6285_v28 = vadd.f32 %v6265_v57, %v10333_v48  ;;  %v6286_v47 = vadd.f32 %v6264_v41, %v10335_v8  ;;  %v6287_v13 = vadd.f32 %v6265_v57, %v6151_v45 }
 0x38a   : > { %v6114_v32 = vadd.f32 %v6082_v26, %v5730_v25  ;;  %v6168_v40 = vmul.f32 0.3, %v6111_v59  ;;  %v6169_v29 = vmul.f32 0.3, %v6112_v58  ;;  %v6170_v52 = vmul.f32 0.3, %v6113_v14 }
 0x38b   : > { %v6300_v34 = vmul.f32 1.3130643, %v6284_v21  ;;  %v6301_v35 = vmul.f32 1.3130643, %v6285_v28  ;;  %v6302_v46 = vmul.f32 1.3130643, %v6286_v47  ;;  %v6138_v48 = vunpack.c.l.bf16 %v7235_v33 }
 0x38c   : > { %v6303_v16 = vmul.f32 1.3130643, %v6287_v13  ;;  %v6171_v30 = vmul.f32 0.3, %v6114_v32  ;;  %v6242_v18 = vcombine.low %v6168_v40, %v6169_v29  ;;  %v6139_v38 = vunpack.c.h.bf16 %v7235_v33 }
 0x38d   : > { %v7244_v55 = vclamps-f32 %v6300_v34, 256.0  ;;  %v7245_v3 = vclamps-f32 %v6301_v35, 256.0  ;;  %v7246_v54 = vclamps-f32 %v6302_v46, 256.0  ;;  %v6152_v50 = vmul.f32 0.7, %v6136_v37 }
 0x38e   : > { %v7247_v8 = vclamps-f32 %v6303_v16, 256.0  ;;  %v6243_v12 = vcombine.low %v6170_v52, %v6171_v30  ;;  %v6250_v10 = vrot.slane %v6242_v18, %v8337_v44  ;;  %v6153_v4 = vmul.f32 0.7, %v6137_v27 }
 0x38f   : > { %v6369_v2 = vrot.slane %v7244_v55, 1  ;;  %v6370_v53 = vrot.slane %v7246_v54, 1  ;;  %v6372_v31 = vrot.slane %v7245_v3, 1  ;;  %v6154_v56 = vmul.f32 0.7, %v6138_v48 }
 0x390   : > { %v6373_v0 = vrot.slane %v7247_v8, 1  ;;  %v6257_v63 = vrot.slane %v6243_v12, %v8337_v44  ;;  %v6155_v1 = vmul.f32 0.7, %v6139_v38 }
 0x391   : > { %v6371_v24 = vsel %vm10536_vm7, %v6369_v2, %v6370_v53 }
 0x392   : > { %v6374_v11 = vsel %vm10537_vm2, %v6372_v31, %v6373_v0  ;;  %6393 = vst [vmem:[%s10414_s7 + $0x20] sm:$0xff] %v6371_v24  ;;  %v6258_v19 = vcombine.low %v6250_v10, %v6257_v63  ;;  %v6259_v23 = vcombine.high %v6250_v10, %v6257_v63 }
 0x393   : > { %6394 = vst [vmem:[%s10414_s7 + $0x28] sm:$0xff] %v6374_v11 }
 0x394   : > { %v6266_v15 = vrot.slane %v6258_v19, 7  ;;  %v6267_v22 = vrot.slane %v6259_v23, 7 }
 0x396   : > { %v6288_v20 = vadd.f32 %v6266_v15, %v6152_v50  ;;  %v6289_v51 = vadd.f32 %v6267_v22, %v6153_v4  ;;  %v6290_v36 = vadd.f32 %v6266_v15, %v6154_v56  ;;  %v6291_v5 = vadd.f32 %v6267_v22, %v6155_v1 }
 0x398   : > { %v6304_v44 = vmul.f32 1.3130643, %v6288_v20  ;;  %v6305_v45 = vmul.f32 1.3130643, %v6289_v51  ;;  %v6306_v39 = vmul.f32 1.3130643, %v6290_v36 }
 0x399   : > { %v6307_v43 = vmul.f32 1.3130643, %v6291_v5 }
 0x39a   : > { %v7248_v17 = vclamps-f32 %v6304_v44, 256.0  ;;  %v7249_v62 = vclamps-f32 %v6305_v45, 256.0  ;;  %v7250_v42 = vclamps-f32 %v6306_v39, 256.0 }
 0x39b   : > { %v7251_v61 = vclamps-f32 %v6307_v43, 256.0 }
 0x39c   : > { %v6375_v6 = vrot.slane %v7248_v17, 1  ;;  %v6376_v9 = vrot.slane %v7250_v42, 1  ;;  %v6378_v25 = vrot.slane %v7249_v62, 1 }
 0x39d   : > { %v6379_v60 = vrot.slane %v7251_v61, 1 }
 0x39e   : > { %v6377_v49 = vsel %vm10538_vm4, %v6375_v6, %v6376_v9 }
 0x39f   : > { %v6380_v41 = vsel %vm10539_vm5, %v6378_v25, %v6379_v60  ;;  %6395 = vst [vmem:[%s10414_s7 + $0x30] sm:$0xff] %v6377_v49 }
 0x3a0   : > { %6396 = vst [vmem:[%s10414_s7 + $0x38] sm:$0xff] %v6380_v41 }
 0x3a1 PF: > { %s14_s15 = sadd.s32 1, %s8016_s15  }
 0x3a2   : > { %p11_p4 = scmp.ge.s32.totalorder %s14_s15, 4  }
 0x3a4   :  { %13 = sbr.rel (!%p11_p4) target bundleno = 1 (0x1), region = 80 }

</bundles_post_ra>
